<compile_context>
chip_gen: v6e
topology: v6e:2x2x1
jax: 0.10.0
libtpu: 0.0.40
codegen_flags: <defaults>
</compile_context>

<pallas_src>
import math

import jax
import jax.numpy as jnp
from jax import lax
from jax.experimental import pallas as pl
from jax.experimental.pallas import tpu as pltpu


# ----------------------------- geometry constants ---------------------------

KH = KW = 5                    # conv kernel size
H1 = W1 = 32                   # input spatial size
CI1, CO1 = 3, 6                # conv1 channels
OH1 = H1 - KH + 1              # 28  conv1 output spatial
PH1 = OH1 // 2                 # 14  after 2x2/2 pool
CI2, CO2 = CO1, 16             # conv2 channels
OH2 = PH1 - KH + 1             # 10  conv2 output spatial
PH2 = OH2 // 2                 # 5   after 2x2/2 pool
NCLS = 10

LANE = 128                     # lane width / padded N for every GEMM
K1 = KH * KW * CI1             # 75   conv1 im2col K (taps folded into K)
POOL1_Q = PH1 * PH1            # 196  pooled conv1 positions
POOL1_QP = 200                 # padded to a sublane multiple
M1 = 4 * POOL1_QP              # 800  conv1 im2col rows per sample (member-major)
S2_ROWS = POOL1_QP             # 200  pooled conv1 (= conv2 input) rows
TAP_LANES = 16                 # lanes per kernel-row group in S5 (6 used, 16 for clean concat)
K2 = KH * TAP_LANES            # 80   conv2 K after folding the 5 kernel rows
WIDE2 = OH2 * PH1              # 140  conv2 evaluated at every input column ("wide")
S5_ROWS = 144                  # conv2 row-folded input rows (140 + 4 column-tap slack)
FDIM = CO2 * PH2 * PH2         # 400  flattened feature size
B_TILE = 8                     # samples per grid step
FEAT_ROWS = PH2 * PH2 * B_TILE  # 200  position-major feature scratch rows


# ----------------------------- fused LeNet kernel ---------------------------


def _lenet_kernel(x1_ref, w1_ref, b1_ref, w2_ref, b2_ref,
                  w1f_ref, b1f_ref, w2f_ref, b2f_ref, w3f_ref, b3f_ref,
                  o_ref, s2_ref, s5_ref, wide2_ref, feat_ref):
    """conv1+pool -> conv2+pool -> fc1 -> fc2 -> fc3 for B_TILE samples."""

    def sample_body(b, carry):
        # ---- conv1: one K=75 GEMM on the pre-built im2col (rows grouped by pool member)
        wide1 = jnp.dot(x1_ref[b], w1_ref[...],
                        preferred_element_type=jnp.float32)          # (800, 128) f32
        # 2x2/2 max-pool == elementwise max of the four member slabs, then bias+ReLU
        pooled = jnp.maximum(
            jnp.maximum(wide1[0:POOL1_QP], wide1[POOL1_QP:2 * POOL1_QP]),
            jnp.maximum(wide1[2 * POOL1_QP:3 * POOL1_QP], wide1[3 * POOL1_QP:4 * POOL1_QP]))
        s2 = jnp.maximum(pooled + b1_ref[...], 0.0)                  # (200, 128) f32
        s2_ref[...] = s2                                             # lane-dense scratch

        # ---- conv2: fold the 5 kernel rows into K (S5), loop only the 5 kernel columns
        s5_ref[...] = jnp.concatenate(
            [s2_ref[pl.ds(PH1 * i, S5_ROWS), 0:TAP_LANES] for i in range(KH)],
            axis=1)                                                  # (144, 80) f32
        acc2 = jnp.dot(s5_ref[pl.ds(0, WIDE2), :].astype(jnp.bfloat16), w2_ref[0],
                       preferred_element_type=jnp.float32)           # (140, 128)
        for j in range(1, KW):
            acc2 = acc2 + jnp.dot(
                s5_ref[pl.ds(j, WIDE2), :].astype(jnp.bfloat16), w2_ref[j],
                preferred_element_type=jnp.float32)
        wide2_ref[0:WIDE2, :] = acc2                                 # written once

        # ---- fused 2x2/2 max-pool + bias + ReLU; scatter rows position-major for fc1
        b2v = b2_ref[0]
        for pr in range(PH2):
            for pc in range(PH2):
                r00 = (2 * pr) * PH1 + 2 * pc
                r10 = (2 * pr + 1) * PH1 + 2 * pc
                v = jnp.maximum(
                    jnp.maximum(wide2_ref[r00, :], wide2_ref[r00 + 1, :]),
                    jnp.maximum(wide2_ref[r10, :], wide2_ref[r10 + 1, :]))
                v = jnp.maximum(v + b2v, 0.0)                        # (128,) lanes 16+ are 0
                feat_ref[(pr * PH2 + pc) * B_TILE + b] = v
        return carry

    lax.fori_loop(0, B_TILE, sample_body, 0)

    # ---- MLP head on the whole batch tile (fused into the same launch) -----
    h = jnp.zeros((B_TILE, LANE), jnp.float32)
    for p in range(PH2 * PH2):                       # 25 spatial positions, K=16 each
        lhs = feat_ref[pl.ds(p * B_TILE, B_TILE), 0:CO2].astype(jnp.bfloat16)
        h = h + jnp.dot(lhs, w1f_ref[pl.ds(p * CO2, CO2), :],
                        preferred_element_type=jnp.float32)
    h = jnp.maximum(h + b1f_ref[...], 0.0)
    h = jnp.dot(h.astype(jnp.bfloat16), w2f_ref[...],
                preferred_element_type=jnp.float32)
    h = jnp.maximum(h + b2f_ref[...], 0.0)
    out = jnp.dot(h.astype(jnp.bfloat16), w3f_ref[...],
                  preferred_element_type=jnp.float32) + b3f_ref[...]
    o_ref[...] = out                                                  # lane-dense (B,128) store


def lenet_pallas(x1, packed, n_pad):
    grid = (n_pad // B_TILE,)
    return pl.pallas_call(
        _lenet_kernel,
        out_shape=jax.ShapeDtypeStruct((n_pad, LANE), jnp.float32),
        grid_spec=pltpu.PrefetchScalarGridSpec(
            num_scalar_prefetch=0,
            grid=grid,
            in_specs=[
                pl.BlockSpec((B_TILE, M1, K1), lambda s: (s, 0, 0)),       # conv1 im2col
                pl.BlockSpec((K1, LANE), lambda s: (0, 0)),                # w1
                pl.BlockSpec((1, LANE), lambda s: (0, 0)),                 # b1
                pl.BlockSpec((KW, K2, LANE), lambda s: (0, 0, 0)),         # w2 (per column tap)
                pl.BlockSpec((1, LANE), lambda s: (0, 0)),                 # b2
                pl.BlockSpec((FDIM, LANE), lambda s: (0, 0)),              # fc1
                pl.BlockSpec((1, LANE), lambda s: (0, 0)),                 # fc1 bias
                pl.BlockSpec((LANE, LANE), lambda s: (0, 0)),              # fc2
                pl.BlockSpec((1, LANE), lambda s: (0, 0)),                 # fc2 bias
                pl.BlockSpec((LANE, LANE), lambda s: (0, 0)),              # fc3
                pl.BlockSpec((1, LANE), lambda s: (0, 0)),                 # fc3 bias
            ],
            out_specs=pl.BlockSpec((B_TILE, LANE), lambda s: (s, 0)),
            scratch_shapes=[
                pltpu.VMEM((S2_ROWS, LANE), jnp.float32),   # pooled conv1 (lane-dense)
                pltpu.VMEM((S5_ROWS, K2), jnp.float32),     # row-folded conv2 input
                pltpu.VMEM((S5_ROWS, LANE), jnp.float32),   # conv2 wide output
                pltpu.VMEM((FEAT_ROWS, LANE), jnp.float32),  # position-major features
            ],
        ),
        compiler_params=pltpu.CompilerParams(
            dimension_semantics=("parallel",),
            vmem_limit_bytes=32 * 1024 * 1024,
        ),
    )(x1, packed["w1"], packed["b1"], packed["w2"], packed["b2"],
      packed["f1"], packed["b1f"], packed["f2"], packed["b2f"],
      packed["f3"], packed["b3f"])


# ------------------------------- parameters ---------------------------------


def _uniform(key, shape, bound):
    return jax.random.uniform(key, shape, jnp.float32, -bound, bound)


def init_params(key):
    ks = jax.random.split(key, 10)
    p = {}
    b1 = 1.0 / math.sqrt(3 * 5 * 5)
    p["conv1_w"] = _uniform(ks[0], (6, 3, 5, 5), b1)
    p["conv1_b"] = _uniform(ks[1], (6,), b1)
    b2 = 1.0 / math.sqrt(6 * 5 * 5)
    p["conv2_w"] = _uniform(ks[2], (16, 6, 5, 5), b2)
    p["conv2_b"] = _uniform(ks[3], (16,), b2)
    b3 = 1.0 / math.sqrt(16 * 5 * 5)
    p["fc1_w"] = _uniform(ks[4], (120, 400), b3)   # PyTorch Linear: (out, in)
    p["fc1_b"] = _uniform(ks[5], (120,), b3)
    b4 = 1.0 / math.sqrt(120)
    p["fc2_w"] = _uniform(ks[6], (84, 120), b4)
    p["fc2_b"] = _uniform(ks[7], (84,), b4)
    b5 = 1.0 / math.sqrt(84)
    p["fc3_w"] = _uniform(ks[8], (10, 84), b5)
    p["fc3_b"] = _uniform(ks[9], (84,), b5) if False else _uniform(ks[9], (10,), b5)
    return p


def pack_params(p):
    """One-time repack into GEMM-ready, lane-padded, bf16 layouts."""
    # conv1: rows ordered 3*(5*i + j) + c  (matches the im2col K order)
    w1 = jnp.transpose(p["conv1_w"], (2, 3, 1, 0)).reshape(K1, CO1)
    w1 = jnp.pad(w1, ((0, 0), (0, LANE - CO1))).astype(jnp.bfloat16)
    b1 = jnp.pad(p["conv1_b"], (0, LANE - CO1)).reshape(1, LANE).astype(jnp.float32)

    # conv2: per column-tap j, rows ordered 16*i + c (kernel rows folded into K)
    w2 = jnp.transpose(p["conv2_w"], (3, 2, 1, 0))              # (j, i, c, o)
    w2 = jnp.pad(w2, ((0, 0), (0, 0), (0, TAP_LANES - CI2), (0, 0)))
    w2 = w2.reshape(KW, K2, CO2)
    w2 = jnp.pad(w2, ((0, 0), (0, 0), (0, LANE - CO2))).astype(jnp.bfloat16)
    b2 = jnp.pad(p["conv2_b"], (0, LANE - CO2)).reshape(1, LANE).astype(jnp.float32)

    # fc1: fold PyTorch's (c, h, w) flatten into (h, w, c) rows = position-major K
    f1 = p["fc1_w"].reshape(120, CO2, PH2, PH2)
    f1 = jnp.transpose(f1, (2, 3, 1, 0)).reshape(FDIM, 120)
    f1 = jnp.pad(f1, ((0, 0), (0, LANE - 120))).astype(jnp.bfloat16)
    b1f = jnp.pad(p["fc1_b"], (0, LANE - 120)).reshape(1, LANE).astype(jnp.float32)

    f2 = jnp.pad(p["fc2_w"].T, ((0, LANE - 120), (0, LANE - 84))).astype(jnp.bfloat16)
    b2f = jnp.pad(p["fc2_b"], (0, LANE - 84)).reshape(1, LANE).astype(jnp.float32)

    f3 = jnp.pad(p["fc3_w"].T, ((0, LANE - 84), (0, LANE - NCLS))).astype(jnp.bfloat16)
    b3f = jnp.pad(p["fc3_b"], (0, LANE - NCLS)).reshape(1, LANE).astype(jnp.float32)

    return {"w1": w1, "b1": b1, "w2": w2, "b2": b2,
            "f1": f1, "b1f": b1f, "f2": f2, "b2f": b2f, "f3": f3, "b3f": b3f}


# --------------------------------- forward ----------------------------------


def _pack_input(x_nchw):
    """conv1 im2col (K=75), rows grouped (pool-member, pooled-row, pooled-col)."""
    n = x_nchw.shape[0]
    xt = jnp.transpose(x_nchw, (0, 2, 3, 1)).astype(jnp.float32)           # (N,32,32,3)
    cols = jnp.stack(
        [xt[:, i:i + OH1, j:j + OH1, :] for i in range(KH) for j in range(KW)],
        axis=3)                                                            # (N,28,28,25,3)
    cols = cols.reshape(n, OH1, OH1, K1)                                   # (N,28,28,75)
    cols = cols.reshape(n, PH1, 2, PH1, 2, K1)
    cols = jnp.transpose(cols, (0, 2, 4, 1, 3, 5))                         # (N,mr,mc,pr,pc,K)
    cols = cols.reshape(n, 4, POOL1_Q, K1)
    cols = jnp.pad(cols, ((0, 0), (0, 0), (0, POOL1_QP - POOL1_Q), (0, 0)))
    return cols.reshape(n, M1, K1).astype(jnp.bfloat16)


def lenet_forward(packed, x_nchw):
    n = x_nchw.shape[0]
    n_pad = -(-n // B_TILE) * B_TILE
    if n_pad != n:
        x_nchw = jnp.pad(x_nchw, ((0, n_pad - n), (0, 0), (0, 0), (0, 0)))
    x1 = _pack_input(x_nchw)                                   # (n_pad, 800, 75) bf16
    logits = lenet_pallas(x1, packed, n_pad)                   # (n_pad, 128)
    return logits[:n, :NCLS]


# ------------------------------ pure-JAX reference ---------------------------


def _reference_forward(params, x_nchw):
    dn = ("NCHW", "OIHW", "NCHW")
    y = jax.lax.conv_general_dilated(x_nchw, params["conv1_w"], (1, 1), "VALID",
                                     dimension_numbers=dn)
    y = jax.nn.relu(y + params["conv1_b"][None, :, None, None])
    y = jax.lax.reduce_window(y, -jnp.inf, jax.lax.max, (1, 1, 2, 2), (1, 1, 2, 2), "VALID")
    y = jax.lax.conv_general_dilated(y, params["conv2_w"], (1, 1), "VALID",
                                     dimension_numbers=dn)
    y = jax.nn.relu(y + params["conv2_b"][None, :, None, None])
    y = jax.lax.reduce_window(y, -jnp.inf, jax.lax.max, (1, 1, 2, 2), (1, 1, 2, 2), "VALID")
    y = y.reshape(y.shape[0], FDIM)
    y = jax.nn.relu(y @ params["fc1_w"].T + params["fc1_b"])
    y = jax.nn.relu(y @ params["fc2_w"].T + params["fc2_b"])
    return y @ params["fc3_w"].T + params["fc3_b"]


if __name__ == "__main__":
    key = jax.random.PRNGKey(0)
    pkey, xkey = jax.random.split(key)
    params = init_params(pkey)
    packed = pack_params(params)   # one-time pre-pack, outside the jitted forward

    fwd = jax.jit(lenet_forward)

    # LeNet geometry requires 3x32x32 inputs so the flatten is 16*5*5 = 400.
    for batch in (2, 13):          # grid of 1 tile and of 2 tiles (ragged batch)
        x = jax.random.normal(jax.random.fold_in(xkey, batch),
                              (batch, 3, 32, 32), dtype=jnp.float32)
        out = jax.block_until_ready(fwd(packed, x))
        assert out.shape == (batch, NCLS) and out.dtype == jnp.float32
        ref = _reference_forward(params, x)
        max_err = float(jnp.max(jnp.abs(out - ref)))
        assert bool(jnp.allclose(out, ref, atol=2e-2, rtol=2e-2)), \
            f"mismatch vs reference (batch={batch}): {max_err}"

    print("KERNEL_OK")
</pallas_src>

<mosaic_0001>
module attributes {stable_mosaic.version = 11 : i64} {
  func.func @_lenet_kernel(%arg0: i32, %arg1: memref<8x800x75xbf16, #tpu.memory_space<vmem>>, %arg2: memref<75x128xbf16, #tpu.memory_space<vmem>>, %arg3: memref<1x128xf32, #tpu.memory_space<vmem>>, %arg4: memref<5x80x128xbf16, #tpu.memory_space<vmem>>, %arg5: memref<1x128xf32, #tpu.memory_space<vmem>>, %arg6: memref<400x128xbf16, #tpu.memory_space<vmem>>, %arg7: memref<1x128xf32, #tpu.memory_space<vmem>>, %arg8: memref<128x128xbf16, #tpu.memory_space<vmem>>, %arg9: memref<1x128xf32, #tpu.memory_space<vmem>>, %arg10: memref<128x128xbf16, #tpu.memory_space<vmem>>, %arg11: memref<1x128xf32, #tpu.memory_space<vmem>>, %arg12: memref<8x128xf32, #tpu.memory_space<vmem>>, %arg13: memref<200x128xf32, #tpu.memory_space<vmem>>, %arg14: memref<144x80xf32, #tpu.memory_space<vmem>>, %arg15: memref<144x128xf32, #tpu.memory_space<vmem>>, %arg16: memref<200x128xf32, #tpu.memory_space<vmem>>) attributes {dimension_semantics = [#tpu.dimension_semantics<parallel>], iteration_bounds = array<i64: 1>, scalar_prefetch = 0 : i64, scratch_operands = 4 : i64, tpu.core_type = #tpu.core_type<tc>, window_params = [{transform_indices = @transform_0, window_bounds = array<i64: 8, 800, 75>}, {pipeline_mode = #tpu.pipeline_mode<synchronous>, transform_indices = @transform_1, window_bounds = array<i64: 75, 128>}, {pipeline_mode = #tpu.pipeline_mode<synchronous>, transform_indices = @transform_2, window_bounds = array<i64: 1, 128>}, {pipeline_mode = #tpu.pipeline_mode<synchronous>, transform_indices = @transform_3, window_bounds = array<i64: 5, 80, 128>}, {pipeline_mode = #tpu.pipeline_mode<synchronous>, transform_indices = @transform_4, window_bounds = array<i64: 1, 128>}, {pipeline_mode = #tpu.pipeline_mode<synchronous>, transform_indices = @transform_5, window_bounds = array<i64: 400, 128>}, {pipeline_mode = #tpu.pipeline_mode<synchronous>, transform_indices = @transform_6, window_bounds = array<i64: 1, 128>}, {pipeline_mode = #tpu.pipeline_mode<synchronous>, transform_indices = @transform_7, window_bounds = array<i64: 128, 128>}, {pipeline_mode = #tpu.pipeline_mode<synchronous>, transform_indices = @transform_8, window_bounds = array<i64: 1, 128>}, {pipeline_mode = #tpu.pipeline_mode<synchronous>, transform_indices = @transform_9, window_bounds = array<i64: 128, 128>}, {pipeline_mode = #tpu.pipeline_mode<synchronous>, transform_indices = @transform_10, window_bounds = array<i64: 1, 128>}, {transform_indices = @transform_11, window_bounds = array<i64: 8, 128>}]} {
    %c0_i32 = arith.constant 0 : i32
    %c8_i32 = arith.constant 8 : i32
    %0 = arith.addi %c0_i32, %c8_i32 : i32
    %c1_i32 = arith.constant 1 : i32
    scf.for %arg17 = %c0_i32 to %0 step %c1_i32  : i32 {
      %147 = arith.index_cast %arg17 : i32 to index
      %c0_105 = arith.constant 0 : index
      %c0_106 = arith.constant 0 : index
      %148 = vector.load %arg1[%147, %c0_105, %c0_106] : memref<8x800x75xbf16, #tpu.memory_space<vmem>>, vector<1x800x75xbf16>
      %149 = vector.shape_cast %148 : vector<1x800x75xbf16> to vector<800x75xbf16>
      %c0_107 = arith.constant 0 : index
      %c0_108 = arith.constant 0 : index
      %150 = vector.load %arg2[%c0_107, %c0_108] : memref<75x128xbf16, #tpu.memory_space<vmem>>, vector<75x128xbf16>
      %cst_109 = arith.constant dense<0.000000e+00> : vector<800x128xf32>
      %151 = tpu.matmul %149, %150, %cst_109 {dimension_numbers = #tpu.dot_dimension_numbers<[1], [0], [0], [1], [0, 0, 1, 1], [], []>} : vector<800x75xbf16>, vector<75x128xbf16>, vector<800x128xf32> -> vector<800x128xf32>
      %152 = vector.extract_strided_slice %151 {offsets = [0, 0], sizes = [200, 128], strides = [1, 1]} : vector<800x128xf32> to vector<200x128xf32>
      %153 = vector.extract_strided_slice %151 {offsets = [200, 0], sizes = [200, 128], strides = [1, 1]} : vector<800x128xf32> to vector<200x128xf32>
      %154 = arith.maximumf %152, %153 : vector<200x128xf32>
      %155 = vector.extract_strided_slice %151 {offsets = [400, 0], sizes = [200, 128], strides = [1, 1]} : vector<800x128xf32> to vector<200x128xf32>
      %156 = vector.extract_strided_slice %151 {offsets = [600, 0], sizes = [200, 128], strides = [1, 1]} : vector<800x128xf32> to vector<200x128xf32>
      %157 = arith.maximumf %155, %156 : vector<200x128xf32>
      %158 = arith.maximumf %154, %157 : vector<200x128xf32>
      %c0_110 = arith.constant 0 : index
      %c0_111 = arith.constant 0 : index
      %159 = vector.load %arg3[%c0_110, %c0_111] : memref<1x128xf32, #tpu.memory_space<vmem>>, vector<1x128xf32>
      %160 = vector.broadcast %159 : vector<1x128xf32> to vector<200x128xf32>
      %161 = arith.addf %158, %160 : vector<200x128xf32>
      %cst_112 = arith.constant 0.000000e+00 : f32
      %162 = vector.broadcast %cst_112 : f32 to vector<200x128xf32>
      %163 = arith.maximumf %161, %162 : vector<200x128xf32>
      %c0_113 = arith.constant 0 : index
      %c0_114 = arith.constant 0 : index
      %164 = vector.load %arg13[%c0_113, %c0_114] : memref<200x128xf32, #tpu.memory_space<vmem>>, vector<200x128xf32>
      tpu.vector_store %arg13[%c0_113, %c0_114], %163 {strides = array<i32>} : memref<200x128xf32, #tpu.memory_space<vmem>>, vector<200x128xf32>,
      %c0_115 = arith.constant 0 : index
      %c0_116 = arith.constant 0 : index
      %165 = vector.load %arg13[%c0_115, %c0_116] : memref<200x128xf32, #tpu.memory_space<vmem>>, vector<144x16xf32>
      %c14 = arith.constant 14 : index
      %c0_117 = arith.constant 0 : index
      %166 = vector.load %arg13[%c14, %c0_117] : memref<200x128xf32, #tpu.memory_space<vmem>>, vector<144x16xf32>
      %c28 = arith.constant 28 : index
      %c0_118 = arith.constant 0 : index
      %167 = vector.load %arg13[%c28, %c0_118] : memref<200x128xf32, #tpu.memory_space<vmem>>, vector<144x16xf32>
      %c42 = arith.constant 42 : index
      %c0_119 = arith.constant 0 : index
      %168 = vector.load %arg13[%c42, %c0_119] : memref<200x128xf32, #tpu.memory_space<vmem>>, vector<144x16xf32>
      %c56_120 = arith.constant 56 : index
      %c0_121 = arith.constant 0 : index
      %169 = vector.load %arg13[%c56_120, %c0_121] : memref<200x128xf32, #tpu.memory_space<vmem>>, vector<144x16xf32>
      %170 = tpu.concatenate %165, %166, %167, %168, %169 in 1 : vector<144x16xf32>, vector<144x16xf32>, vector<144x16xf32>, vector<144x16xf32>, vector<144x16xf32> -> vector<144x80xf32>
      %c0_122 = arith.constant 0 : index
      %c0_123 = arith.constant 0 : index
      %171 = vector.load %arg14[%c0_122, %c0_123] : memref<144x80xf32, #tpu.memory_space<vmem>>, vector<144x80xf32>
      tpu.vector_store %arg14[%c0_122, %c0_123], %170 {strides = array<i32>} : memref<144x80xf32, #tpu.memory_space<vmem>>, vector<144x80xf32>,
      %c0_124 = arith.constant 0 : index
      %c0_125 = arith.constant 0 : index
      %172 = vector.load %arg14[%c0_124, %c0_125] : memref<144x80xf32, #tpu.memory_space<vmem>>, vector<140x80xf32>
      %173 = arith.truncf %172 : vector<140x80xf32> to vector<140x80xbf16>
      %c0_126 = arith.constant 0 : index
      %c0_127 = arith.constant 0 : index
      %c0_128 = arith.constant 0 : index
      %174 = vector.load %arg4[%c0_126, %c0_127, %c0_128] : memref<5x80x128xbf16, #tpu.memory_space<vmem>>, vector<1x80x128xbf16>
      %175 = vector.shape_cast %174 : vector<1x80x128xbf16> to vector<80x128xbf16>
      %cst_129 = arith.constant dense<0.000000e+00> : vector<140x128xf32>
      %176 = tpu.matmul %173, %175, %cst_129 {dimension_numbers = #tpu.dot_dimension_numbers<[1], [0], [0], [1], [0, 0, 1, 1], [], []>} : vector<140x80xbf16>, vector<80x128xbf16>, vector<140x128xf32> -> vector<140x128xf32>
      %c1 = arith.constant 1 : index
      %c0_130 = arith.constant 0 : index
      %177 = vector.load %arg14[%c1, %c0_130] : memref<144x80xf32, #tpu.memory_space<vmem>>, vector<140x80xf32>
      %178 = arith.truncf %177 : vector<140x80xf32> to vector<140x80xbf16>
      %c1_131 = arith.constant 1 : index
      %c0_132 = arith.constant 0 : index
      %c0_133 = arith.constant 0 : index
      %179 = vector.load %arg4[%c1_131, %c0_132, %c0_133] : memref<5x80x128xbf16, #tpu.memory_space<vmem>>, vector<1x80x128xbf16>
      %180 = vector.shape_cast %179 : vector<1x80x128xbf16> to vector<80x128xbf16>
      %cst_134 = arith.constant dense<0.000000e+00> : vector<140x128xf32>
      %181 = tpu.matmul %178, %180, %cst_134 {dimension_numbers = #tpu.dot_dimension_numbers<[1], [0], [0], [1], [0, 0, 1, 1], [], []>} : vector<140x80xbf16>, vector<80x128xbf16>, vector<140x128xf32> -> vector<140x128xf32>
      %182 = arith.addf %176, %181 : vector<140x128xf32>
      %c2 = arith.constant 2 : index
      %c0_135 = arith.constant 0 : index
      %183 = vector.load %arg14[%c2, %c0_135] : memref<144x80xf32, #tpu.memory_space<vmem>>, vector<140x80xf32>
      %184 = arith.truncf %183 : vector<140x80xf32> to vector<140x80xbf16>
      %c2_136 = arith.constant 2 : index
      %c0_137 = arith.constant 0 : index
      %c0_138 = arith.constant 0 : index
      %185 = vector.load %arg4[%c2_136, %c0_137, %c0_138] : memref<5x80x128xbf16, #tpu.memory_space<vmem>>, vector<1x80x128xbf16>
      %186 = vector.shape_cast %185 : vector<1x80x128xbf16> to vector<80x128xbf16>
      %cst_139 = arith.constant dense<0.000000e+00> : vector<140x128xf32>
      %187 = tpu.matmul %184, %186, %cst_139 {dimension_numbers = #tpu.dot_dimension_numbers<[1], [0], [0], [1], [0, 0, 1, 1], [], []>} : vector<140x80xbf16>, vector<80x128xbf16>, vector<140x128xf32> -> vector<140x128xf32>
      %188 = arith.addf %182, %187 : vector<140x128xf32>
      %c3 = arith.constant 3 : index
      %c0_140 = arith.constant 0 : index
      %189 = vector.load %arg14[%c3, %c0_140] : memref<144x80xf32, #tpu.memory_space<vmem>>, vector<140x80xf32>
      %190 = arith.truncf %189 : vector<140x80xf32> to vector<140x80xbf16>
      %c3_141 = arith.constant 3 : index
      %c0_142 = arith.constant 0 : index
      %c0_143 = arith.constant 0 : index
      %191 = vector.load %arg4[%c3_141, %c0_142, %c0_143] : memref<5x80x128xbf16, #tpu.memory_space<vmem>>, vector<1x80x128xbf16>
      %192 = vector.shape_cast %191 : vector<1x80x128xbf16> to vector<80x128xbf16>
      %cst_144 = arith.constant dense<0.000000e+00> : vector<140x128xf32>
      %193 = tpu.matmul %190, %192, %cst_144 {dimension_numbers = #tpu.dot_dimension_numbers<[1], [0], [0], [1], [0, 0, 1, 1], [], []>} : vector<140x80xbf16>, vector<80x128xbf16>, vector<140x128xf32> -> vector<140x128xf32>
      %194 = arith.addf %188, %193 : vector<140x128xf32>
      %c4 = arith.constant 4 : index
      %c0_145 = arith.constant 0 : index
      %195 = vector.load %arg14[%c4, %c0_145] : memref<144x80xf32, #tpu.memory_space<vmem>>, vector<140x80xf32>
      %196 = arith.truncf %195 : vector<140x80xf32> to vector<140x80xbf16>
      %c4_146 = arith.constant 4 : index
      %c0_147 = arith.constant 0 : index
      %c0_148 = arith.constant 0 : index
      %197 = vector.load %arg4[%c4_146, %c0_147, %c0_148] : memref<5x80x128xbf16, #tpu.memory_space<vmem>>, vector<1x80x128xbf16>
      %198 = vector.shape_cast %197 : vector<1x80x128xbf16> to vector<80x128xbf16>
      %cst_149 = arith.constant dense<0.000000e+00> : vector<140x128xf32>
      %199 = tpu.matmul %196, %198, %cst_149 {dimension_numbers = #tpu.dot_dimension_numbers<[1], [0], [0], [1], [0, 0, 1, 1], [], []>} : vector<140x80xbf16>, vector<80x128xbf16>, vector<140x128xf32> -> vector<140x128xf32>
      %200 = arith.addf %194, %199 : vector<140x128xf32>
      %c0_150 = arith.constant 0 : index
      %c0_151 = arith.constant 0 : index
      %201 = vector.load %arg15[%c0_150, %c0_151] : memref<144x128xf32, #tpu.memory_space<vmem>>, vector<140x128xf32>
      tpu.vector_store %arg15[%c0_150, %c0_151], %200 {strides = array<i32>} : memref<144x128xf32, #tpu.memory_space<vmem>>, vector<140x128xf32>,
      %c0_152 = arith.constant 0 : index
      %c0_153 = arith.constant 0 : index
      %202 = vector.load %arg5[%c0_152, %c0_153] : memref<1x128xf32, #tpu.memory_space<vmem>>, vector<1x128xf32>
      %203 = vector.shape_cast %202 : vector<1x128xf32> to vector<128xf32>
      %c0_154 = arith.constant 0 : index
      %c0_155 = arith.constant 0 : index
      %204 = vector.load %arg15[%c0_154, %c0_155] : memref<144x128xf32, #tpu.memory_space<vmem>>, vector<1x128xf32>
      %205 = vector.shape_cast %204 : vector<1x128xf32> to vector<128xf32>
      %c1_156 = arith.constant 1 : index
      %c0_157 = arith.constant 0 : index
      %206 = vector.load %arg15[%c1_156, %c0_157] : memref<144x128xf32, #tpu.memory_space<vmem>>, vector<1x128xf32>
      %207 = vector.shape_cast %206 : vector<1x128xf32> to vector<128xf32>
      %208 = arith.maximumf %205, %207 : vector<128xf32>
      %c14_158 = arith.constant 14 : index
      %c0_159 = arith.constant 0 : index
      %209 = vector.load %arg15[%c14_158, %c0_159] : memref<144x128xf32, #tpu.memory_space<vmem>>, vector<1x128xf32>
      %210 = vector.shape_cast %209 : vector<1x128xf32> to vector<128xf32>
      %c15 = arith.constant 15 : index
      %c0_160 = arith.constant 0 : index
      %211 = vector.load %arg15[%c15, %c0_160] : memref<144x128xf32, #tpu.memory_space<vmem>>, vector<1x128xf32>
      %212 = vector.shape_cast %211 : vector<1x128xf32> to vector<128xf32>
      %213 = arith.maximumf %210, %212 : vector<128xf32>
      %214 = arith.maximumf %208, %213 : vector<128xf32>
      %215 = arith.addf %214, %203 : vector<128xf32>
      %cst_161 = arith.constant 0.000000e+00 : f32
      %216 = vector.broadcast %cst_161 : f32 to vector<128xf32>
      %217 = arith.maximumf %215, %216 : vector<128xf32>
      %c0_i32_162 = arith.constant 0 : i32
      %218 = arith.addi %c0_i32_162, %arg17 : i32
      %219 = arith.index_cast %218 : i32 to index
      %c0_163 = arith.constant 0 : index
      %220 = vector.load %arg16[%219, %c0_163] : memref<200x128xf32, #tpu.memory_space<vmem>>, vector<1x128xf32>
      %221 = vector.shape_cast %220 : vector<1x128xf32> to vector<128xf32>
      %222 = vector.shape_cast %217 : vector<128xf32> to vector<1x128xf32>
      tpu.vector_store %arg16[%219, %c0_163], %222 {strides = array<i32>} : memref<200x128xf32, #tpu.memory_space<vmem>>, vector<1x128xf32>,
      %c2_164 = arith.constant 2 : index
      %c0_165 = arith.constant 0 : index
      %223 = vector.load %arg15[%c2_164, %c0_165] : memref<144x128xf32, #tpu.memory_space<vmem>>, vector<1x128xf32>
      %224 = vector.shape_cast %223 : vector<1x128xf32> to vector<128xf32>
      %c3_166 = arith.constant 3 : index
      %c0_167 = arith.constant 0 : index
      %225 = vector.load %arg15[%c3_166, %c0_167] : memref<144x128xf32, #tpu.memory_space<vmem>>, vector<1x128xf32>
      %226 = vector.shape_cast %225 : vector<1x128xf32> to vector<128xf32>
      %227 = arith.maximumf %224, %226 : vector<128xf32>
      %c16_168 = arith.constant 16 : index
      %c0_169 = arith.constant 0 : index
      %228 = vector.load %arg15[%c16_168, %c0_169] : memref<144x128xf32, #tpu.memory_space<vmem>>, vector<1x128xf32>
      %229 = vector.shape_cast %228 : vector<1x128xf32> to vector<128xf32>
      %c17 = arith.constant 17 : index
      %c0_170 = arith.constant 0 : index
      %230 = vector.load %arg15[%c17, %c0_170] : memref<144x128xf32, #tpu.memory_space<vmem>>, vector<1x128xf32>
      %231 = vector.shape_cast %230 : vector<1x128xf32> to vector<128xf32>
      %232 = arith.maximumf %229, %231 : vector<128xf32>
      %233 = arith.maximumf %227, %232 : vector<128xf32>
      %234 = arith.addf %233, %203 : vector<128xf32>
      %cst_171 = arith.constant 0.000000e+00 : f32
      %235 = vector.broadcast %cst_171 : f32 to vector<128xf32>
      %236 = arith.maximumf %234, %235 : vector<128xf32>
      %c8_i32_172 = arith.constant 8 : i32
      %237 = arith.addi %c8_i32_172, %arg17 : i32
      %238 = arith.index_cast %237 : i32 to index
      %c0_173 = arith.constant 0 : index
      %239 = vector.load %arg16[%238, %c0_173] : memref<200x128xf32, #tpu.memory_space<vmem>>, vector<1x128xf32>
      %240 = vector.shape_cast %239 : vector<1x128xf32> to vector<128xf32>
      %241 = vector.shape_cast %236 : vector<128xf32> to vector<1x128xf32>
      tpu.vector_store %arg16[%238, %c0_173], %241 {strides = array<i32>} : memref<200x128xf32, #tpu.memory_space<vmem>>, vector<1x128xf32>,
      %c4_174 = arith.constant 4 : index
      %c0_175 = arith.constant 0 : index
      %242 = vector.load %arg15[%c4_174, %c0_175] : memref<144x128xf32, #tpu.memory_space<vmem>>, vector<1x128xf32>
      %243 = vector.shape_cast %242 : vector<1x128xf32> to vector<128xf32>
      %c5 = arith.constant 5 : index
      %c0_176 = arith.constant 0 : index
      %244 = vector.load %arg15[%c5, %c0_176] : memref<144x128xf32, #tpu.memory_space<vmem>>, vector<1x128xf32>
      %245 = vector.shape_cast %244 : vector<1x128xf32> to vector<128xf32>
      %246 = arith.maximumf %243, %245 : vector<128xf32>
      %c18 = arith.constant 18 : index
      %c0_177 = arith.constant 0 : index
      %247 = vector.load %arg15[%c18, %c0_177] : memref<144x128xf32, #tpu.memory_space<vmem>>, vector<1x128xf32>
      %248 = vector.shape_cast %247 : vector<1x128xf32> to vector<128xf32>
      %c19 = arith.constant 19 : index
      %c0_178 = arith.constant 0 : index
      %249 = vector.load %arg15[%c19, %c0_178] : memref<144x128xf32, #tpu.memory_space<vmem>>, vector<1x128xf32>
      %250 = vector.shape_cast %249 : vector<1x128xf32> to vector<128xf32>
      %251 = arith.maximumf %248, %250 : vector<128xf32>
      %252 = arith.maximumf %246, %251 : vector<128xf32>
      %253 = arith.addf %252, %203 : vector<128xf32>
      %cst_179 = arith.constant 0.000000e+00 : f32
      %254 = vector.broadcast %cst_179 : f32 to vector<128xf32>
      %255 = arith.maximumf %253, %254 : vector<128xf32>
      %c16_i32 = arith.constant 16 : i32
      %256 = arith.addi %c16_i32, %arg17 : i32
      %257 = arith.index_cast %256 : i32 to index
      %c0_180 = arith.constant 0 : index
      %258 = vector.load %arg16[%257, %c0_180] : memref<200x128xf32, #tpu.memory_space<vmem>>, vector<1x128xf32>
      %259 = vector.shape_cast %258 : vector<1x128xf32> to vector<128xf32>
      %260 = vector.shape_cast %255 : vector<128xf32> to vector<1x128xf32>
      tpu.vector_store %arg16[%257, %c0_180], %260 {strides = array<i32>} : memref<200x128xf32, #tpu.memory_space<vmem>>, vector<1x128xf32>,
      %c6 = arith.constant 6 : index
      %c0_181 = arith.constant 0 : index
      %261 = vector.load %arg15[%c6, %c0_181] : memref<144x128xf32, #tpu.memory_space<vmem>>, vector<1x128xf32>
      %262 = vector.shape_cast %261 : vector<1x128xf32> to vector<128xf32>
      %c7 = arith.constant 7 : index
      %c0_182 = arith.constant 0 : index
      %263 = vector.load %arg15[%c7, %c0_182] : memref<144x128xf32, #tpu.memory_space<vmem>>, vector<1x128xf32>
      %264 = vector.shape_cast %263 : vector<1x128xf32> to vector<128xf32>
      %265 = arith.maximumf %262, %264 : vector<128xf32>
      %c20 = arith.constant 20 : index
      %c0_183 = arith.constant 0 : index
      %266 = vector.load %arg15[%c20, %c0_183] : memref<144x128xf32, #tpu.memory_space<vmem>>, vector<1x128xf32>
      %267 = vector.shape_cast %266 : vector<1x128xf32> to vector<128xf32>
      %c21 = arith.constant 21 : index
      %c0_184 = arith.constant 0 : index
      %268 = vector.load %arg15[%c21, %c0_184] : memref<144x128xf32, #tpu.memory_space<vmem>>, vector<1x128xf32>
      %269 = vector.shape_cast %268 : vector<1x128xf32> to vector<128xf32>
      %270 = arith.maximumf %267, %269 : vector<128xf32>
      %271 = arith.maximumf %265, %270 : vector<128xf32>
      %272 = arith.addf %271, %203 : vector<128xf32>
      %cst_185 = arith.constant 0.000000e+00 : f32
      %273 = vector.broadcast %cst_185 : f32 to vector<128xf32>
      %274 = arith.maximumf %272, %273 : vector<128xf32>
      %c24_i32 = arith.constant 24 : i32
      %275 = arith.addi %c24_i32, %arg17 : i32
      %276 = arith.index_cast %275 : i32 to index
      %c0_186 = arith.constant 0 : index
      %277 = vector.load %arg16[%276, %c0_186] : memref<200x128xf32, #tpu.memory_space<vmem>>, vector<1x128xf32>
      %278 = vector.shape_cast %277 : vector<1x128xf32> to vector<128xf32>
      %279 = vector.shape_cast %274 : vector<128xf32> to vector<1x128xf32>
      tpu.vector_store %arg16[%276, %c0_186], %279 {strides = array<i32>} : memref<200x128xf32, #tpu.memory_space<vmem>>, vector<1x128xf32>,
      %c8_187 = arith.constant 8 : index
      %c0_188 = arith.constant 0 : index
      %280 = vector.load %arg15[%c8_187, %c0_188] : memref<144x128xf32, #tpu.memory_space<vmem>>, vector<1x128xf32>
      %281 = vector.shape_cast %280 : vector<1x128xf32> to vector<128xf32>
      %c9 = arith.constant 9 : index
      %c0_189 = arith.constant 0 : index
      %282 = vector.load %arg15[%c9, %c0_189] : memref<144x128xf32, #tpu.memory_space<vmem>>, vector<1x128xf32>
      %283 = vector.shape_cast %282 : vector<1x128xf32> to vector<128xf32>
      %284 = arith.maximumf %281, %283 : vector<128xf32>
      %c22 = arith.constant 22 : index
      %c0_190 = arith.constant 0 : index
      %285 = vector.load %arg15[%c22, %c0_190] : memref<144x128xf32, #tpu.memory_space<vmem>>, vector<1x128xf32>
      %286 = vector.shape_cast %285 : vector<1x128xf32> to vector<128xf32>
      %c23 = arith.constant 23 : index
      %c0_191 = arith.constant 0 : index
      %287 = vector.load %arg15[%c23, %c0_191] : memref<144x128xf32, #tpu.memory_space<vmem>>, vector<1x128xf32>
      %288 = vector.shape_cast %287 : vector<1x128xf32> to vector<128xf32>
      %289 = arith.maximumf %286, %288 : vector<128xf32>
      %290 = arith.maximumf %284, %289 : vector<128xf32>
      %291 = arith.addf %290, %203 : vector<128xf32>
      %cst_192 = arith.constant 0.000000e+00 : f32
      %292 = vector.broadcast %cst_192 : f32 to vector<128xf32>
      %293 = arith.maximumf %291, %292 : vector<128xf32>
      %c32_i32 = arith.constant 32 : i32
      %294 = arith.addi %c32_i32, %arg17 : i32
      %295 = arith.index_cast %294 : i32 to index
      %c0_193 = arith.constant 0 : index
      %296 = vector.load %arg16[%295, %c0_193] : memref<200x128xf32, #tpu.memory_space<vmem>>, vector<1x128xf32>
      %297 = vector.shape_cast %296 : vector<1x128xf32> to vector<128xf32>
      %298 = vector.shape_cast %293 : vector<128xf32> to vector<1x128xf32>
      tpu.vector_store %arg16[%295, %c0_193], %298 {strides = array<i32>} : memref<200x128xf32, #tpu.memory_space<vmem>>, vector<1x128xf32>,
      %c28_194 = arith.constant 28 : index
      %c0_195 = arith.constant 0 : index
      %299 = vector.load %arg15[%c28_194, %c0_195] : memref<144x128xf32, #tpu.memory_space<vmem>>, vector<1x128xf32>
      %300 = vector.shape_cast %299 : vector<1x128xf32> to vector<128xf32>
      %c29 = arith.constant 29 : index
      %c0_196 = arith.constant 0 : index
      %301 = vector.load %arg15[%c29, %c0_196] : memref<144x128xf32, #tpu.memory_space<vmem>>, vector<1x128xf32>
      %302 = vector.shape_cast %301 : vector<1x128xf32> to vector<128xf32>
      %303 = arith.maximumf %300, %302 : vector<128xf32>
      %c42_197 = arith.constant 42 : index
      %c0_198 = arith.constant 0 : index
      %304 = vector.load %arg15[%c42_197, %c0_198] : memref<144x128xf32, #tpu.memory_space<vmem>>, vector<1x128xf32>
      %305 = vector.shape_cast %304 : vector<1x128xf32> to vector<128xf32>
      %c43 = arith.constant 43 : index
      %c0_199 = arith.constant 0 : index
      %306 = vector.load %arg15[%c43, %c0_199] : memref<144x128xf32, #tpu.memory_space<vmem>>, vector<1x128xf32>
      %307 = vector.shape_cast %306 : vector<1x128xf32> to vector<128xf32>
      %308 = arith.maximumf %305, %307 : vector<128xf32>
      %309 = arith.maximumf %303, %308 : vector<128xf32>
      %310 = arith.addf %309, %203 : vector<128xf32>
      %cst_200 = arith.constant 0.000000e+00 : f32
      %311 = vector.broadcast %cst_200 : f32 to vector<128xf32>
      %312 = arith.maximumf %310, %311 : vector<128xf32>
      %c40_i32 = arith.constant 40 : i32
      %313 = arith.addi %c40_i32, %arg17 : i32
      %314 = arith.index_cast %313 : i32 to index
      %c0_201 = arith.constant 0 : index
      %315 = vector.load %arg16[%314, %c0_201] : memref<200x128xf32, #tpu.memory_space<vmem>>, vector<1x128xf32>
      %316 = vector.shape_cast %315 : vector<1x128xf32> to vector<128xf32>
      %317 = vector.shape_cast %312 : vector<128xf32> to vector<1x128xf32>
      tpu.vector_store %arg16[%314, %c0_201], %317 {strides = array<i32>} : memref<200x128xf32, #tpu.memory_space<vmem>>, vector<1x128xf32>,
      %c30 = arith.constant 30 : index
      %c0_202 = arith.constant 0 : index
      %318 = vector.load %arg15[%c30, %c0_202] : memref<144x128xf32, #tpu.memory_space<vmem>>, vector<1x128xf32>
      %319 = vector.shape_cast %318 : vector<1x128xf32> to vector<128xf32>
      %c31 = arith.constant 31 : index
      %c0_203 = arith.constant 0 : index
      %320 = vector.load %arg15[%c31, %c0_203] : memref<144x128xf32, #tpu.memory_space<vmem>>, vector<1x128xf32>
      %321 = vector.shape_cast %320 : vector<1x128xf32> to vector<128xf32>
      %322 = arith.maximumf %319, %321 : vector<128xf32>
      %c44 = arith.constant 44 : index
      %c0_204 = arith.constant 0 : index
      %323 = vector.load %arg15[%c44, %c0_204] : memref<144x128xf32, #tpu.memory_space<vmem>>, vector<1x128xf32>
      %324 = vector.shape_cast %323 : vector<1x128xf32> to vector<128xf32>
      %c45 = arith.constant 45 : index
      %c0_205 = arith.constant 0 : index
      %325 = vector.load %arg15[%c45, %c0_205] : memref<144x128xf32, #tpu.memory_space<vmem>>, vector<1x128xf32>
      %326 = vector.shape_cast %325 : vector<1x128xf32> to vector<128xf32>
      %327 = arith.maximumf %324, %326 : vector<128xf32>
      %328 = arith.maximumf %322, %327 : vector<128xf32>
      %329 = arith.addf %328, %203 : vector<128xf32>
      %cst_206 = arith.constant 0.000000e+00 : f32
      %330 = vector.broadcast %cst_206 : f32 to vector<128xf32>
      %331 = arith.maximumf %329, %330 : vector<128xf32>
      %c48_i32 = arith.constant 48 : i32
      %332 = arith.addi %c48_i32, %arg17 : i32
      %333 = arith.index_cast %332 : i32 to index
      %c0_207 = arith.constant 0 : index
      %334 = vector.load %arg16[%333, %c0_207] : memref<200x128xf32, #tpu.memory_space<vmem>>, vector<1x128xf32>
      %335 = vector.shape_cast %334 : vector<1x128xf32> to vector<128xf32>
      %336 = vector.shape_cast %331 : vector<128xf32> to vector<1x128xf32>
      tpu.vector_store %arg16[%333, %c0_207], %336 {strides = array<i32>} : memref<200x128xf32, #tpu.memory_space<vmem>>, vector<1x128xf32>,
      %c32_208 = arith.constant 32 : index
      %c0_209 = arith.constant 0 : index
      %337 = vector.load %arg15[%c32_208, %c0_209] : memref<144x128xf32, #tpu.memory_space<vmem>>, vector<1x128xf32>
      %338 = vector.shape_cast %337 : vector<1x128xf32> to vector<128xf32>
      %c33 = arith.constant 33 : index
      %c0_210 = arith.constant 0 : index
      %339 = vector.load %arg15[%c33, %c0_210] : memref<144x128xf32, #tpu.memory_space<vmem>>, vector<1x128xf32>
      %340 = vector.shape_cast %339 : vector<1x128xf32> to vector<128xf32>
      %341 = arith.maximumf %338, %340 : vector<128xf32>
      %c46 = arith.constant 46 : index
      %c0_211 = arith.constant 0 : index
      %342 = vector.load %arg15[%c46, %c0_211] : memref<144x128xf32, #tpu.memory_space<vmem>>, vector<1x128xf32>
      %343 = vector.shape_cast %342 : vector<1x128xf32> to vector<128xf32>
      %c47 = arith.constant 47 : index
      %c0_212 = arith.constant 0 : index
      %344 = vector.load %arg15[%c47, %c0_212] : memref<144x128xf32, #tpu.memory_space<vmem>>, vector<1x128xf32>
      %345 = vector.shape_cast %344 : vector<1x128xf32> to vector<128xf32>
      %346 = arith.maximumf %343, %345 : vector<128xf32>
      %347 = arith.maximumf %341, %346 : vector<128xf32>
      %348 = arith.addf %347, %203 : vector<128xf32>
      %cst_213 = arith.constant 0.000000e+00 : f32
      %349 = vector.broadcast %cst_213 : f32 to vector<128xf32>
      %350 = arith.maximumf %348, %349 : vector<128xf32>
      %c56_i32 = arith.constant 56 : i32
      %351 = arith.addi %c56_i32, %arg17 : i32
      %352 = arith.index_cast %351 : i32 to index
      %c0_214 = arith.constant 0 : index
      %353 = vector.load %arg16[%352, %c0_214] : memref<200x128xf32, #tpu.memory_space<vmem>>, vector<1x128xf32>
      %354 = vector.shape_cast %353 : vector<1x128xf32> to vector<128xf32>
      %355 = vector.shape_cast %350 : vector<128xf32> to vector<1x128xf32>
      tpu.vector_store %arg16[%352, %c0_214], %355 {strides = array<i32>} : memref<200x128xf32, #tpu.memory_space<vmem>>, vector<1x128xf32>,
      %c34 = arith.constant 34 : index
      %c0_215 = arith.constant 0 : index
      %356 = vector.load %arg15[%c34, %c0_215] : memref<144x128xf32, #tpu.memory_space<vmem>>, vector<1x128xf32>
      %357 = vector.shape_cast %356 : vector<1x128xf32> to vector<128xf32>
      %c35 = arith.constant 35 : index
      %c0_216 = arith.constant 0 : index
      %358 = vector.load %arg15[%c35, %c0_216] : memref<144x128xf32, #tpu.memory_space<vmem>>, vector<1x128xf32>
      %359 = vector.shape_cast %358 : vector<1x128xf32> to vector<128xf32>
      %360 = arith.maximumf %357, %359 : vector<128xf32>
      %c48_217 = arith.constant 48 : index
      %c0_218 = arith.constant 0 : index
      %361 = vector.load %arg15[%c48_217, %c0_218] : memref<144x128xf32, #tpu.memory_space<vmem>>, vector<1x128xf32>
      %362 = vector.shape_cast %361 : vector<1x128xf32> to vector<128xf32>
      %c49 = arith.constant 49 : index
      %c0_219 = arith.constant 0 : index
      %363 = vector.load %arg15[%c49, %c0_219] : memref<144x128xf32, #tpu.memory_space<vmem>>, vector<1x128xf32>
      %364 = vector.shape_cast %363 : vector<1x128xf32> to vector<128xf32>
      %365 = arith.maximumf %362, %364 : vector<128xf32>
      %366 = arith.maximumf %360, %365 : vector<128xf32>
      %367 = arith.addf %366, %203 : vector<128xf32>
      %cst_220 = arith.constant 0.000000e+00 : f32
      %368 = vector.broadcast %cst_220 : f32 to vector<128xf32>
      %369 = arith.maximumf %367, %368 : vector<128xf32>
      %c64_i32 = arith.constant 64 : i32
      %370 = arith.addi %c64_i32, %arg17 : i32
      %371 = arith.index_cast %370 : i32 to index
      %c0_221 = arith.constant 0 : index
      %372 = vector.load %arg16[%371, %c0_221] : memref<200x128xf32, #tpu.memory_space<vmem>>, vector<1x128xf32>
      %373 = vector.shape_cast %372 : vector<1x128xf32> to vector<128xf32>
      %374 = vector.shape_cast %369 : vector<128xf32> to vector<1x128xf32>
      tpu.vector_store %arg16[%371, %c0_221], %374 {strides = array<i32>} : memref<200x128xf32, #tpu.memory_space<vmem>>, vector<1x128xf32>,
      %c36 = arith.constant 36 : index
      %c0_222 = arith.constant 0 : index
      %375 = vector.load %arg15[%c36, %c0_222] : memref<144x128xf32, #tpu.memory_space<vmem>>, vector<1x128xf32>
      %376 = vector.shape_cast %375 : vector<1x128xf32> to vector<128xf32>
      %c37 = arith.constant 37 : index
      %c0_223 = arith.constant 0 : index
      %377 = vector.load %arg15[%c37, %c0_223] : memref<144x128xf32, #tpu.memory_space<vmem>>, vector<1x128xf32>
      %378 = vector.shape_cast %377 : vector<1x128xf32> to vector<128xf32>
      %379 = arith.maximumf %376, %378 : vector<128xf32>
      %c50 = arith.constant 50 : index
      %c0_224 = arith.constant 0 : index
      %380 = vector.load %arg15[%c50, %c0_224] : memref<144x128xf32, #tpu.memory_space<vmem>>, vector<1x128xf32>
      %381 = vector.shape_cast %380 : vector<1x128xf32> to vector<128xf32>
      %c51 = arith.constant 51 : index
      %c0_225 = arith.constant 0 : index
      %382 = vector.load %arg15[%c51, %c0_225] : memref<144x128xf32, #tpu.memory_space<vmem>>, vector<1x128xf32>
      %383 = vector.shape_cast %382 : vector<1x128xf32> to vector<128xf32>
      %384 = arith.maximumf %381, %383 : vector<128xf32>
      %385 = arith.maximumf %379, %384 : vector<128xf32>
      %386 = arith.addf %385, %203 : vector<128xf32>
      %cst_226 = arith.constant 0.000000e+00 : f32
      %387 = vector.broadcast %cst_226 : f32 to vector<128xf32>
      %388 = arith.maximumf %386, %387 : vector<128xf32>
      %c72_i32 = arith.constant 72 : i32
      %389 = arith.addi %c72_i32, %arg17 : i32
      %390 = arith.index_cast %389 : i32 to index
      %c0_227 = arith.constant 0 : index
      %391 = vector.load %arg16[%390, %c0_227] : memref<200x128xf32, #tpu.memory_space<vmem>>, vector<1x128xf32>
      %392 = vector.shape_cast %391 : vector<1x128xf32> to vector<128xf32>
      %393 = vector.shape_cast %388 : vector<128xf32> to vector<1x128xf32>
      tpu.vector_store %arg16[%390, %c0_227], %393 {strides = array<i32>} : memref<200x128xf32, #tpu.memory_space<vmem>>, vector<1x128xf32>,
      %c56_228 = arith.constant 56 : index
      %c0_229 = arith.constant 0 : index
      %394 = vector.load %arg15[%c56_228, %c0_229] : memref<144x128xf32, #tpu.memory_space<vmem>>, vector<1x128xf32>
      %395 = vector.shape_cast %394 : vector<1x128xf32> to vector<128xf32>
      %c57 = arith.constant 57 : index
      %c0_230 = arith.constant 0 : index
      %396 = vector.load %arg15[%c57, %c0_230] : memref<144x128xf32, #tpu.memory_space<vmem>>, vector<1x128xf32>
      %397 = vector.shape_cast %396 : vector<1x128xf32> to vector<128xf32>
      %398 = arith.maximumf %395, %397 : vector<128xf32>
      %c70 = arith.constant 70 : index
      %c0_231 = arith.constant 0 : index
      %399 = vector.load %arg15[%c70, %c0_231] : memref<144x128xf32, #tpu.memory_space<vmem>>, vector<1x128xf32>
      %400 = vector.shape_cast %399 : vector<1x128xf32> to vector<128xf32>
      %c71 = arith.constant 71 : index
      %c0_232 = arith.constant 0 : index
      %401 = vector.load %arg15[%c71, %c0_232] : memref<144x128xf32, #tpu.memory_space<vmem>>, vector<1x128xf32>
      %402 = vector.shape_cast %401 : vector<1x128xf32> to vector<128xf32>
      %403 = arith.maximumf %400, %402 : vector<128xf32>
      %404 = arith.maximumf %398, %403 : vector<128xf32>
      %405 = arith.addf %404, %203 : vector<128xf32>
      %cst_233 = arith.constant 0.000000e+00 : f32
      %406 = vector.broadcast %cst_233 : f32 to vector<128xf32>
      %407 = arith.maximumf %405, %406 : vector<128xf32>
      %c80_i32 = arith.constant 80 : i32
      %408 = arith.addi %c80_i32, %arg17 : i32
      %409 = arith.index_cast %408 : i32 to index
      %c0_234 = arith.constant 0 : index
      %410 = vector.load %arg16[%409, %c0_234] : memref<200x128xf32, #tpu.memory_space<vmem>>, vector<1x128xf32>
      %411 = vector.shape_cast %410 : vector<1x128xf32> to vector<128xf32>
      %412 = vector.shape_cast %407 : vector<128xf32> to vector<1x128xf32>
      tpu.vector_store %arg16[%409, %c0_234], %412 {strides = array<i32>} : memref<200x128xf32, #tpu.memory_space<vmem>>, vector<1x128xf32>,
      %c58 = arith.constant 58 : index
      %c0_235 = arith.constant 0 : index
      %413 = vector.load %arg15[%c58, %c0_235] : memref<144x128xf32, #tpu.memory_space<vmem>>, vector<1x128xf32>
      %414 = vector.shape_cast %413 : vector<1x128xf32> to vector<128xf32>
      %c59 = arith.constant 59 : index
      %c0_236 = arith.constant 0 : index
      %415 = vector.load %arg15[%c59, %c0_236] : memref<144x128xf32, #tpu.memory_space<vmem>>, vector<1x128xf32>
      %416 = vector.shape_cast %415 : vector<1x128xf32> to vector<128xf32>
      %417 = arith.maximumf %414, %416 : vector<128xf32>
      %c72_237 = arith.constant 72 : index
      %c0_238 = arith.constant 0 : index
      %418 = vector.load %arg15[%c72_237, %c0_238] : memref<144x128xf32, #tpu.memory_space<vmem>>, vector<1x128xf32>
      %419 = vector.shape_cast %418 : vector<1x128xf32> to vector<128xf32>
      %c73 = arith.constant 73 : index
      %c0_239 = arith.constant 0 : index
      %420 = vector.load %arg15[%c73, %c0_239] : memref<144x128xf32, #tpu.memory_space<vmem>>, vector<1x128xf32>
      %421 = vector.shape_cast %420 : vector<1x128xf32> to vector<128xf32>
      %422 = arith.maximumf %419, %421 : vector<128xf32>
      %423 = arith.maximumf %417, %422 : vector<128xf32>
      %424 = arith.addf %423, %203 : vector<128xf32>
      %cst_240 = arith.constant 0.000000e+00 : f32
      %425 = vector.broadcast %cst_240 : f32 to vector<128xf32>
      %426 = arith.maximumf %424, %425 : vector<128xf32>
      %c88_i32 = arith.constant 88 : i32
      %427 = arith.addi %c88_i32, %arg17 : i32
      %428 = arith.index_cast %427 : i32 to index
      %c0_241 = arith.constant 0 : index
      %429 = vector.load %arg16[%428, %c0_241] : memref<200x128xf32, #tpu.memory_space<vmem>>, vector<1x128xf32>
      %430 = vector.shape_cast %429 : vector<1x128xf32> to vector<128xf32>
      %431 = vector.shape_cast %426 : vector<128xf32> to vector<1x128xf32>
      tpu.vector_store %arg16[%428, %c0_241], %431 {strides = array<i32>} : memref<200x128xf32, #tpu.memory_space<vmem>>, vector<1x128xf32>,
      %c60 = arith.constant 60 : index
      %c0_242 = arith.constant 0 : index
      %432 = vector.load %arg15[%c60, %c0_242] : memref<144x128xf32, #tpu.memory_space<vmem>>, vector<1x128xf32>
      %433 = vector.shape_cast %432 : vector<1x128xf32> to vector<128xf32>
      %c61 = arith.constant 61 : index
      %c0_243 = arith.constant 0 : index
      %434 = vector.load %arg15[%c61, %c0_243] : memref<144x128xf32, #tpu.memory_space<vmem>>, vector<1x128xf32>
      %435 = vector.shape_cast %434 : vector<1x128xf32> to vector<128xf32>
      %436 = arith.maximumf %433, %435 : vector<128xf32>
      %c74 = arith.constant 74 : index
      %c0_244 = arith.constant 0 : index
      %437 = vector.load %arg15[%c74, %c0_244] : memref<144x128xf32, #tpu.memory_space<vmem>>, vector<1x128xf32>
      %438 = vector.shape_cast %437 : vector<1x128xf32> to vector<128xf32>
      %c75 = arith.constant 75 : index
      %c0_245 = arith.constant 0 : index
      %439 = vector.load %arg15[%c75, %c0_245] : memref<144x128xf32, #tpu.memory_space<vmem>>, vector<1x128xf32>
      %440 = vector.shape_cast %439 : vector<1x128xf32> to vector<128xf32>
      %441 = arith.maximumf %438, %440 : vector<128xf32>
      %442 = arith.maximumf %436, %441 : vector<128xf32>
      %443 = arith.addf %442, %203 : vector<128xf32>
      %cst_246 = arith.constant 0.000000e+00 : f32
      %444 = vector.broadcast %cst_246 : f32 to vector<128xf32>
      %445 = arith.maximumf %443, %444 : vector<128xf32>
      %c96_i32 = arith.constant 96 : i32
      %446 = arith.addi %c96_i32, %arg17 : i32
      %447 = arith.index_cast %446 : i32 to index
      %c0_247 = arith.constant 0 : index
      %448 = vector.load %arg16[%447, %c0_247] : memref<200x128xf32, #tpu.memory_space<vmem>>, vector<1x128xf32>
      %449 = vector.shape_cast %448 : vector<1x128xf32> to vector<128xf32>
      %450 = vector.shape_cast %445 : vector<128xf32> to vector<1x128xf32>
      tpu.vector_store %arg16[%447, %c0_247], %450 {strides = array<i32>} : memref<200x128xf32, #tpu.memory_space<vmem>>, vector<1x128xf32>,
      %c62 = arith.constant 62 : index
      %c0_248 = arith.constant 0 : index
      %451 = vector.load %arg15[%c62, %c0_248] : memref<144x128xf32, #tpu.memory_space<vmem>>, vector<1x128xf32>
      %452 = vector.shape_cast %451 : vector<1x128xf32> to vector<128xf32>
      %c63 = arith.constant 63 : index
      %c0_249 = arith.constant 0 : index
      %453 = vector.load %arg15[%c63, %c0_249] : memref<144x128xf32, #tpu.memory_space<vmem>>, vector<1x128xf32>
      %454 = vector.shape_cast %453 : vector<1x128xf32> to vector<128xf32>
      %455 = arith.maximumf %452, %454 : vector<128xf32>
      %c76 = arith.constant 76 : index
      %c0_250 = arith.constant 0 : index
      %456 = vector.load %arg15[%c76, %c0_250] : memref<144x128xf32, #tpu.memory_space<vmem>>, vector<1x128xf32>
      %457 = vector.shape_cast %456 : vector<1x128xf32> to vector<128xf32>
      %c77 = arith.constant 77 : index
      %c0_251 = arith.constant 0 : index
      %458 = vector.load %arg15[%c77, %c0_251] : memref<144x128xf32, #tpu.memory_space<vmem>>, vector<1x128xf32>
      %459 = vector.shape_cast %458 : vector<1x128xf32> to vector<128xf32>
      %460 = arith.maximumf %457, %459 : vector<128xf32>
      %461 = arith.maximumf %455, %460 : vector<128xf32>
      %462 = arith.addf %461, %203 : vector<128xf32>
      %cst_252 = arith.constant 0.000000e+00 : f32
      %463 = vector.broadcast %cst_252 : f32 to vector<128xf32>
      %464 = arith.maximumf %462, %463 : vector<128xf32>
      %c104_i32 = arith.constant 104 : i32
      %465 = arith.addi %c104_i32, %arg17 : i32
      %466 = arith.index_cast %465 : i32 to index
      %c0_253 = arith.constant 0 : index
      %467 = vector.load %arg16[%466, %c0_253] : memref<200x128xf32, #tpu.memory_space<vmem>>, vector<1x128xf32>
      %468 = vector.shape_cast %467 : vector<1x128xf32> to vector<128xf32>
      %469 = vector.shape_cast %464 : vector<128xf32> to vector<1x128xf32>
      tpu.vector_store %arg16[%466, %c0_253], %469 {strides = array<i32>} : memref<200x128xf32, #tpu.memory_space<vmem>>, vector<1x128xf32>,
      %c64_254 = arith.constant 64 : index
      %c0_255 = arith.constant 0 : index
      %470 = vector.load %arg15[%c64_254, %c0_255] : memref<144x128xf32, #tpu.memory_space<vmem>>, vector<1x128xf32>
      %471 = vector.shape_cast %470 : vector<1x128xf32> to vector<128xf32>
      %c65 = arith.constant 65 : index
      %c0_256 = arith.constant 0 : index
      %472 = vector.load %arg15[%c65, %c0_256] : memref<144x128xf32, #tpu.memory_space<vmem>>, vector<1x128xf32>
      %473 = vector.shape_cast %472 : vector<1x128xf32> to vector<128xf32>
      %474 = arith.maximumf %471, %473 : vector<128xf32>
      %c78 = arith.constant 78 : index
      %c0_257 = arith.constant 0 : index
      %475 = vector.load %arg15[%c78, %c0_257] : memref<144x128xf32, #tpu.memory_space<vmem>>, vector<1x128xf32>
      %476 = vector.shape_cast %475 : vector<1x128xf32> to vector<128xf32>
      %c79 = arith.constant 79 : index
      %c0_258 = arith.constant 0 : index
      %477 = vector.load %arg15[%c79, %c0_258] : memref<144x128xf32, #tpu.memory_space<vmem>>, vector<1x128xf32>
      %478 = vector.shape_cast %477 : vector<1x128xf32> to vector<128xf32>
      %479 = arith.maximumf %476, %478 : vector<128xf32>
      %480 = arith.maximumf %474, %479 : vector<128xf32>
      %481 = arith.addf %480, %203 : vector<128xf32>
      %cst_259 = arith.constant 0.000000e+00 : f32
      %482 = vector.broadcast %cst_259 : f32 to vector<128xf32>
      %483 = arith.maximumf %481, %482 : vector<128xf32>
      %c112_i32 = arith.constant 112 : i32
      %484 = arith.addi %c112_i32, %arg17 : i32
      %485 = arith.index_cast %484 : i32 to index
      %c0_260 = arith.constant 0 : index
      %486 = vector.load %arg16[%485, %c0_260] : memref<200x128xf32, #tpu.memory_space<vmem>>, vector<1x128xf32>
      %487 = vector.shape_cast %486 : vector<1x128xf32> to vector<128xf32>
      %488 = vector.shape_cast %483 : vector<128xf32> to vector<1x128xf32>
      tpu.vector_store %arg16[%485, %c0_260], %488 {strides = array<i32>} : memref<200x128xf32, #tpu.memory_space<vmem>>, vector<1x128xf32>,
      %c84 = arith.constant 84 : index
      %c0_261 = arith.constant 0 : index
      %489 = vector.load %arg15[%c84, %c0_261] : memref<144x128xf32, #tpu.memory_space<vmem>>, vector<1x128xf32>
      %490 = vector.shape_cast %489 : vector<1x128xf32> to vector<128xf32>
      %c85 = arith.constant 85 : index
      %c0_262 = arith.constant 0 : index
      %491 = vector.load %arg15[%c85, %c0_262] : memref<144x128xf32, #tpu.memory_space<vmem>>, vector<1x128xf32>
      %492 = vector.shape_cast %491 : vector<1x128xf32> to vector<128xf32>
      %493 = arith.maximumf %490, %492 : vector<128xf32>
      %c98 = arith.constant 98 : index
      %c0_263 = arith.constant 0 : index
      %494 = vector.load %arg15[%c98, %c0_263] : memref<144x128xf32, #tpu.memory_space<vmem>>, vector<1x128xf32>
      %495 = vector.shape_cast %494 : vector<1x128xf32> to vector<128xf32>
      %c99 = arith.constant 99 : index
      %c0_264 = arith.constant 0 : index
      %496 = vector.load %arg15[%c99, %c0_264] : memref<144x128xf32, #tpu.memory_space<vmem>>, vector<1x128xf32>
      %497 = vector.shape_cast %496 : vector<1x128xf32> to vector<128xf32>
      %498 = arith.maximumf %495, %497 : vector<128xf32>
      %499 = arith.maximumf %493, %498 : vector<128xf32>
      %500 = arith.addf %499, %203 : vector<128xf32>
      %cst_265 = arith.constant 0.000000e+00 : f32
      %501 = vector.broadcast %cst_265 : f32 to vector<128xf32>
      %502 = arith.maximumf %500, %501 : vector<128xf32>
      %c120_i32 = arith.constant 120 : i32
      %503 = arith.addi %c120_i32, %arg17 : i32
      %504 = arith.index_cast %503 : i32 to index
      %c0_266 = arith.constant 0 : index
      %505 = vector.load %arg16[%504, %c0_266] : memref<200x128xf32, #tpu.memory_space<vmem>>, vector<1x128xf32>
      %506 = vector.shape_cast %505 : vector<1x128xf32> to vector<128xf32>
      %507 = vector.shape_cast %502 : vector<128xf32> to vector<1x128xf32>
      tpu.vector_store %arg16[%504, %c0_266], %507 {strides = array<i32>} : memref<200x128xf32, #tpu.memory_space<vmem>>, vector<1x128xf32>,
      %c86 = arith.constant 86 : index
      %c0_267 = arith.constant 0 : index
      %508 = vector.load %arg15[%c86, %c0_267] : memref<144x128xf32, #tpu.memory_space<vmem>>, vector<1x128xf32>
      %509 = vector.shape_cast %508 : vector<1x128xf32> to vector<128xf32>
      %c87 = arith.constant 87 : index
      %c0_268 = arith.constant 0 : index
      %510 = vector.load %arg15[%c87, %c0_268] : memref<144x128xf32, #tpu.memory_space<vmem>>, vector<1x128xf32>
      %511 = vector.shape_cast %510 : vector<1x128xf32> to vector<128xf32>
      %512 = arith.maximumf %509, %511 : vector<128xf32>
      %c100 = arith.constant 100 : index
      %c0_269 = arith.constant 0 : index
      %513 = vector.load %arg15[%c100, %c0_269] : memref<144x128xf32, #tpu.memory_space<vmem>>, vector<1x128xf32>
      %514 = vector.shape_cast %513 : vector<1x128xf32> to vector<128xf32>
      %c101 = arith.constant 101 : index
      %c0_270 = arith.constant 0 : index
      %515 = vector.load %arg15[%c101, %c0_270] : memref<144x128xf32, #tpu.memory_space<vmem>>, vector<1x128xf32>
      %516 = vector.shape_cast %515 : vector<1x128xf32> to vector<128xf32>
      %517 = arith.maximumf %514, %516 : vector<128xf32>
      %518 = arith.maximumf %512, %517 : vector<128xf32>
      %519 = arith.addf %518, %203 : vector<128xf32>
      %cst_271 = arith.constant 0.000000e+00 : f32
      %520 = vector.broadcast %cst_271 : f32 to vector<128xf32>
      %521 = arith.maximumf %519, %520 : vector<128xf32>
      %c128_i32 = arith.constant 128 : i32
      %522 = arith.addi %c128_i32, %arg17 : i32
      %523 = arith.index_cast %522 : i32 to index
      %c0_272 = arith.constant 0 : index
      %524 = vector.load %arg16[%523, %c0_272] : memref<200x128xf32, #tpu.memory_space<vmem>>, vector<1x128xf32>
      %525 = vector.shape_cast %524 : vector<1x128xf32> to vector<128xf32>
      %526 = vector.shape_cast %521 : vector<128xf32> to vector<1x128xf32>
      tpu.vector_store %arg16[%523, %c0_272], %526 {strides = array<i32>} : memref<200x128xf32, #tpu.memory_space<vmem>>, vector<1x128xf32>,
      %c88_273 = arith.constant 88 : index
      %c0_274 = arith.constant 0 : index
      %527 = vector.load %arg15[%c88_273, %c0_274] : memref<144x128xf32, #tpu.memory_space<vmem>>, vector<1x128xf32>
      %528 = vector.shape_cast %527 : vector<1x128xf32> to vector<128xf32>
      %c89 = arith.constant 89 : index
      %c0_275 = arith.constant 0 : index
      %529 = vector.load %arg15[%c89, %c0_275] : memref<144x128xf32, #tpu.memory_space<vmem>>, vector<1x128xf32>
      %530 = vector.shape_cast %529 : vector<1x128xf32> to vector<128xf32>
      %531 = arith.maximumf %528, %530 : vector<128xf32>
      %c102 = arith.constant 102 : index
      %c0_276 = arith.constant 0 : index
      %532 = vector.load %arg15[%c102, %c0_276] : memref<144x128xf32, #tpu.memory_space<vmem>>, vector<1x128xf32>
      %533 = vector.shape_cast %532 : vector<1x128xf32> to vector<128xf32>
      %c103 = arith.constant 103 : index
      %c0_277 = arith.constant 0 : index
      %534 = vector.load %arg15[%c103, %c0_277] : memref<144x128xf32, #tpu.memory_space<vmem>>, vector<1x128xf32>
      %535 = vector.shape_cast %534 : vector<1x128xf32> to vector<128xf32>
      %536 = arith.maximumf %533, %535 : vector<128xf32>
      %537 = arith.maximumf %531, %536 : vector<128xf32>
      %538 = arith.addf %537, %203 : vector<128xf32>
      %cst_278 = arith.constant 0.000000e+00 : f32
      %539 = vector.broadcast %cst_278 : f32 to vector<128xf32>
      %540 = arith.maximumf %538, %539 : vector<128xf32>
      %c136_i32 = arith.constant 136 : i32
      %541 = arith.addi %c136_i32, %arg17 : i32
      %542 = arith.index_cast %541 : i32 to index
      %c0_279 = arith.constant 0 : index
      %543 = vector.load %arg16[%542, %c0_279] : memref<200x128xf32, #tpu.memory_space<vmem>>, vector<1x128xf32>
      %544 = vector.shape_cast %543 : vector<1x128xf32> to vector<128xf32>
      %545 = vector.shape_cast %540 : vector<128xf32> to vector<1x128xf32>
      tpu.vector_store %arg16[%542, %c0_279], %545 {strides = array<i32>} : memref<200x128xf32, #tpu.memory_space<vmem>>, vector<1x128xf32>,
      %c90 = arith.constant 90 : index
      %c0_280 = arith.constant 0 : index
      %546 = vector.load %arg15[%c90, %c0_280] : memref<144x128xf32, #tpu.memory_space<vmem>>, vector<1x128xf32>
      %547 = vector.shape_cast %546 : vector<1x128xf32> to vector<128xf32>
      %c91 = arith.constant 91 : index
      %c0_281 = arith.constant 0 : index
      %548 = vector.load %arg15[%c91, %c0_281] : memref<144x128xf32, #tpu.memory_space<vmem>>, vector<1x128xf32>
      %549 = vector.shape_cast %548 : vector<1x128xf32> to vector<128xf32>
      %550 = arith.maximumf %547, %549 : vector<128xf32>
      %c104_282 = arith.constant 104 : index
      %c0_283 = arith.constant 0 : index
      %551 = vector.load %arg15[%c104_282, %c0_283] : memref<144x128xf32, #tpu.memory_space<vmem>>, vector<1x128xf32>
      %552 = vector.shape_cast %551 : vector<1x128xf32> to vector<128xf32>
      %c105 = arith.constant 105 : index
      %c0_284 = arith.constant 0 : index
      %553 = vector.load %arg15[%c105, %c0_284] : memref<144x128xf32, #tpu.memory_space<vmem>>, vector<1x128xf32>
      %554 = vector.shape_cast %553 : vector<1x128xf32> to vector<128xf32>
      %555 = arith.maximumf %552, %554 : vector<128xf32>
      %556 = arith.maximumf %550, %555 : vector<128xf32>
      %557 = arith.addf %556, %203 : vector<128xf32>
      %cst_285 = arith.constant 0.000000e+00 : f32
      %558 = vector.broadcast %cst_285 : f32 to vector<128xf32>
      %559 = arith.maximumf %557, %558 : vector<128xf32>
      %c144_i32 = arith.constant 144 : i32
      %560 = arith.addi %c144_i32, %arg17 : i32
      %561 = arith.index_cast %560 : i32 to index
      %c0_286 = arith.constant 0 : index
      %562 = vector.load %arg16[%561, %c0_286] : memref<200x128xf32, #tpu.memory_space<vmem>>, vector<1x128xf32>
      %563 = vector.shape_cast %562 : vector<1x128xf32> to vector<128xf32>
      %564 = vector.shape_cast %559 : vector<128xf32> to vector<1x128xf32>
      tpu.vector_store %arg16[%561, %c0_286], %564 {strides = array<i32>} : memref<200x128xf32, #tpu.memory_space<vmem>>, vector<1x128xf32>,
      %c92 = arith.constant 92 : index
      %c0_287 = arith.constant 0 : index
      %565 = vector.load %arg15[%c92, %c0_287] : memref<144x128xf32, #tpu.memory_space<vmem>>, vector<1x128xf32>
      %566 = vector.shape_cast %565 : vector<1x128xf32> to vector<128xf32>
      %c93 = arith.constant 93 : index
      %c0_288 = arith.constant 0 : index
      %567 = vector.load %arg15[%c93, %c0_288] : memref<144x128xf32, #tpu.memory_space<vmem>>, vector<1x128xf32>
      %568 = vector.shape_cast %567 : vector<1x128xf32> to vector<128xf32>
      %569 = arith.maximumf %566, %568 : vector<128xf32>
      %c106 = arith.constant 106 : index
      %c0_289 = arith.constant 0 : index
      %570 = vector.load %arg15[%c106, %c0_289] : memref<144x128xf32, #tpu.memory_space<vmem>>, vector<1x128xf32>
      %571 = vector.shape_cast %570 : vector<1x128xf32> to vector<128xf32>
      %c107 = arith.constant 107 : index
      %c0_290 = arith.constant 0 : index
      %572 = vector.load %arg15[%c107, %c0_290] : memref<144x128xf32, #tpu.memory_space<vmem>>, vector<1x128xf32>
      %573 = vector.shape_cast %572 : vector<1x128xf32> to vector<128xf32>
      %574 = arith.maximumf %571, %573 : vector<128xf32>
      %575 = arith.maximumf %569, %574 : vector<128xf32>
      %576 = arith.addf %575, %203 : vector<128xf32>
      %cst_291 = arith.constant 0.000000e+00 : f32
      %577 = vector.broadcast %cst_291 : f32 to vector<128xf32>
      %578 = arith.maximumf %576, %577 : vector<128xf32>
      %c152_i32 = arith.constant 152 : i32
      %579 = arith.addi %c152_i32, %arg17 : i32
      %580 = arith.index_cast %579 : i32 to index
      %c0_292 = arith.constant 0 : index
      %581 = vector.load %arg16[%580, %c0_292] : memref<200x128xf32, #tpu.memory_space<vmem>>, vector<1x128xf32>
      %582 = vector.shape_cast %581 : vector<1x128xf32> to vector<128xf32>
      %583 = vector.shape_cast %578 : vector<128xf32> to vector<1x128xf32>
      tpu.vector_store %arg16[%580, %c0_292], %583 {strides = array<i32>} : memref<200x128xf32, #tpu.memory_space<vmem>>, vector<1x128xf32>,
      %c112_293 = arith.constant 112 : index
      %c0_294 = arith.constant 0 : index
      %584 = vector.load %arg15[%c112_293, %c0_294] : memref<144x128xf32, #tpu.memory_space<vmem>>, vector<1x128xf32>
      %585 = vector.shape_cast %584 : vector<1x128xf32> to vector<128xf32>
      %c113 = arith.constant 113 : index
      %c0_295 = arith.constant 0 : index
      %586 = vector.load %arg15[%c113, %c0_295] : memref<144x128xf32, #tpu.memory_space<vmem>>, vector<1x128xf32>
      %587 = vector.shape_cast %586 : vector<1x128xf32> to vector<128xf32>
      %588 = arith.maximumf %585, %587 : vector<128xf32>
      %c126 = arith.constant 126 : index
      %c0_296 = arith.constant 0 : index
      %589 = vector.load %arg15[%c126, %c0_296] : memref<144x128xf32, #tpu.memory_space<vmem>>, vector<1x128xf32>
      %590 = vector.shape_cast %589 : vector<1x128xf32> to vector<128xf32>
      %c127 = arith.constant 127 : index
      %c0_297 = arith.constant 0 : index
      %591 = vector.load %arg15[%c127, %c0_297] : memref<144x128xf32, #tpu.memory_space<vmem>>, vector<1x128xf32>
      %592 = vector.shape_cast %591 : vector<1x128xf32> to vector<128xf32>
      %593 = arith.maximumf %590, %592 : vector<128xf32>
      %594 = arith.maximumf %588, %593 : vector<128xf32>
      %595 = arith.addf %594, %203 : vector<128xf32>
      %cst_298 = arith.constant 0.000000e+00 : f32
      %596 = vector.broadcast %cst_298 : f32 to vector<128xf32>
      %597 = arith.maximumf %595, %596 : vector<128xf32>
      %c160_i32 = arith.constant 160 : i32
      %598 = arith.addi %c160_i32, %arg17 : i32
      %599 = arith.index_cast %598 : i32 to index
      %c0_299 = arith.constant 0 : index
      %600 = vector.load %arg16[%599, %c0_299] : memref<200x128xf32, #tpu.memory_space<vmem>>, vector<1x128xf32>
      %601 = vector.shape_cast %600 : vector<1x128xf32> to vector<128xf32>
      %602 = vector.shape_cast %597 : vector<128xf32> to vector<1x128xf32>
      tpu.vector_store %arg16[%599, %c0_299], %602 {strides = array<i32>} : memref<200x128xf32, #tpu.memory_space<vmem>>, vector<1x128xf32>,
      %c114 = arith.constant 114 : index
      %c0_300 = arith.constant 0 : index
      %603 = vector.load %arg15[%c114, %c0_300] : memref<144x128xf32, #tpu.memory_space<vmem>>, vector<1x128xf32>
      %604 = vector.shape_cast %603 : vector<1x128xf32> to vector<128xf32>
      %c115 = arith.constant 115 : index
      %c0_301 = arith.constant 0 : index
      %605 = vector.load %arg15[%c115, %c0_301] : memref<144x128xf32, #tpu.memory_space<vmem>>, vector<1x128xf32>
      %606 = vector.shape_cast %605 : vector<1x128xf32> to vector<128xf32>
      %607 = arith.maximumf %604, %606 : vector<128xf32>
      %c128_302 = arith.constant 128 : index
      %c0_303 = arith.constant 0 : index
      %608 = vector.load %arg15[%c128_302, %c0_303] : memref<144x128xf32, #tpu.memory_space<vmem>>, vector<1x128xf32>
      %609 = vector.shape_cast %608 : vector<1x128xf32> to vector<128xf32>
      %c129 = arith.constant 129 : index
      %c0_304 = arith.constant 0 : index
      %610 = vector.load %arg15[%c129, %c0_304] : memref<144x128xf32, #tpu.memory_space<vmem>>, vector<1x128xf32>
      %611 = vector.shape_cast %610 : vector<1x128xf32> to vector<128xf32>
      %612 = arith.maximumf %609, %611 : vector<128xf32>
      %613 = arith.maximumf %607, %612 : vector<128xf32>
      %614 = arith.addf %613, %203 : vector<128xf32>
      %cst_305 = arith.constant 0.000000e+00 : f32
      %615 = vector.broadcast %cst_305 : f32 to vector<128xf32>
      %616 = arith.maximumf %614, %615 : vector<128xf32>
      %c168_i32 = arith.constant 168 : i32
      %617 = arith.addi %c168_i32, %arg17 : i32
      %618 = arith.index_cast %617 : i32 to index
      %c0_306 = arith.constant 0 : index
      %619 = vector.load %arg16[%618, %c0_306] : memref<200x128xf32, #tpu.memory_space<vmem>>, vector<1x128xf32>
      %620 = vector.shape_cast %619 : vector<1x128xf32> to vector<128xf32>
      %621 = vector.shape_cast %616 : vector<128xf32> to vector<1x128xf32>
      tpu.vector_store %arg16[%618, %c0_306], %621 {strides = array<i32>} : memref<200x128xf32, #tpu.memory_space<vmem>>, vector<1x128xf32>,
      %c116 = arith.constant 116 : index
      %c0_307 = arith.constant 0 : index
      %622 = vector.load %arg15[%c116, %c0_307] : memref<144x128xf32, #tpu.memory_space<vmem>>, vector<1x128xf32>
      %623 = vector.shape_cast %622 : vector<1x128xf32> to vector<128xf32>
      %c117 = arith.constant 117 : index
      %c0_308 = arith.constant 0 : index
      %624 = vector.load %arg15[%c117, %c0_308] : memref<144x128xf32, #tpu.memory_space<vmem>>, vector<1x128xf32>
      %625 = vector.shape_cast %624 : vector<1x128xf32> to vector<128xf32>
      %626 = arith.maximumf %623, %625 : vector<128xf32>
      %c130 = arith.constant 130 : index
      %c0_309 = arith.constant 0 : index
      %627 = vector.load %arg15[%c130, %c0_309] : memref<144x128xf32, #tpu.memory_space<vmem>>, vector<1x128xf32>
      %628 = vector.shape_cast %627 : vector<1x128xf32> to vector<128xf32>
      %c131 = arith.constant 131 : index
      %c0_310 = arith.constant 0 : index
      %629 = vector.load %arg15[%c131, %c0_310] : memref<144x128xf32, #tpu.memory_space<vmem>>, vector<1x128xf32>
      %630 = vector.shape_cast %629 : vector<1x128xf32> to vector<128xf32>
      %631 = arith.maximumf %628, %630 : vector<128xf32>
      %632 = arith.maximumf %626, %631 : vector<128xf32>
      %633 = arith.addf %632, %203 : vector<128xf32>
      %cst_311 = arith.constant 0.000000e+00 : f32
      %634 = vector.broadcast %cst_311 : f32 to vector<128xf32>
      %635 = arith.maximumf %633, %634 : vector<128xf32>
      %c176_i32 = arith.constant 176 : i32
      %636 = arith.addi %c176_i32, %arg17 : i32
      %637 = arith.index_cast %636 : i32 to index
      %c0_312 = arith.constant 0 : index
      %638 = vector.load %arg16[%637, %c0_312] : memref<200x128xf32, #tpu.memory_space<vmem>>, vector<1x128xf32>
      %639 = vector.shape_cast %638 : vector<1x128xf32> to vector<128xf32>
      %640 = vector.shape_cast %635 : vector<128xf32> to vector<1x128xf32>
      tpu.vector_store %arg16[%637, %c0_312], %640 {strides = array<i32>} : memref<200x128xf32, #tpu.memory_space<vmem>>, vector<1x128xf32>,
      %c118 = arith.constant 118 : index
      %c0_313 = arith.constant 0 : index
      %641 = vector.load %arg15[%c118, %c0_313] : memref<144x128xf32, #tpu.memory_space<vmem>>, vector<1x128xf32>
      %642 = vector.shape_cast %641 : vector<1x128xf32> to vector<128xf32>
      %c119 = arith.constant 119 : index
      %c0_314 = arith.constant 0 : index
      %643 = vector.load %arg15[%c119, %c0_314] : memref<144x128xf32, #tpu.memory_space<vmem>>, vector<1x128xf32>
      %644 = vector.shape_cast %643 : vector<1x128xf32> to vector<128xf32>
      %645 = arith.maximumf %642, %644 : vector<128xf32>
      %c132 = arith.constant 132 : index
      %c0_315 = arith.constant 0 : index
      %646 = vector.load %arg15[%c132, %c0_315] : memref<144x128xf32, #tpu.memory_space<vmem>>, vector<1x128xf32>
      %647 = vector.shape_cast %646 : vector<1x128xf32> to vector<128xf32>
      %c133 = arith.constant 133 : index
      %c0_316 = arith.constant 0 : index
      %648 = vector.load %arg15[%c133, %c0_316] : memref<144x128xf32, #tpu.memory_space<vmem>>, vector<1x128xf32>
      %649 = vector.shape_cast %648 : vector<1x128xf32> to vector<128xf32>
      %650 = arith.maximumf %647, %649 : vector<128xf32>
      %651 = arith.maximumf %645, %650 : vector<128xf32>
      %652 = arith.addf %651, %203 : vector<128xf32>
      %cst_317 = arith.constant 0.000000e+00 : f32
      %653 = vector.broadcast %cst_317 : f32 to vector<128xf32>
      %654 = arith.maximumf %652, %653 : vector<128xf32>
      %c184_i32 = arith.constant 184 : i32
      %655 = arith.addi %c184_i32, %arg17 : i32
      %656 = arith.index_cast %655 : i32 to index
      %c0_318 = arith.constant 0 : index
      %657 = vector.load %arg16[%656, %c0_318] : memref<200x128xf32, #tpu.memory_space<vmem>>, vector<1x128xf32>
      %658 = vector.shape_cast %657 : vector<1x128xf32> to vector<128xf32>
      %659 = vector.shape_cast %654 : vector<128xf32> to vector<1x128xf32>
      tpu.vector_store %arg16[%656, %c0_318], %659 {strides = array<i32>} : memref<200x128xf32, #tpu.memory_space<vmem>>, vector<1x128xf32>,
      %c120_319 = arith.constant 120 : index
      %c0_320 = arith.constant 0 : index
      %660 = vector.load %arg15[%c120_319, %c0_320] : memref<144x128xf32, #tpu.memory_space<vmem>>, vector<1x128xf32>
      %661 = vector.shape_cast %660 : vector<1x128xf32> to vector<128xf32>
      %c121 = arith.constant 121 : index
      %c0_321 = arith.constant 0 : index
      %662 = vector.load %arg15[%c121, %c0_321] : memref<144x128xf32, #tpu.memory_space<vmem>>, vector<1x128xf32>
      %663 = vector.shape_cast %662 : vector<1x128xf32> to vector<128xf32>
      %664 = arith.maximumf %661, %663 : vector<128xf32>
      %c134 = arith.constant 134 : index
      %c0_322 = arith.constant 0 : index
      %665 = vector.load %arg15[%c134, %c0_322] : memref<144x128xf32, #tpu.memory_space<vmem>>, vector<1x128xf32>
      %666 = vector.shape_cast %665 : vector<1x128xf32> to vector<128xf32>
      %c135 = arith.constant 135 : index
      %c0_323 = arith.constant 0 : index
      %667 = vector.load %arg15[%c135, %c0_323] : memref<144x128xf32, #tpu.memory_space<vmem>>, vector<1x128xf32>
      %668 = vector.shape_cast %667 : vector<1x128xf32> to vector<128xf32>
      %669 = arith.maximumf %666, %668 : vector<128xf32>
      %670 = arith.maximumf %664, %669 : vector<128xf32>
      %671 = arith.addf %670, %203 : vector<128xf32>
      %cst_324 = arith.constant 0.000000e+00 : f32
      %672 = vector.broadcast %cst_324 : f32 to vector<128xf32>
      %673 = arith.maximumf %671, %672 : vector<128xf32>
      %c192_i32 = arith.constant 192 : i32
      %674 = arith.addi %c192_i32, %arg17 : i32
      %675 = arith.index_cast %674 : i32 to index
      %c0_325 = arith.constant 0 : index
      %676 = vector.load %arg16[%675, %c0_325] : memref<200x128xf32, #tpu.memory_space<vmem>>, vector<1x128xf32>
      %677 = vector.shape_cast %676 : vector<1x128xf32> to vector<128xf32>
      %678 = vector.shape_cast %673 : vector<128xf32> to vector<1x128xf32>
      tpu.vector_store %arg16[%675, %c0_325], %678 {strides = array<i32>} : memref<200x128xf32, #tpu.memory_space<vmem>>, vector<1x128xf32>,
    }
    %c8_i32_0 = arith.constant 8 : i32
    %cst = arith.constant 0.000000e+00 : f32
    %1 = vector.broadcast %cst : f32 to vector<8x128xf32>
    %c0 = arith.constant 0 : index
    %c0_1 = arith.constant 0 : index
    %2 = vector.load %arg16[%c0, %c0_1] : memref<200x128xf32, #tpu.memory_space<vmem>>, vector<8x16xf32>
    %3 = arith.truncf %2 : vector<8x16xf32> to vector<8x16xbf16>
    %c0_2 = arith.constant 0 : index
    %c0_3 = arith.constant 0 : index
    %4 = vector.load %arg6[%c0_2, %c0_3] : memref<400x128xbf16, #tpu.memory_space<vmem>>, vector<16x128xbf16>
    %cst_4 = arith.constant dense<0.000000e+00> : vector<8x128xf32>
    %5 = tpu.matmul %3, %4, %cst_4 {dimension_numbers = #tpu.dot_dimension_numbers<[1], [0], [0], [1], [0, 0, 1, 1], [], []>} : vector<8x16xbf16>, vector<16x128xbf16>, vector<8x128xf32> -> vector<8x128xf32>
    %6 = arith.addf %1, %5 : vector<8x128xf32>
    %c8 = arith.constant 8 : index
    %c0_5 = arith.constant 0 : index
    %7 = vector.load %arg16[%c8, %c0_5] : memref<200x128xf32, #tpu.memory_space<vmem>>, vector<8x16xf32>
    %8 = arith.truncf %7 : vector<8x16xf32> to vector<8x16xbf16>
    %c16 = arith.constant 16 : index
    %c0_6 = arith.constant 0 : index
    %9 = vector.load %arg6[%c16, %c0_6] : memref<400x128xbf16, #tpu.memory_space<vmem>>, vector<16x128xbf16>
    %cst_7 = arith.constant dense<0.000000e+00> : vector<8x128xf32>
    %10 = tpu.matmul %8, %9, %cst_7 {dimension_numbers = #tpu.dot_dimension_numbers<[1], [0], [0], [1], [0, 0, 1, 1], [], []>} : vector<8x16xbf16>, vector<16x128xbf16>, vector<8x128xf32> -> vector<8x128xf32>
    %11 = arith.addf %6, %10 : vector<8x128xf32>
    %c16_8 = arith.constant 16 : index
    %c0_9 = arith.constant 0 : index
    %12 = vector.load %arg16[%c16_8, %c0_9] : memref<200x128xf32, #tpu.memory_space<vmem>>, vector<8x16xf32>
    %13 = arith.truncf %12 : vector<8x16xf32> to vector<8x16xbf16>
    %c32 = arith.constant 32 : index
    %c0_10 = arith.constant 0 : index
    %14 = vector.load %arg6[%c32, %c0_10] : memref<400x128xbf16, #tpu.memory_space<vmem>>, vector<16x128xbf16>
    %cst_11 = arith.constant dense<0.000000e+00> : vector<8x128xf32>
    %15 = tpu.matmul %13, %14, %cst_11 {dimension_numbers = #tpu.dot_dimension_numbers<[1], [0], [0], [1], [0, 0, 1, 1], [], []>} : vector<8x16xbf16>, vector<16x128xbf16>, vector<8x128xf32> -> vector<8x128xf32>
    %16 = arith.addf %11, %15 : vector<8x128xf32>
    %c24 = arith.constant 24 : index
    %c0_12 = arith.constant 0 : index
    %17 = vector.load %arg16[%c24, %c0_12] : memref<200x128xf32, #tpu.memory_space<vmem>>, vector<8x16xf32>
    %18 = arith.truncf %17 : vector<8x16xf32> to vector<8x16xbf16>
    %c48 = arith.constant 48 : index
    %c0_13 = arith.constant 0 : index
    %19 = vector.load %arg6[%c48, %c0_13] : memref<400x128xbf16, #tpu.memory_space<vmem>>, vector<16x128xbf16>
    %cst_14 = arith.constant dense<0.000000e+00> : vector<8x128xf32>
    %20 = tpu.matmul %18, %19, %cst_14 {dimension_numbers = #tpu.dot_dimension_numbers<[1], [0], [0], [1], [0, 0, 1, 1], [], []>} : vector<8x16xbf16>, vector<16x128xbf16>, vector<8x128xf32> -> vector<8x128xf32>
    %21 = arith.addf %16, %20 : vector<8x128xf32>
    %c32_15 = arith.constant 32 : index
    %c0_16 = arith.constant 0 : index
    %22 = vector.load %arg16[%c32_15, %c0_16] : memref<200x128xf32, #tpu.memory_space<vmem>>, vector<8x16xf32>
    %23 = arith.truncf %22 : vector<8x16xf32> to vector<8x16xbf16>
    %c64 = arith.constant 64 : index
    %c0_17 = arith.constant 0 : index
    %24 = vector.load %arg6[%c64, %c0_17] : memref<400x128xbf16, #tpu.memory_space<vmem>>, vector<16x128xbf16>
    %cst_18 = arith.constant dense<0.000000e+00> : vector<8x128xf32>
    %25 = tpu.matmul %23, %24, %cst_18 {dimension_numbers = #tpu.dot_dimension_numbers<[1], [0], [0], [1], [0, 0, 1, 1], [], []>} : vector<8x16xbf16>, vector<16x128xbf16>, vector<8x128xf32> -> vector<8x128xf32>
    %26 = arith.addf %21, %25 : vector<8x128xf32>
    %c40 = arith.constant 40 : index
    %c0_19 = arith.constant 0 : index
    %27 = vector.load %arg16[%c40, %c0_19] : memref<200x128xf32, #tpu.memory_space<vmem>>, vector<8x16xf32>
    %28 = arith.truncf %27 : vector<8x16xf32> to vector<8x16xbf16>
    %c80 = arith.constant 80 : index
    %c0_20 = arith.constant 0 : index
    %29 = vector.load %arg6[%c80, %c0_20] : memref<400x128xbf16, #tpu.memory_space<vmem>>, vector<16x128xbf16>
    %cst_21 = arith.constant dense<0.000000e+00> : vector<8x128xf32>
    %30 = tpu.matmul %28, %29, %cst_21 {dimension_numbers = #tpu.dot_dimension_numbers<[1], [0], [0], [1], [0, 0, 1, 1], [], []>} : vector<8x16xbf16>, vector<16x128xbf16>, vector<8x128xf32> -> vector<8x128xf32>
    %31 = arith.addf %26, %30 : vector<8x128xf32>
    %c48_22 = arith.constant 48 : index
    %c0_23 = arith.constant 0 : index
    %32 = vector.load %arg16[%c48_22, %c0_23] : memref<200x128xf32, #tpu.memory_space<vmem>>, vector<8x16xf32>
    %33 = arith.truncf %32 : vector<8x16xf32> to vector<8x16xbf16>
    %c96 = arith.constant 96 : index
    %c0_24 = arith.constant 0 : index
    %34 = vector.load %arg6[%c96, %c0_24] : memref<400x128xbf16, #tpu.memory_space<vmem>>, vector<16x128xbf16>
    %cst_25 = arith.constant dense<0.000000e+00> : vector<8x128xf32>
    %35 = tpu.matmul %33, %34, %cst_25 {dimension_numbers = #tpu.dot_dimension_numbers<[1], [0], [0], [1], [0, 0, 1, 1], [], []>} : vector<8x16xbf16>, vector<16x128xbf16>, vector<8x128xf32> -> vector<8x128xf32>
    %36 = arith.addf %31, %35 : vector<8x128xf32>
    %c56 = arith.constant 56 : index
    %c0_26 = arith.constant 0 : index
    %37 = vector.load %arg16[%c56, %c0_26] : memref<200x128xf32, #tpu.memory_space<vmem>>, vector<8x16xf32>
    %38 = arith.truncf %37 : vector<8x16xf32> to vector<8x16xbf16>
    %c112 = arith.constant 112 : index
    %c0_27 = arith.constant 0 : index
    %39 = vector.load %arg6[%c112, %c0_27] : memref<400x128xbf16, #tpu.memory_space<vmem>>, vector<16x128xbf16>
    %cst_28 = arith.constant dense<0.000000e+00> : vector<8x128xf32>
    %40 = tpu.matmul %38, %39, %cst_28 {dimension_numbers = #tpu.dot_dimension_numbers<[1], [0], [0], [1], [0, 0, 1, 1], [], []>} : vector<8x16xbf16>, vector<16x128xbf16>, vector<8x128xf32> -> vector<8x128xf32>
    %41 = arith.addf %36, %40 : vector<8x128xf32>
    %c64_29 = arith.constant 64 : index
    %c0_30 = arith.constant 0 : index
    %42 = vector.load %arg16[%c64_29, %c0_30] : memref<200x128xf32, #tpu.memory_space<vmem>>, vector<8x16xf32>
    %43 = arith.truncf %42 : vector<8x16xf32> to vector<8x16xbf16>
    %c128 = arith.constant 128 : index
    %c0_31 = arith.constant 0 : index
    %44 = vector.load %arg6[%c128, %c0_31] : memref<400x128xbf16, #tpu.memory_space<vmem>>, vector<16x128xbf16>
    %cst_32 = arith.constant dense<0.000000e+00> : vector<8x128xf32>
    %45 = tpu.matmul %43, %44, %cst_32 {dimension_numbers = #tpu.dot_dimension_numbers<[1], [0], [0], [1], [0, 0, 1, 1], [], []>} : vector<8x16xbf16>, vector<16x128xbf16>, vector<8x128xf32> -> vector<8x128xf32>
    %46 = arith.addf %41, %45 : vector<8x128xf32>
    %c72 = arith.constant 72 : index
    %c0_33 = arith.constant 0 : index
    %47 = vector.load %arg16[%c72, %c0_33] : memref<200x128xf32, #tpu.memory_space<vmem>>, vector<8x16xf32>
    %48 = arith.truncf %47 : vector<8x16xf32> to vector<8x16xbf16>
    %c144 = arith.constant 144 : index
    %c0_34 = arith.constant 0 : index
    %49 = vector.load %arg6[%c144, %c0_34] : memref<400x128xbf16, #tpu.memory_space<vmem>>, vector<16x128xbf16>
    %cst_35 = arith.constant dense<0.000000e+00> : vector<8x128xf32>
    %50 = tpu.matmul %48, %49, %cst_35 {dimension_numbers = #tpu.dot_dimension_numbers<[1], [0], [0], [1], [0, 0, 1, 1], [], []>} : vector<8x16xbf16>, vector<16x128xbf16>, vector<8x128xf32> -> vector<8x128xf32>
    %51 = arith.addf %46, %50 : vector<8x128xf32>
    %c80_36 = arith.constant 80 : index
    %c0_37 = arith.constant 0 : index
    %52 = vector.load %arg16[%c80_36, %c0_37] : memref<200x128xf32, #tpu.memory_space<vmem>>, vector<8x16xf32>
    %53 = arith.truncf %52 : vector<8x16xf32> to vector<8x16xbf16>
    %c160 = arith.constant 160 : index
    %c0_38 = arith.constant 0 : index
    %54 = vector.load %arg6[%c160, %c0_38] : memref<400x128xbf16, #tpu.memory_space<vmem>>, vector<16x128xbf16>
    %cst_39 = arith.constant dense<0.000000e+00> : vector<8x128xf32>
    %55 = tpu.matmul %53, %54, %cst_39 {dimension_numbers = #tpu.dot_dimension_numbers<[1], [0], [0], [1], [0, 0, 1, 1], [], []>} : vector<8x16xbf16>, vector<16x128xbf16>, vector<8x128xf32> -> vector<8x128xf32>
    %56 = arith.addf %51, %55 : vector<8x128xf32>
    %c88 = arith.constant 88 : index
    %c0_40 = arith.constant 0 : index
    %57 = vector.load %arg16[%c88, %c0_40] : memref<200x128xf32, #tpu.memory_space<vmem>>, vector<8x16xf32>
    %58 = arith.truncf %57 : vector<8x16xf32> to vector<8x16xbf16>
    %c176 = arith.constant 176 : index
    %c0_41 = arith.constant 0 : index
    %59 = vector.load %arg6[%c176, %c0_41] : memref<400x128xbf16, #tpu.memory_space<vmem>>, vector<16x128xbf16>
    %cst_42 = arith.constant dense<0.000000e+00> : vector<8x128xf32>
    %60 = tpu.matmul %58, %59, %cst_42 {dimension_numbers = #tpu.dot_dimension_numbers<[1], [0], [0], [1], [0, 0, 1, 1], [], []>} : vector<8x16xbf16>, vector<16x128xbf16>, vector<8x128xf32> -> vector<8x128xf32>
    %61 = arith.addf %56, %60 : vector<8x128xf32>
    %c96_43 = arith.constant 96 : index
    %c0_44 = arith.constant 0 : index
    %62 = vector.load %arg16[%c96_43, %c0_44] : memref<200x128xf32, #tpu.memory_space<vmem>>, vector<8x16xf32>
    %63 = arith.truncf %62 : vector<8x16xf32> to vector<8x16xbf16>
    %c192 = arith.constant 192 : index
    %c0_45 = arith.constant 0 : index
    %64 = vector.load %arg6[%c192, %c0_45] : memref<400x128xbf16, #tpu.memory_space<vmem>>, vector<16x128xbf16>
    %cst_46 = arith.constant dense<0.000000e+00> : vector<8x128xf32>
    %65 = tpu.matmul %63, %64, %cst_46 {dimension_numbers = #tpu.dot_dimension_numbers<[1], [0], [0], [1], [0, 0, 1, 1], [], []>} : vector<8x16xbf16>, vector<16x128xbf16>, vector<8x128xf32> -> vector<8x128xf32>
    %66 = arith.addf %61, %65 : vector<8x128xf32>
    %c104 = arith.constant 104 : index
    %c0_47 = arith.constant 0 : index
    %67 = vector.load %arg16[%c104, %c0_47] : memref<200x128xf32, #tpu.memory_space<vmem>>, vector<8x16xf32>
    %68 = arith.truncf %67 : vector<8x16xf32> to vector<8x16xbf16>
    %c208 = arith.constant 208 : index
    %c0_48 = arith.constant 0 : index
    %69 = vector.load %arg6[%c208, %c0_48] : memref<400x128xbf16, #tpu.memory_space<vmem>>, vector<16x128xbf16>
    %cst_49 = arith.constant dense<0.000000e+00> : vector<8x128xf32>
    %70 = tpu.matmul %68, %69, %cst_49 {dimension_numbers = #tpu.dot_dimension_numbers<[1], [0], [0], [1], [0, 0, 1, 1], [], []>} : vector<8x16xbf16>, vector<16x128xbf16>, vector<8x128xf32> -> vector<8x128xf32>
    %71 = arith.addf %66, %70 : vector<8x128xf32>
    %c112_50 = arith.constant 112 : index
    %c0_51 = arith.constant 0 : index
    %72 = vector.load %arg16[%c112_50, %c0_51] : memref<200x128xf32, #tpu.memory_space<vmem>>, vector<8x16xf32>
    %73 = arith.truncf %72 : vector<8x16xf32> to vector<8x16xbf16>
    %c224 = arith.constant 224 : index
    %c0_52 = arith.constant 0 : index
    %74 = vector.load %arg6[%c224, %c0_52] : memref<400x128xbf16, #tpu.memory_space<vmem>>, vector<16x128xbf16>
    %cst_53 = arith.constant dense<0.000000e+00> : vector<8x128xf32>
    %75 = tpu.matmul %73, %74, %cst_53 {dimension_numbers = #tpu.dot_dimension_numbers<[1], [0], [0], [1], [0, 0, 1, 1], [], []>} : vector<8x16xbf16>, vector<16x128xbf16>, vector<8x128xf32> -> vector<8x128xf32>
    %76 = arith.addf %71, %75 : vector<8x128xf32>
    %c120 = arith.constant 120 : index
    %c0_54 = arith.constant 0 : index
    %77 = vector.load %arg16[%c120, %c0_54] : memref<200x128xf32, #tpu.memory_space<vmem>>, vector<8x16xf32>
    %78 = arith.truncf %77 : vector<8x16xf32> to vector<8x16xbf16>
    %c240 = arith.constant 240 : index
    %c0_55 = arith.constant 0 : index
    %79 = vector.load %arg6[%c240, %c0_55] : memref<400x128xbf16, #tpu.memory_space<vmem>>, vector<16x128xbf16>
    %cst_56 = arith.constant dense<0.000000e+00> : vector<8x128xf32>
    %80 = tpu.matmul %78, %79, %cst_56 {dimension_numbers = #tpu.dot_dimension_numbers<[1], [0], [0], [1], [0, 0, 1, 1], [], []>} : vector<8x16xbf16>, vector<16x128xbf16>, vector<8x128xf32> -> vector<8x128xf32>
    %81 = arith.addf %76, %80 : vector<8x128xf32>
    %c128_57 = arith.constant 128 : index
    %c0_58 = arith.constant 0 : index
    %82 = vector.load %arg16[%c128_57, %c0_58] : memref<200x128xf32, #tpu.memory_space<vmem>>, vector<8x16xf32>
    %83 = arith.truncf %82 : vector<8x16xf32> to vector<8x16xbf16>
    %c256 = arith.constant 256 : index
    %c0_59 = arith.constant 0 : index
    %84 = vector.load %arg6[%c256, %c0_59] : memref<400x128xbf16, #tpu.memory_space<vmem>>, vector<16x128xbf16>
    %cst_60 = arith.constant dense<0.000000e+00> : vector<8x128xf32>
    %85 = tpu.matmul %83, %84, %cst_60 {dimension_numbers = #tpu.dot_dimension_numbers<[1], [0], [0], [1], [0, 0, 1, 1], [], []>} : vector<8x16xbf16>, vector<16x128xbf16>, vector<8x128xf32> -> vector<8x128xf32>
    %86 = arith.addf %81, %85 : vector<8x128xf32>
    %c136 = arith.constant 136 : index
    %c0_61 = arith.constant 0 : index
    %87 = vector.load %arg16[%c136, %c0_61] : memref<200x128xf32, #tpu.memory_space<vmem>>, vector<8x16xf32>
    %88 = arith.truncf %87 : vector<8x16xf32> to vector<8x16xbf16>
    %c272 = arith.constant 272 : index
    %c0_62 = arith.constant 0 : index
    %89 = vector.load %arg6[%c272, %c0_62] : memref<400x128xbf16, #tpu.memory_space<vmem>>, vector<16x128xbf16>
    %cst_63 = arith.constant dense<0.000000e+00> : vector<8x128xf32>
    %90 = tpu.matmul %88, %89, %cst_63 {dimension_numbers = #tpu.dot_dimension_numbers<[1], [0], [0], [1], [0, 0, 1, 1], [], []>} : vector<8x16xbf16>, vector<16x128xbf16>, vector<8x128xf32> -> vector<8x128xf32>
    %91 = arith.addf %86, %90 : vector<8x128xf32>
    %c144_64 = arith.constant 144 : index
    %c0_65 = arith.constant 0 : index
    %92 = vector.load %arg16[%c144_64, %c0_65] : memref<200x128xf32, #tpu.memory_space<vmem>>, vector<8x16xf32>
    %93 = arith.truncf %92 : vector<8x16xf32> to vector<8x16xbf16>
    %c288 = arith.constant 288 : index
    %c0_66 = arith.constant 0 : index
    %94 = vector.load %arg6[%c288, %c0_66] : memref<400x128xbf16, #tpu.memory_space<vmem>>, vector<16x128xbf16>
    %cst_67 = arith.constant dense<0.000000e+00> : vector<8x128xf32>
    %95 = tpu.matmul %93, %94, %cst_67 {dimension_numbers = #tpu.dot_dimension_numbers<[1], [0], [0], [1], [0, 0, 1, 1], [], []>} : vector<8x16xbf16>, vector<16x128xbf16>, vector<8x128xf32> -> vector<8x128xf32>
    %96 = arith.addf %91, %95 : vector<8x128xf32>
    %c152 = arith.constant 152 : index
    %c0_68 = arith.constant 0 : index
    %97 = vector.load %arg16[%c152, %c0_68] : memref<200x128xf32, #tpu.memory_space<vmem>>, vector<8x16xf32>
    %98 = arith.truncf %97 : vector<8x16xf32> to vector<8x16xbf16>
    %c304 = arith.constant 304 : index
    %c0_69 = arith.constant 0 : index
    %99 = vector.load %arg6[%c304, %c0_69] : memref<400x128xbf16, #tpu.memory_space<vmem>>, vector<16x128xbf16>
    %cst_70 = arith.constant dense<0.000000e+00> : vector<8x128xf32>
    %100 = tpu.matmul %98, %99, %cst_70 {dimension_numbers = #tpu.dot_dimension_numbers<[1], [0], [0], [1], [0, 0, 1, 1], [], []>} : vector<8x16xbf16>, vector<16x128xbf16>, vector<8x128xf32> -> vector<8x128xf32>
    %101 = arith.addf %96, %100 : vector<8x128xf32>
    %c160_71 = arith.constant 160 : index
    %c0_72 = arith.constant 0 : index
    %102 = vector.load %arg16[%c160_71, %c0_72] : memref<200x128xf32, #tpu.memory_space<vmem>>, vector<8x16xf32>
    %103 = arith.truncf %102 : vector<8x16xf32> to vector<8x16xbf16>
    %c320 = arith.constant 320 : index
    %c0_73 = arith.constant 0 : index
    %104 = vector.load %arg6[%c320, %c0_73] : memref<400x128xbf16, #tpu.memory_space<vmem>>, vector<16x128xbf16>
    %cst_74 = arith.constant dense<0.000000e+00> : vector<8x128xf32>
    %105 = tpu.matmul %103, %104, %cst_74 {dimension_numbers = #tpu.dot_dimension_numbers<[1], [0], [0], [1], [0, 0, 1, 1], [], []>} : vector<8x16xbf16>, vector<16x128xbf16>, vector<8x128xf32> -> vector<8x128xf32>
    %106 = arith.addf %101, %105 : vector<8x128xf32>
    %c168 = arith.constant 168 : index
    %c0_75 = arith.constant 0 : index
    %107 = vector.load %arg16[%c168, %c0_75] : memref<200x128xf32, #tpu.memory_space<vmem>>, vector<8x16xf32>
    %108 = arith.truncf %107 : vector<8x16xf32> to vector<8x16xbf16>
    %c336 = arith.constant 336 : index
    %c0_76 = arith.constant 0 : index
    %109 = vector.load %arg6[%c336, %c0_76] : memref<400x128xbf16, #tpu.memory_space<vmem>>, vector<16x128xbf16>
    %cst_77 = arith.constant dense<0.000000e+00> : vector<8x128xf32>
    %110 = tpu.matmul %108, %109, %cst_77 {dimension_numbers = #tpu.dot_dimension_numbers<[1], [0], [0], [1], [0, 0, 1, 1], [], []>} : vector<8x16xbf16>, vector<16x128xbf16>, vector<8x128xf32> -> vector<8x128xf32>
    %111 = arith.addf %106, %110 : vector<8x128xf32>
    %c176_78 = arith.constant 176 : index
    %c0_79 = arith.constant 0 : index
    %112 = vector.load %arg16[%c176_78, %c0_79] : memref<200x128xf32, #tpu.memory_space<vmem>>, vector<8x16xf32>
    %113 = arith.truncf %112 : vector<8x16xf32> to vector<8x16xbf16>
    %c352 = arith.constant 352 : index
    %c0_80 = arith.constant 0 : index
    %114 = vector.load %arg6[%c352, %c0_80] : memref<400x128xbf16, #tpu.memory_space<vmem>>, vector<16x128xbf16>
    %cst_81 = arith.constant dense<0.000000e+00> : vector<8x128xf32>
    %115 = tpu.matmul %113, %114, %cst_81 {dimension_numbers = #tpu.dot_dimension_numbers<[1], [0], [0], [1], [0, 0, 1, 1], [], []>} : vector<8x16xbf16>, vector<16x128xbf16>, vector<8x128xf32> -> vector<8x128xf32>
    %116 = arith.addf %111, %115 : vector<8x128xf32>
    %c184 = arith.constant 184 : index
    %c0_82 = arith.constant 0 : index
    %117 = vector.load %arg16[%c184, %c0_82] : memref<200x128xf32, #tpu.memory_space<vmem>>, vector<8x16xf32>
    %118 = arith.truncf %117 : vector<8x16xf32> to vector<8x16xbf16>
    %c368 = arith.constant 368 : index
    %c0_83 = arith.constant 0 : index
    %119 = vector.load %arg6[%c368, %c0_83] : memref<400x128xbf16, #tpu.memory_space<vmem>>, vector<16x128xbf16>
    %cst_84 = arith.constant dense<0.000000e+00> : vector<8x128xf32>
    %120 = tpu.matmul %118, %119, %cst_84 {dimension_numbers = #tpu.dot_dimension_numbers<[1], [0], [0], [1], [0, 0, 1, 1], [], []>} : vector<8x16xbf16>, vector<16x128xbf16>, vector<8x128xf32> -> vector<8x128xf32>
    %121 = arith.addf %116, %120 : vector<8x128xf32>
    %c192_85 = arith.constant 192 : index
    %c0_86 = arith.constant 0 : index
    %122 = vector.load %arg16[%c192_85, %c0_86] : memref<200x128xf32, #tpu.memory_space<vmem>>, vector<8x16xf32>
    %123 = arith.truncf %122 : vector<8x16xf32> to vector<8x16xbf16>
    %c384 = arith.constant 384 : index
    %c0_87 = arith.constant 0 : index
    %124 = vector.load %arg6[%c384, %c0_87] : memref<400x128xbf16, #tpu.memory_space<vmem>>, vector<16x128xbf16>
    %cst_88 = arith.constant dense<0.000000e+00> : vector<8x128xf32>
    %125 = tpu.matmul %123, %124, %cst_88 {dimension_numbers = #tpu.dot_dimension_numbers<[1], [0], [0], [1], [0, 0, 1, 1], [], []>} : vector<8x16xbf16>, vector<16x128xbf16>, vector<8x128xf32> -> vector<8x128xf32>
    %126 = arith.addf %121, %125 : vector<8x128xf32>
    %c0_89 = arith.constant 0 : index
    %c0_90 = arith.constant 0 : index
    %127 = vector.load %arg7[%c0_89, %c0_90] : memref<1x128xf32, #tpu.memory_space<vmem>>, vector<1x128xf32>
    %128 = vector.broadcast %127 : vector<1x128xf32> to vector<8x128xf32>
    %129 = arith.addf %126, %128 : vector<8x128xf32>
    %cst_91 = arith.constant 0.000000e+00 : f32
    %130 = vector.broadcast %cst_91 : f32 to vector<8x128xf32>
    %131 = arith.maximumf %129, %130 : vector<8x128xf32>
    %132 = arith.truncf %131 : vector<8x128xf32> to vector<8x128xbf16>
    %c0_92 = arith.constant 0 : index
    %c0_93 = arith.constant 0 : index
    %133 = vector.load %arg8[%c0_92, %c0_93] : memref<128x128xbf16, #tpu.memory_space<vmem>>, vector<128x128xbf16>
    %cst_94 = arith.constant dense<0.000000e+00> : vector<8x128xf32>
    %134 = tpu.matmul %132, %133, %cst_94 {dimension_numbers = #tpu.dot_dimension_numbers<[1], [0], [0], [1], [0, 0, 1, 1], [], []>} : vector<8x128xbf16>, vector<128x128xbf16>, vector<8x128xf32> -> vector<8x128xf32>
    %c0_95 = arith.constant 0 : index
    %c0_96 = arith.constant 0 : index
    %135 = vector.load %arg9[%c0_95, %c0_96] : memref<1x128xf32, #tpu.memory_space<vmem>>, vector<1x128xf32>
    %136 = vector.broadcast %135 : vector<1x128xf32> to vector<8x128xf32>
    %137 = arith.addf %134, %136 : vector<8x128xf32>
    %cst_97 = arith.constant 0.000000e+00 : f32
    %138 = vector.broadcast %cst_97 : f32 to vector<8x128xf32>
    %139 = arith.maximumf %137, %138 : vector<8x128xf32>
    %140 = arith.truncf %139 : vector<8x128xf32> to vector<8x128xbf16>
    %c0_98 = arith.constant 0 : index
    %c0_99 = arith.constant 0 : index
    %141 = vector.load %arg10[%c0_98, %c0_99] : memref<128x128xbf16, #tpu.memory_space<vmem>>, vector<128x128xbf16>
    %cst_100 = arith.constant dense<0.000000e+00> : vector<8x128xf32>
    %142 = tpu.matmul %140, %141, %cst_100 {dimension_numbers = #tpu.dot_dimension_numbers<[1], [0], [0], [1], [0, 0, 1, 1], [], []>} : vector<8x128xbf16>, vector<128x128xbf16>, vector<8x128xf32> -> vector<8x128xf32>
    %c0_101 = arith.constant 0 : index
    %c0_102 = arith.constant 0 : index
    %143 = vector.load %arg11[%c0_101, %c0_102] : memref<1x128xf32, #tpu.memory_space<vmem>>, vector<1x128xf32>
    %144 = vector.broadcast %143 : vector<1x128xf32> to vector<8x128xf32>
    %145 = arith.addf %142, %144 : vector<8x128xf32>
    %c0_103 = arith.constant 0 : index
    %c0_104 = arith.constant 0 : index
    %146 = vector.load %arg12[%c0_103, %c0_104] : memref<8x128xf32, #tpu.memory_space<vmem>>, vector<8x128xf32>
    tpu.vector_store %arg12[%c0_103, %c0_104], %145 {strides = array<i32>} : memref<8x128xf32, #tpu.memory_space<vmem>>, vector<8x128xf32>,
    return
  }
  func.func @transform_0(%arg0: i32) -> (i32, i32, i32) {
    %c0_i32 = arith.constant 0 : i32
    %c0_i32_0 = arith.constant 0 : i32
    %c0_i32_1 = arith.constant 0 : i32
    return %arg0, %c0_i32, %c0_i32_0 : i32, i32, i32
  }
  func.func @transform_1(%arg0: i32) -> (i32, i32) {
    %c0_i32 = arith.constant 0 : i32
    %c0_i32_0 = arith.constant 0 : i32
    %c0_i32_1 = arith.constant 0 : i32
    return %c0_i32, %c0_i32_0 : i32, i32
  }
  func.func @transform_2(%arg0: i32) -> (i32, i32) {
    %c0_i32 = arith.constant 0 : i32
    %c0_i32_0 = arith.constant 0 : i32
    %c0_i32_1 = arith.constant 0 : i32
    return %c0_i32, %c0_i32_0 : i32, i32
  }
  func.func @transform_3(%arg0: i32) -> (i32, i32, i32) {
    %c0_i32 = arith.constant 0 : i32
    %c0_i32_0 = arith.constant 0 : i32
    %c0_i32_1 = arith.constant 0 : i32
    %c0_i32_2 = arith.constant 0 : i32
    return %c0_i32, %c0_i32_0, %c0_i32_1 : i32, i32, i32
  }
  func.func @transform_4(%arg0: i32) -> (i32, i32) {
    %c0_i32 = arith.constant 0 : i32
    %c0_i32_0 = arith.constant 0 : i32
    %c0_i32_1 = arith.constant 0 : i32
    return %c0_i32, %c0_i32_0 : i32, i32
  }
  func.func @transform_5(%arg0: i32) -> (i32, i32) {
    %c0_i32 = arith.constant 0 : i32
    %c0_i32_0 = arith.constant 0 : i32
    %c0_i32_1 = arith.constant 0 : i32
    return %c0_i32, %c0_i32_0 : i32, i32
  }
  func.func @transform_6(%arg0: i32) -> (i32, i32) {
    %c0_i32 = arith.constant 0 : i32
    %c0_i32_0 = arith.constant 0 : i32
    %c0_i32_1 = arith.constant 0 : i32
    return %c0_i32, %c0_i32_0 : i32, i32
  }
  func.func @transform_7(%arg0: i32) -> (i32, i32) {
    %c0_i32 = arith.constant 0 : i32
    %c0_i32_0 = arith.constant 0 : i32
    %c0_i32_1 = arith.constant 0 : i32
    return %c0_i32, %c0_i32_0 : i32, i32
  }
  func.func @transform_8(%arg0: i32) -> (i32, i32) {
    %c0_i32 = arith.constant 0 : i32
    %c0_i32_0 = arith.constant 0 : i32
    %c0_i32_1 = arith.constant 0 : i32
    return %c0_i32, %c0_i32_0 : i32, i32
  }
  func.func @transform_9(%arg0: i32) -> (i32, i32) {
    %c0_i32 = arith.constant 0 : i32
    %c0_i32_0 = arith.constant 0 : i32
    %c0_i32_1 = arith.constant 0 : i32
    return %c0_i32, %c0_i32_0 : i32, i32
  }
  func.func @transform_10(%arg0: i32) -> (i32, i32) {
    %c0_i32 = arith.constant 0 : i32
    %c0_i32_0 = arith.constant 0 : i32
    %c0_i32_1 = arith.constant 0 : i32
    return %c0_i32, %c0_i32_0 : i32, i32
  }
  func.func @transform_11(%arg0: i32) -> (i32, i32) {
    %c0_i32 = arith.constant 0 : i32
    %c0_i32_0 = arith.constant 0 : i32
    return %arg0, %c0_i32 : i32, i32
  }
}

</mosaic_0001>

<bundles_post_ra>
// kernel: lenet_forward.1
= control target key start
LH: loop header
LB: loop body
LE: loop exit
PB: predicated region body
PF: predicated region fallthrough
CT: control target
= control target key end

     0   :  { %s5932_s17 = smov 0   ;;  %s7440_s0 = inlined_call_operand.vmem [shape: bf16[8,800,75], index: 0, kind: input, shape index: {}]   ;;  %s7441_s1 = inlined_call_operand.vmem [shape: bf16[75,128], index: 1, kind: input, shape index: {}]   ;;  %s7442_s2 = inlined_call_operand.vmem [shape: f32[1,128], index: 2, kind: input, shape index: {}]   ;;  %s7443_s3 = inlined_call_operand.vmem [shape: bf16[5,80,128], index: 3, kind: input, shape index: {}]   ;;  %s7444_s4 = inlined_call_operand.vmem [shape: f32[1,128], index: 4, kind: input, shape index: {}]   ;;  %s7445_s5 = inlined_call_operand.vmem [shape: bf16[400,128], index: 5, kind: input, shape index: {}]   ;;  %s7446_s6 = inlined_call_operand.vmem [shape: f32[1,128], index: 6, kind: input, shape index: {}]   ;;  %s7447_s7 = inlined_call_operand.vmem [shape: bf16[128,128], index: 7, kind: input, shape index: {}]   ;;  %s7448_s8 = inlined_call_operand.vmem [shape: f32[1,128], index: 8, kind: input, shape index: {}]   ;;  %s7449_s9 = inlined_call_operand.vmem [shape: bf16[128,128], index: 9, kind: input, shape index: {}]   ;;  %s7450_s10 = inlined_call_operand.vmem [shape: f32[1,128], index: 10, kind: input, shape index: {}]   ;;  %s7451_s11 = inlined_call_operand.vmem [shape: f32[8,128], index: 11, kind: output, shape index: {}]  }
   0x1 LB: > { %v5734_v0 = vld [vmem:[%s7441_s1 + $0x20] sm:$0x3f]   ;;  %vm588_vm0 = vcmask 1044480   ;;  %vm589_vm1 = vcmask 1045504   ;;  %v5863_v1 = vmov 65535   ;;  %v5735_v4 = vld [vmem:[%s7441_s1 + $0x18] sm:$0xff]   ;;  %s5861_s17 = sphi %s5932_s17, %s44_s17  }
   0x2   : > { %v590_v2 = vsel %vm588_vm0, 4294967295, %v5863_v1  ;;  %s4983_s22 = smul.u32 400, %s5861_s17  ;;  %vm437_vm2 = vcmask 613376   ;;  %v5736_v6 = vld [vmem:[%s7441_s1 + $0x10] sm:$0xff]   ;;  %v5737_v8 = vld [vmem:[%s7441_s1 + $0x8] sm:$0xff]   ;;  %v5738_v9 = vld [vmem:[%s7441_s1] sm:$0xff]  }
   0x3   : > { %v591_v3 = vsel %vm589_vm1, %v590_v2, 0  ;;  %s5864_s15 = smov 16   ;;  %s5865_s16 = smov 32   ;;  %vm5869_vm3 = vmmov 0   ;;  %vm1563_vm4 = vcmask 130048   ;;  %vm1582_vm5 = vcmask 261120  }
   0x4   : > { %v593_v5 = vand.u32 %v5734_v0, %v591_v3  ;;  %s5950_s27 = scalar_lea.vmem %s7440_s0, %s4983_s22  ;;  %s5866_s18 = smov 64   ;;  %vm1620_vm6 = vcmask 523264   ;;  %vm1601_vm7 = vcmask 392192   ;;  %vm1639_vm8 = vcmask 654336  }
   0x5   : > { %v5739_v7 = vld [vmem:[%s5950_s27] sm:$0xff]   ;;  %v5740_v10 = vld [vmem:[%s5950_s27 + $0x8] sm:$0xff]   ;;  %v5741_v11 = vld [vmem:[%s5950_s27 + $0x10] sm:$0xff]   ;;  %s5868_s23 = smov 48   ;;  %s7056_s21 = scalar_lea.vmem [#allocation5], %s5861_s17 }
   0x6   : > { %5177 = vmatprep.subr.bf16.mxu0 %v593_v5  ;;  %5187 = vmatprep.mubr.msk.bf16.mxu0 %vm437_vm2, %v5739_v7  ;;  %v5742_v12 = vld [vmem:[%s5950_s27 + $0x18] sm:$0xff]   ;;  %v5743_v13 = vld [vmem:[%s5950_s27 + $0x20] sm:$0xff]   ;;  %v5744_v14 = vld [vmem:[%s5950_s27 + $0x28] sm:$0xff]   ;;  %s44_s17 = sadd.s32 1, %s5861_s17  }
   0x7   : > { %5178 = vmatpush3.bf16.msra.mxu0 %v593_v5  ;;  %v5745_v15 = vld [vmem:[%s5950_s27 + $0x30] sm:$0xff]   ;;  %v5746_v16 = vld [vmem:[%s5950_s27 + $0x38] sm:$0xff]   ;;  %v5747_v17 = vld [vmem:[%s5950_s27 + $0x40] sm:$0xff]   ;;  %p41_p0 = scmp.ge.s32.totalorder %s44_s17, 8  }
   0x8   : > { %5179 = vmatprep.subr.bf16.mxu0 %v5735_v4  ;;  %v5748_v18 = vld [vmem:[%s5950_s27 + $0x48] sm:$0xff]   ;;  %v5749_v19 = vld [vmem:[%s5950_s27 + $0x50] sm:$0xff]   ;;  %v5750_v20 = vld [vmem:[%s5950_s27 + $0x58] sm:$0xff]   ;;  %vm5871_vm9 = vmmov (%p41_p0), 0  }
   0x9   : > { %v5751_v21 = vld [vmem:[%s5950_s27 + $0x60] sm:$0xff]   ;;  %v5752_v22 = vld [vmem:[%s5950_s27 + $0x68] sm:$0xff]   ;;  %v5753_v23 = vld [vmem:[%s5950_s27 + $0x70] sm:$0xff]  }
   0xa   : > { %v5754_v24 = vld [vmem:[%s5950_s27 + $0x78] sm:$0xff]   ;;  %v5755_v25 = vld [vmem:[%s5950_s27 + $0x80] sm:$0xff]   ;;  %v5756_v26 = vld [vmem:[%s5950_s27 + $0x88] sm:$0xff]  }
   0xb   : > { %5180 = vmatpush3.bf16.msra.mxu0 %v5735_v4  ;;  %v5757_v27 = vld [vmem:[%s5950_s27 + $0x90] sm:$0xff]   ;;  %v5758_v28 = vld [vmem:[%s5950_s27 + $0x98] sm:$0xff]   ;;  %v5759_v29 = vld [vmem:[%s5950_s27 + $0xa0] sm:$0xff]  }
   0xc   : > { %5181 = vmatprep.subr.bf16.mxu0 %v5736_v6  ;;  %v5760_v30 = vld [vmem:[%s5950_s27 + $0xa8] sm:$0xff]   ;;  %v5761_v31 = vld [vmem:[%s5950_s27 + $0xb0] sm:$0xff]   ;;  %v5762_v32 = vld [vmem:[%s5950_s27 + $0xb8] sm:$0xff]  }
   0xd   : > { %v5763_v33 = vld [vmem:[%s5950_s27 + $0xc0] sm:$0xff]   ;;  %v5764_v34 = vld [vmem:[%s5950_s27 + $0xc8] sm:$0xff]   ;;  %v5765_v35 = vld [vmem:[%s5950_s27 + $0xd0] sm:$0xff]  }
   0xe   : > { %v5766_v36 = vld [vmem:[%s5950_s27 + $0xd8] sm:$0xff]   ;;  %v5767_v37 = vld [vmem:[%s5950_s27 + $0xe0] sm:$0xff]   ;;  %v5768_v38 = vld [vmem:[%s5950_s27 + $0xe8] sm:$0xff]  }
   0xf   : > { %5182 = vmatpush3.bf16.msra.mxu0 %v5736_v6  ;;  %v5769_v39 = vld [vmem:[%s5950_s27 + $0xf0] sm:$0xff]   ;;  %v5770_v40 = vld [vmem:[%s5950_s27 + $0xf8] sm:$0xff]   ;;  %v5771_v41 = vld [vmem:[%s5950_s27 + $0x100] sm:$0xff]  }
  0x10   : > { %5183 = vmatprep.subr.bf16.mxu0 %v5737_v8  ;;  %v5772_v42 = vld [vmem:[%s5950_s27 + $0x108] sm:$0xff]   ;;  %v5773_v43 = vld [vmem:[%s5950_s27 + $0x110] sm:$0xff]   ;;  %v5774_v44 = vld [vmem:[%s5950_s27 + $0x118] sm:$0xff]  }
  0x11   : > { %v5775_v45 = vld [vmem:[%s5950_s27 + $0x120] sm:$0xff]   ;;  %v5776_v46 = vld [vmem:[%s5950_s27 + $0x128] sm:$0xff]   ;;  %v5777_v47 = vld [vmem:[%s5950_s27 + $0x130] sm:$0xff]  }
  0x12   : > { %v5778_v48 = vld [vmem:[%s5950_s27 + $0x138] sm:$0xff]   ;;  %v5779_v49 = vld [vmem:[%s5950_s27 + $0x140] sm:$0xff]   ;;  %v5780_v50 = vld [vmem:[%s5950_s27 + $0x148] sm:$0xff]  }
  0x13   : > { %5184 = vmatpush3.bf16.msra.mxu0 %v5737_v8  ;;  %v5781_v51 = vld [vmem:[%s5950_s27 + $0x150] sm:$0xff]   ;;  %v5782_v52 = vld [vmem:[%s5950_s27 + $0x158] sm:$0xff]   ;;  %v5783_v53 = vld [vmem:[%s5950_s27 + $0x160] sm:$0xff]  }
  0x14   : > { %5185 = vmatprep.subr.bf16.mxu0 %v5738_v9  ;;  %v5784_v54 = vld [vmem:[%s5950_s27 + $0x168] sm:$0xff]   ;;  %v5785_v55 = vld [vmem:[%s5950_s27 + $0x170] sm:$0xff]   ;;  %v5786_v56 = vld [vmem:[%s5950_s27 + $0x178] sm:$0xff]  }
  0x15   : > { %v5787_v57 = vld [vmem:[%s5950_s27 + $0x180] sm:$0xff]   ;;  %v5788_v58 = vld [vmem:[%s5950_s27 + $0x188] sm:$0xff]  }
  0x17   : > { %5186 = vmatpush3.bf16.msra.mxu0 %v5738_v9 }
  0x1a   : > { %5188 = vmatmul.mubr.msk.bf16.vlgmr.msra.gmra.mxu0 %vm437_vm2, %v5740_v10 }
  0x1b   : > { %5191 = vmatprep.mubr.msk.bf16.mxu0 %vm437_vm2, %v5741_v11 }
  0x22   : > { %5192 = vmatmul.mubr.msk.bf16.gmra.mxu0 %vm437_vm2, %v5742_v12 }
  0x23   : > { %5195 = vmatprep.mubr.msk.bf16.mxu0 %vm437_vm2, %v5743_v13 }
  0x2a   : > { %5196 = vmatmul.mubr.msk.bf16.gmra.mxu0 %vm437_vm2, %v5744_v14 }
  0x2b   : > { %5199 = vmatprep.mubr.msk.bf16.mxu0 %vm437_vm2, %v5745_v15 }
  0x32   : > { %5200 = vmatmul.mubr.msk.bf16.gmra.mxu0 %vm437_vm2, %v5746_v16 }
  0x33   : > { %5203 = vmatprep.mubr.msk.bf16.mxu0 %vm437_vm2, %v5747_v17 }
  0x3a   : > { %5204 = vmatmul.mubr.msk.bf16.gmra.mxu0 %vm437_vm2, %v5748_v18 }
  0x3b   : > { %5207 = vmatprep.mubr.msk.bf16.mxu0 %vm437_vm2, %v5749_v19 }
  0x42   : > { %5208 = vmatmul.mubr.msk.bf16.gmra.mxu0 %vm437_vm2, %v5750_v20 }
  0x43   : > { %5211 = vmatprep.mubr.msk.bf16.mxu0 %vm437_vm2, %v5751_v21 }
  0x4a   : > { %5212 = vmatmul.mubr.msk.bf16.gmra.mxu0 %vm437_vm2, %v5752_v22 }
  0x4b   : > { %5215 = vmatprep.mubr.msk.bf16.mxu0 %vm437_vm2, %v5753_v23 }
  0x52   : > { %5216 = vmatmul.mubr.msk.bf16.gmra.mxu0 %vm437_vm2, %v5754_v24 }
  0x53   : > { %5219 = vmatprep.mubr.msk.bf16.mxu0 %vm437_vm2, %v5755_v25 }
  0x5a   : > { %5220 = vmatmul.mubr.msk.bf16.gmra.mxu0 %vm437_vm2, %v5756_v26 }
  0x5b   : > { %5223 = vmatprep.mubr.msk.bf16.mxu0 %vm437_vm2, %v5757_v27 }
  0x62   : > { %5224 = vmatmul.mubr.msk.bf16.gmra.mxu0 %vm437_vm2, %v5758_v28 }
  0x63   : > { %5227 = vmatprep.mubr.msk.bf16.mxu0 %vm437_vm2, %v5759_v29 }
  0x6a   : > { %5228 = vmatmul.mubr.msk.bf16.gmra.mxu0 %vm437_vm2, %v5760_v30 }
  0x6b   : > { %5231 = vmatprep.mubr.msk.bf16.mxu0 %vm437_vm2, %v5761_v31 }
  0x72   : > { %5232 = vmatmul.mubr.msk.bf16.gmra.mxu0 %vm437_vm2, %v5762_v32 }
  0x73   : > { %5235 = vmatprep.mubr.msk.bf16.mxu0 %vm437_vm2, %v5763_v33 }
  0x7a   : > { %5236 = vmatmul.mubr.msk.bf16.gmra.mxu0 %vm437_vm2, %v5764_v34 }
  0x7b   : > { %5239 = vmatprep.mubr.msk.bf16.mxu0 %vm437_vm2, %v5765_v35 }
  0x82   : > { %5240 = vmatmul.mubr.msk.bf16.gmra.mxu0 %vm437_vm2, %v5766_v36 }
  0x83   : > { %5243 = vmatprep.mubr.msk.bf16.mxu0 %vm437_vm2, %v5767_v37 }
  0x8a   : > { %5244 = vmatmul.mubr.msk.bf16.gmra.mxu0 %vm437_vm2, %v5768_v38 }
  0x8b   : > { %5247 = vmatprep.mubr.msk.bf16.mxu0 %vm437_vm2, %v5769_v39 }
  0x92   : > { %5248 = vmatmul.mubr.msk.bf16.gmra.mxu0 %vm437_vm2, %v5770_v40 }
  0x93   : > { %5251 = vmatprep.mubr.msk.bf16.mxu0 %vm437_vm2, %v5771_v41 }
  0x9a   : > { %5252 = vmatmul.mubr.msk.bf16.gmra.mxu0 %vm437_vm2, %v5772_v42 }
  0x9b   : > { %5255 = vmatprep.mubr.msk.bf16.mxu0 %vm437_vm2, %v5773_v43 }
  0xa2   : > { %5256 = vmatmul.mubr.msk.bf16.gmra.mxu0 %vm437_vm2, %v5774_v44 }
  0xa3   : > { %5259 = vmatprep.mubr.msk.bf16.mxu0 %vm437_vm2, %v5775_v45 }
  0xaa   : > { %5260 = vmatmul.mubr.msk.bf16.gmra.mxu0 %vm437_vm2, %v5776_v46 }
  0xab   : > { %5263 = vmatprep.mubr.msk.bf16.mxu0 %vm437_vm2, %v5777_v47 }
  0xb2   : > { %5264 = vmatmul.mubr.msk.bf16.gmra.mxu0 %vm437_vm2, %v5778_v48 }
  0xb3   : > { %5267 = vmatprep.mubr.msk.bf16.mxu0 %vm437_vm2, %v5779_v49 }
  0xba   : > { %5268 = vmatmul.mubr.msk.bf16.gmra.mxu0 %vm437_vm2, %v5780_v50 }
  0xbb   : > { %5271 = vmatprep.mubr.msk.bf16.mxu0 %vm437_vm2, %v5781_v51 }
  0xc2   : > { %5272 = vmatmul.mubr.msk.bf16.gmra.mxu0 %vm437_vm2, %v5782_v52 }
  0xc3   : > { %5275 = vmatprep.mubr.msk.bf16.mxu0 %vm437_vm2, %v5783_v53 }
  0xca   : > { %5276 = vmatmul.mubr.msk.bf16.gmra.mxu0 %vm437_vm2, %v5784_v54 }
  0xcb   : > { %5279 = vmatprep.mubr.msk.bf16.mxu0 %vm437_vm2, %v5785_v55 }
  0xd2   : > { %5280 = vmatmul.mubr.msk.bf16.gmra.mxu0 %vm437_vm2, %v5786_v56 }
  0xd3   : > { %5283 = vmatprep.mubr.msk.bf16.mxu0 %vm437_vm2, %v5787_v57 }
  0xda   : > { %v6057_v59 = vpop.f32.mrf.mxu0  ;;  %5284 = vmatmul.mubr.msk.bf16.gmra.mxu0 %vm437_vm2, %v5788_v58 }
  0xdc   : > { %v6060_v60 = vpop.f32.mrf.mxu0 }
  0xde   : > { %v6062_v61 = vpop.f32.mrf.mxu0 }
  0xe0   : > { %v6064_v62 = vpop.f32.mrf.mxu0 }
  0xe2   : > { %v6066_v63 = vpop.f32.mrf.mxu0 }
  0xe4   : > { %v6068_v0 = vpop.f32.mrf.mxu0 }
  0xe6   : > { %v6070_v1 = vpop.f32.mrf.mxu0 }
  0xe8   : > { %v6072_v2 = vpop.f32.mrf.mxu0 }
  0xea   : > { %v6074_v3 = vpop.f32.mrf.mxu0 }
  0xec   : > { %v6076_v4 = vpop.f32.mrf.mxu0 }
  0xee   : > { %v6078_v5 = vpop.f32.mrf.mxu0 }
  0xf0   : > { %v6080_v6 = vpop.f32.mrf.mxu0 }
  0xf2   : > { %v6082_v7 = vpop.f32.mrf.mxu0 }
  0xf4   : > { %v6084_v8 = vpop.f32.mrf.mxu0 }
  0xf6   : > { %v6086_v9 = vpop.f32.mrf.mxu0 }
  0xf8   : > { %v6088_v10 = vpop.f32.mrf.mxu0 }
  0xfa   : > { %v6090_v11 = vpop.f32.mrf.mxu0 }
  0xfb   : > { %7464 = vst [vmem:[#allocation6_spill] sm:$0xff] %v6090_v11 }
  0xfc   : > { %v6092_v12 = vpop.f32.mrf.mxu0 }
  0xfe   : > { %v6094_v13 = vpop.f32.mrf.mxu0 }
  0xff   : > { %7465 = vst [vmem:[#allocation7_spill] sm:$0xff] %v6094_v13 }
 0x100   : > { %v6096_v14 = vpop.f32.mrf.mxu0 }
 0x101   : > { %7466 = vst [vmem:[#allocation8_spill] sm:$0xff] %v6096_v14 }
 0x102   : > { %v6098_v15 = vpop.f32.mrf.mxu0 }
 0x103   : > { %7467 = vst [vmem:[#allocation9_spill] sm:$0xff] %v6098_v15 }
 0x104   : > { %v6100_v16 = vpop.f32.mrf.mxu0 }
 0x105   : > { %7468 = vst [vmem:[#allocation10_spill] sm:$0xff] %v6100_v16 }
 0x106   : > { %v6102_v17 = vpop.f32.mrf.mxu0 }
 0x107   : > { %7469 = vst [vmem:[#allocation11_spill] sm:$0xff] %v6102_v17 }
 0x108   : > { %v6104_v18 = vpop.f32.mrf.mxu0 }
 0x109   : > { %7470 = vst [vmem:[#allocation12_spill] sm:$0xff] %v6104_v18 }
 0x10a   : > { %v6106_v19 = vpop.f32.mrf.mxu0 }
 0x10c   : > { %v6108_v20 = vpop.f32.mrf.mxu0 }
 0x10d   : > { %7471 = vst [vmem:[#allocation13_spill] sm:$0xff] %v6108_v20 }
 0x10e   : > { %v6110_v21 = vpop.f32.mrf.mxu0 }
 0x110   : > { %v6114_v23 = vpop.f32.mrf.mxu0 }
 0x111   : > { %v1028_v16 = vmax.f32 %v6060_v60, %v6114_v23 }
 0x112   : > { %v6116_v24 = vpop.f32.mrf.mxu0 }
 0x114   : > { %v6118_v25 = vpop.f32.mrf.mxu0 }
 0x115   : > { %v7487_v23 = vmax.f32 %v6062_v61, %v6118_v25  ;;  %v7489_v25 = vmax.f32 %v6057_v59, %v6110_v21 }
 0x116   : > { %v6122_v27 = vpop.f32.mrf.mxu0 }
 0x118   : > { %v6126_v29 = vpop.f32.mrf.mxu0 }
 0x11a   : > { %v6130_v31 = vpop.f32.mrf.mxu0 }
 0x11c   : > { %v6132_v32 = vpop.f32.mrf.mxu0 }
 0x11e   : > { %v6136_v34 = vpop.f32.mrf.mxu0 }
 0x120   : > { %v6140_v36 = vpop.f32.mrf.mxu0 }
 0x122   : > { %v6144_v38 = vpop.f32.mrf.mxu0 }
 0x124   : > { %v6146_v39 = vpop.f32.mrf.mxu0 }
 0x126   : > { %v6150_v41 = vpop.f32.mrf.mxu0 }
 0x128   : > { %v6154_v43 = vpop.f32.mrf.mxu0 }
 0x12a   : > { %v6158_v45 = vpop.f32.mrf.mxu0 }
 0x12b   : > { %7472 = vst [vmem:[#allocation14_spill] sm:$0xff] %v6158_v45 }
 0x12c   : > { %v6160_v46 = vpop.f32.mrf.mxu0 }
 0x12e   : > { %v6164_v48 = vpop.f32.mrf.mxu0 }
 0x12f   : > { %7473 = vst [vmem:[#allocation15_spill] sm:$0xff] %v6164_v48 }
 0x130   : > { %v6168_v50 = vpop.f32.mrf.mxu0 }
 0x132   : > { %v6172_v52 = vpop.f32.mrf.mxu0 }
 0x133   : > { %7474 = vst [vmem:[#allocation16_spill] sm:$0xff] %v6172_v52 }
 0x134   : > { %v6174_v53 = vpop.f32.mrf.mxu0 }
 0x135   : > { %7475 = vst [vmem:[#allocation17_spill] sm:$0xff] %v6174_v53 }
 0x136   : > { %v6178_v55 = vpop.f32.mrf.mxu0 }
 0x137   : > { %7476 = vst [vmem:[#allocation18_spill] sm:$0xff] %v6178_v55 }
 0x138   : > { %v6182_v57 = vpop.f32.mrf.mxu0 }
 0x139   : > { %7477 = vst [vmem:[#allocation19_spill] sm:$0xff] %v6182_v57 }
 0x13a   : > { %v5237_v49 = vpop.f32.mrf.mxu0 }
 0x13c   : > { %v6186_v42 = vpop.f32.mrf.mxu0 }
 0x13d   : > { %7478 = vst [vmem:[#allocation20_spill] sm:$0xff] %v6186_v42 }
 0x13e   : > { %v5238_v47 = vpop.f32.mrf.mxu0 }
 0x140   : > { %v6190_v35 = vpop.f32.mrf.mxu0 }
 0x141   : > { %7479 = vst [vmem:[#allocation21_spill] sm:$0xff] %v6190_v35 }
 0x142   : > { %v5241_v44 = vpop.f32.mrf.mxu0 }
 0x144   : > { %v837_v40 = vpop.f32.mrf.mxu0 }
 0x146   : > { %v5242_v56 = vpop.f32.mrf.mxu0 }
 0x148   : > { %v840_v28 = vpop.f32.mrf.mxu0 }
 0x14a   : > { %v6194_v37 = vpop.f32.mrf.mxu0 }
 0x14c   : > { %v6196_v33 = vpop.f32.mrf.mxu0 }
 0x14e   : > { %v6198_v58 = vpop.f32.mrf.mxu0 }
 0x150   : > { %v856_v22 = vpop.f32.mrf.mxu0 }
 0x152   : > { %v6200_v30 = vpop.f32.mrf.mxu0 }
 0x154   : > { %v6202_v51 = vpop.f32.mrf.mxu0 }
 0x156   : > { %v6204_v26 = vpop.f32.mrf.mxu0 }
 0x158   : > { %v6206_v55 = vpop.f32.mrf.mxu0 }
 0x15a   : > { %v6208_v54 = vpop.f32.mrf.mxu0 }
 0x15c   : > { %v6210_v15 = vpop.f32.mrf.mxu0 }
 0x15e   : > { %v6212_v35 = vpop.f32.mrf.mxu0 }
 0x15f   : > { %7480 = vst [vmem:[#allocation22_spill] sm:$0xff] %v6212_v35  ;;  %v6233_v35 = vld [vmem:[%s7442_s2] ss:$0 sm:$0xff] }
 0x160   : > { %v6214_v20 = vpop.f32.mrf.mxu0 }
 0x162   : > { %v6216_v42 = vpop.f32.mrf.mxu0 }
 0x163   : > { %7481 = vst [vmem:[#allocation23_spill] sm:$0xff] %v6216_v42 }
 0x164   : > { %v6218_v17 = vpop.f32.mrf.mxu0 }
 0x165   : > { %7482 = vst [vmem:[#allocation24_spill] sm:$0xff] %v6218_v17 }
 0x166   : > { %v6220_v18 = vpop.f32.mrf.mxu0 }
 0x167   : > { %7483 = vst [vmem:[#allocation25_spill] sm:$0xff] %v6220_v18 }
 0x168   : > { %v6222_v52 = vpop.f32.mrf.mxu0 }
 0x16a   : > { %v6224_v48 = vpop.f32.mrf.mxu0 }
 0x16b   : > { %7484 = vst [vmem:[#allocation26_spill] sm:$0xff] %v6224_v48 }
 0x16c   : > { %v6226_v11 = vpop.f32.mrf.mxu0 }
 0x16d   : > { %7485 = vst [vmem:[#allocation27_spill] sm:$0xff] %v6226_v11  ;;  %v1029_v11 = vmax.f32 %v6064_v62, %v6106_v19  ;;  %v7488_v62 = vmax.f32 %v6068_v0, %v6126_v29 }
 0x16e   : > { %v5262_v57 = vpop.f32.mrf.mxu0 }
 0x16f   : > { %v1053_v53 = vmax.f32 %v5237_v49, %v5262_v57 }
 0x170   : > { %v6235_v42 = vpop.f32.mrf.mxu0 }
 0x171   : > { %7486 = vst [vmem:[#allocation28_spill] sm:$0xff] %v6235_v42  ;;  %v1078_v17 = vmax.f32 %v1028_v16, %v1053_v53 }
 0x172   : > { %v5265_v18 = vpop.f32.mrf.mxu0 }
 0x173   : > { %v6238_v13 = vadd.f32 %v6233_v35, %v1078_v17  ;;  %v1056_v48 = vmax.f32 %v840_v28, %v5265_v18 }
 0x174   : > { %v933_v14 = vpop.f32.mrf.mxu0 }
 0x175   : > { %v1081_v49 = vmax.f32 %v7487_v23, %v1056_v48  ;;  %v1054_v57 = vmax.f32 %v5238_v47, %v933_v14  ;;  %v1033_v47 = vmax.f32 %v6072_v2, %v6116_v24  ;;  %v7490_v48 = vmax.f32 %v6070_v1, %v6132_v32 }
 0x176   : > { %v5266_v45 = vpop.f32.mrf.mxu0  ;;  %v7491_v32 = vmax.f32 %v6076_v4, %v6140_v36 }
 0x177   : > { %v6247_v42 = vadd.f32 %v6233_v35, %v1081_v49  ;;  %v1079_v16 = vmax.f32 %v1029_v11, %v1054_v57  ;;  %v1057_v53 = vmax.f32 %v5241_v44, %v5266_v45 }
 0x178   : > { %v936_v17 = vpop.f32.mrf.mxu0 }
 0x179   : > { %v1138_v18 = vmax.f32 %v6247_v42, 0.0  ;;  %v6251_v28 = vadd.f32 %v6233_v35, %v1079_v16  ;;  %v1082_v19 = vmax.f32 %v7488_v62, %v1057_v53  ;;  %v1055_v60 = vmax.f32 %v837_v40, %v936_v17  ;;  %v5801_v42 = vld [vmem:[%s7443_s3 + $0x10] sm:$0xff]  }
 0x17a   : > { %v5269_v61 = vpop.f32.mrf.mxu0  ;;  %v7492_v62 = vmax.f32 %v6066_v63, %v6122_v27 }
 0x17b   : > { %1163 = vst [vmem:[#allocation2 + $0x18] sm:$0xff] %v1138_v18  ;;  %v1136_v14 = vmax.f32 %v6251_v28, 0.0  ;;  %v6260_v11 = vadd.f32 %v6233_v35, %v1082_v19  ;;  %v1080_v44 = vmax.f32 %v7489_v25, %v1055_v60  ;;  %v1060_v45 = vmax.f32 %v856_v22, %v5269_v61 }
 0x17c   : > { %v949_v0 = vpop.f32.mrf.mxu0  ;;  %v1037_v25 = vmax.f32 %v6080_v6, %v6130_v31 }
 0x17d   : > { %1161 = vst [vmem:[#allocation2 + $0x8] sm:$0xff] %v1136_v14  ;;  %v1139_v29 = vmax.f32 %v6260_v11, 0.0  ;;  %v6271_v40 = vadd.f32 %v6233_v35, %v1080_v44  ;;  %v1085_v23 = vmax.f32 %v7490_v48, %v1060_v45  ;;  %v1058_v49 = vmax.f32 %v5242_v56, %v949_v0  ;;  %v6647_v11 = vld [vmem:[%s7443_s3 + $0xb8] sm:$0xff]  }
 0x17e   : > { %v5270_v59 = vpop.f32.mrf.mxu0  ;;  %v7493_v44 = vmax.f32 %v6078_v5, %v6146_v39 }
 0x17f   : > { %1164 = vst [vmem:[#allocation2 + $0x20] sm:$0xff] %v1139_v29  ;;  %v1137_v2 = vmax.f32 %v6271_v40, 0.0  ;;  %v1117_v21 = vadd.f32 %v6233_v35, %v1085_v23  ;;  %v1083_v22 = vmax.f32 %v1033_v47, %v1058_v49  ;;  %v1061_v24 = vmax.f32 %v6194_v37, %v5270_v59 }
 0x180   : > { %v952_v60 = vpop.f32.mrf.mxu0 }
 0x181   : > { %1162 = vst [vmem:[#allocation2 + $0x10] sm:$0xff] %v1137_v2  ;;  %v6283_v57 = vmax.f32 %v1117_v21, 0.0  ;;  %v6286_v1 = vadd.f32 %v6233_v35, %v1083_v22  ;;  %v1086_v56 = vmax.f32 %v7491_v32, %v1061_v24  ;;  %v1059_v16 = vmax.f32 %v6196_v33, %v952_v60 }
 0x182   : > { %v5273_v53 = vpop.f32.mrf.mxu0  ;;  %v7495_v60 = vmax.f32 %v6074_v3, %v6136_v34  ;;  %v7496_v3 = vmax.f32 %v6086_v9, %v6160_v46 }
 0x183   : > { %1167 = vst [vmem:[#allocation2 + $0x38] sm:$0xff] %v6283_v57  ;;  %v1140_v37 = vmax.f32 %v6286_v1, 0.0  ;;  %v1118_v17 = vadd.f32 %v6233_v35, %v1086_v56  ;;  %v1084_v19 = vmax.f32 %v7492_v62, %v1059_v16  ;;  %v1064_v61 = vmax.f32 %v6206_v55, %v5273_v53 }
 0x184   : > { %v965_v4 = vpop.f32.mrf.mxu0 }
 0x185   : > { %1165 = vst [vmem:[#allocation2 + $0x28] sm:$0xff] %v1140_v37  ;;  %v6303_v33 = vmax.f32 %v1118_v17, 0.0  ;;  %v6306_v36 = vadd.f32 %v6233_v35, %v1084_v19  ;;  %v1089_v45 = vmax.f32 %v7493_v44, %v1064_v61  ;;  %v1062_v63 = vmax.f32 %v6198_v58, %v965_v4 }
 0x186   : > { %v5274_v27 = vpop.f32.mrf.mxu0  ;;  %v1205_v55 = vld [vmem:[#allocation2 + $0x1e] sm:$0xff]  ;;  %v7494_v58 = vmax.f32 %v6084_v8, %v6154_v43  ;;  %v1041_v8 = vmax.f32 %v6088_v10, %v6144_v38 }
 0x187   : > { %1168 = vst [vmem:[#allocation2 + $0x40] sm:$0xff] %v6303_v33  ;;  %v1141_v6 = vmax.f32 %v6306_v36, 0.0  ;;  %v1121_v31 = vadd.f32 %v6233_v35, %v1089_v45  ;;  %v1087_v47 = vmax.f32 %v1037_v25, %v1062_v63  ;;  %v1065_v0 = vmax.f32 %v6200_v30, %v5274_v27  ;;  %1297 = vrot.lane.b32.xlu1 %v1205_v55, %s5864_s15  ;;  %v1221_v21 = vld [vmem:[#allocation2 + $0x1c] sm:$0xff] }
 0x188   : > { %v968_v48 = vpop.f32.mrf.mxu0  ;;  %v1203_v23 = vld [vmem:[#allocation2 + $0xe] sm:$0xff]  ;;  %v7497_v25 = vmax.f32 %v6092_v12, %v6168_v50  ;;  %v7498_v55 = vmax.f32 %v6082_v7, %v6150_v41 }
 0x189   : > { %1166 = vst [vmem:[#allocation2 + $0x30] sm:$0xff] %v1141_v6  ;;  %v6319_v5 = vmax.f32 %v1121_v31, 0.0  ;;  %v1119_v39 = vadd.f32 %v6233_v35, %v1087_v47  ;;  %v1090_v49 = vmax.f32 %v7494_v58, %v1065_v0  ;;  %v1063_v59 = vmax.f32 %v6202_v51, %v968_v48  ;;  %1293 = vrot.lane.b32.xlu0 %v1203_v23, %s5864_s15  ;;  %v1204_v51 = vld [vmem:[#allocation2 + $0x16] sm:$0xff] }
 0x18a   : > { %v5277_v30 = vpop.f32.mrf.mxu0  ;;  %v7499_v12 = vld [vmem:[#allocation14_spill] sm:$0xff]  ;;  %v7501_v58 = vld [vmem:[#allocation7_spill] sm:$0xff] }
 0x18b   : > { %1171 = vst [vmem:[#allocation2 + $0x58] sm:$0xff] %v6319_v5  ;;  %v6328_v22 = vmax.f32 %v1119_v39, 0.0  ;;  %v1122_v24 = vadd.f32 %v6233_v35, %v1090_v49  ;;  %v1088_v32 = vmax.f32 %v7495_v60, %v1063_v59  ;;  %v1068_v56 = vmax.f32 %v6214_v20, %v5277_v30  ;;  %1365 = vrot.lane.b32.xlu1 %v1221_v21, %s5865_s16  ;;  %v7502_v49 = vld [vmem:[#allocation17_spill] sm:$0xff]  ;;  %v7504_v41 = vld [vmem:[#allocation22_spill] sm:$0xff]  ;;  %v5790_v21 = vld [vmem:[%s7443_s3 + $0x98] sm:$0xff]  }
 0x18c   : > { %v981_v43 = vpop.f32.mrf.mxu0  ;;  %v1222_v46 = vld [vmem:[#allocation2 + $0x24] sm:$0xff]  ;;  %v7503_v59 = vmax.f32 %v7501_v58, %v7502_v49 }
 0x18d   : > { %1169 = vst [vmem:[#allocation2 + $0x48] sm:$0xff] %v6328_v22  ;;  %v6339_v16 = vmax.f32 %v1122_v24, 0.0  ;;  %v1120_v53 = vadd.f32 %v6233_v35, %v1088_v32  ;;  %v1093_v34 = vmax.f32 %v7496_v3, %v1068_v56  ;;  %v1066_v20 = vmax.f32 %v6204_v26, %v981_v43  ;;  %1295 = vrot.lane.b32.xlu0 %v1204_v51, %s5864_s15  ;;  %v1206_v48 = vld [vmem:[#allocation2 + $0x26] sm:$0xff]  ;;  %v7505_v43 = vld [vmem:[#allocation23_spill] sm:$0xff] }
 0x18e   : > { %v5278_v17 = vpop.f32.mrf.mxu0  ;;  %v1225_v45 = vld [vmem:[#allocation2 + $0x3c] sm:$0xff] }
 0x18f   : > { %1172 = vst [vmem:[#allocation2 + $0x60] sm:$0xff] %v6339_v16  ;;  %v6348_v10 = vmax.f32 %v1120_v53, 0.0  ;;  %v1125_v38 = vadd.f32 %v6233_v35, %v1093_v34  ;;  %v1091_v62 = vmax.f32 %v1041_v8, %v1066_v20  ;;  %v1069_v19 = vmax.f32 %v6208_v54, %v5278_v17  ;;  %1509 = vrot.lane.b32.xlu1 %v6283_v57, %s5866_s18  ;;  %v1209_v60 = vld [vmem:[#allocation2 + $0x3e] sm:$0xff] }
 0x190   : > { %v984_v9 = vpop.f32.mrf.mxu0  ;;  %v5867_v53 = vmov 0.0   ;;  %v1241_v34 = vld [vmem:[#allocation2 + $0x3a] sm:$0xff] }
 0x191   : > { %1170 = vst [vmem:[#allocation2 + $0x50] sm:$0xff] %v6348_v10  ;;  %v6355_v26 = vmax.f32 %v1125_v38, 0.0  ;;  %v1123_v61 = vadd.f32 %v6233_v35, %v1091_v62  ;;  %v1094_v4 = vmax.f32 %v7497_v25, %v1069_v19  ;;  %v1067_v44 = vmax.f32 %v6210_v15, %v984_v9  ;;  %1367 = vrot.lane.b32.xlu0 %v1222_v46, %s5865_s16  ;;  %v7500_v15 = vld [vmem:[#allocation8_spill] sm:$0xff]  ;;  %v7506_v38 = vld [vmem:[#allocation10_spill] sm:$0xff]  ;;  %v7507_v62 = vld [vmem:[#allocation19_spill] sm:$0xff] }
 0x192   : > { %v5281_v54 = vpop.f32.mrf.mxu0  ;;  %v1045_v50 = vmax.f32 %v7500_v15, %v7499_v12  ;;  %5287 = vmatprep.subr.bf16.mxu1 %v5867_v53  ;;  %5425 = vmatprep.subr.bf16.mxu0 %v5867_v53  ;;  %v7508_v19 = vmax.f32 %v7506_v38, %v7507_v62  ;;  %v7509_v46 = vld [vmem:[#allocation24_spill] sm:$0xff]  ;;  %v7520_v38 = vld [vmem:[#allocation26_spill] sm:$0xff] }
 0x193   : > { %1175 = vst [vmem:[#allocation2 + $0x78] sm:$0xff] %v6355_v26  ;;  %v6364_v63 = vmax.f32 %v1123_v61, 0.0  ;;  %v1126_v27 = vadd.f32 %v6233_v35, %v1094_v4  ;;  %v1092_v31 = vmax.f32 %v7498_v55, %v1067_v44  ;;  %v1072_v47 = vmax.f32 %v6222_v52, %v5281_v54  ;;  %1373 = vrot.lane.b32.xlu1 %v1225_v45, %s5865_s16  ;;  %v5789_v52 = vld [vmem:[%s7443_s3 + $0x48] sm:$0xff]   ;;  %v5791_v44 = vld [vmem:[%s7443_s3 + $0x40] sm:$0xff]   ;;  %v5792_v54 = vld [vmem:[%s7443_s3 + $0x90] sm:$0xff]  }
 0x194   : > { %v997_v0 = vpop.f32.mrf.mxu0  ;;  %5288 = vmatpush3.bf16.msra.mxu1 %v5789_v52  ;;  %5426 = vmatpush3.bf16.msra.mxu0 %v5790_v21  ;;  %v1223_v4 = vld [vmem:[#allocation2 + $0x2c] sm:$0xff]  ;;  %v7513_v15 = vld [vmem:[#allocation28_spill] sm:$0xff] }
 0x195   : > { %1173 = vst [vmem:[#allocation2 + $0x68] sm:$0xff] %v6364_v63  ;;  %v6375_v23 = vmax.f32 %v1126_v27, 0.0  ;;  %v1124_v39 = vadd.f32 %v6233_v35, %v1092_v31  ;;  %v1097_v7 = vmax.f32 %v7503_v59, %v1072_v47  ;;  %v1070_v30 = vmax.f32 %v7504_v41, %v997_v0  ;;  %1299 = vrot.lane.b32.xlu0 %v1206_v48, %s5864_s15  ;;  %v7510_v55 = vld [vmem:[#allocation6_spill] sm:$0xff]  ;;  %v7511_v31 = vld [vmem:[#allocation15_spill] sm:$0xff]  ;;  %v7514_v0 = vld [vmem:[#allocation16_spill] sm:$0xff] }
 0x196   : > { %v5282_v24 = vpop.f32.mrf.mxu0  ;;  %5289 = vmatprep.subr.bf16.mxu1 %v5867_v53  ;;  %5427 = vmatprep.subr.bf16.mxu0 %v5867_v53  ;;  %v7512_v47 = vmax.f32 %v7510_v55, %v7511_v31  ;;  %v7515_v48 = vld [vmem:[#allocation12_spill] sm:$0xff]  ;;  %v7519_v21 = vld [vmem:[#allocation25_spill] sm:$0xff]  ;;  %v7524_v55 = vld [vmem:[#allocation27_spill] sm:$0xff] }
 0x197   : > { %1176 = vst [vmem:[#allocation2 + $0x80] sm:$0xff] %v6375_v23  ;;  %v6390_v32 = vmax.f32 %v1124_v39, 0.0  ;;  %v6393_v56 = vadd.f32 %v6233_v35, %v1097_v7  ;;  %v1095_v8 = vmax.f32 %v1045_v50, %v1070_v30  ;;  %v1073_v51 = vmax.f32 %v7505_v43, %v5282_v24  ;;  %1305 = vrot.lane.b32.xlu1 %v1209_v60, %s5864_s15  ;;  %v7516_v7 = vld [vmem:[#allocation11_spill] sm:$0xff]  ;;  %v7517_v41 = vld [vmem:[#allocation20_spill] sm:$0xff] }
 0x198   : > { %v1000_v3 = vpop.f32.mrf.mxu0  ;;  %v1049_v39 = vmax.f32 %v7515_v48, %v7514_v0  ;;  %5290 = vmatpush3.bf16.msra.mxu1 %v5791_v44  ;;  %v7518_v30 = vmax.f32 %v7516_v7, %v7517_v41  ;;  %5428 = vmatpush3.bf16.msra.mxu0 %v5792_v54  ;;  %v5793_v60 = vld [vmem:[%s7443_s3 + $0x38] sm:$0xff]   ;;  %v7525_v48 = vld [vmem:[#allocation9_spill] sm:$0xff] }
 0x199   : > { %1174 = vst [vmem:[#allocation2 + $0x70] sm:$0xff] %v6390_v32  ;;  %v1154_v20 = vmax.f32 %v6393_v56, 0.0  ;;  %v1127_v17 = vadd.f32 %v6233_v35, %v1095_v8  ;;  %v1098_v9 = vmax.f32 %v7508_v19, %v1073_v51  ;;  %v1071_v61 = vmax.f32 %v7509_v46, %v1000_v3  ;;  %1441 = vrot.lane.b32.xlu0 %v1241_v34, %s5868_s23  ;;  %v5794_v8 = vld [vmem:[%s7443_s3 + $0x88] sm:$0xff]   ;;  %v1240_v51 = vld [vmem:[#allocation2 + $0x32] sm:$0xff] }
 0x19a   : > { %v5285_v25 = vpop.f32.mrf.mxu0  ;;  %5291 = vmatprep.subr.bf16.mxu1 %v5867_v53  ;;  %5429 = vmatprep.subr.bf16.mxu0 %v5867_v53  ;;  %v1224_v41 = vld [vmem:[#allocation2 + $0x34] sm:$0xff] }
 0x19b   : > { %1179 = vst [vmem:[#allocation2 + $0x98] sm:$0xff] %v1154_v20  ;;  %v6417_v45 = vmax.f32 %v1127_v17, 0.0  ;;  %v6420_v27 = vadd.f32 %v6233_v35, %v1098_v9  ;;  %v1096_v12 = vmax.f32 %v7512_v47, %v1071_v61  ;;  %v1076_v50 = vmax.f32 %v7513_v15, %v5285_v25  ;;  %1369 = vrot.lane.b32.xlu1 %v1223_v4, %s5865_s16  ;;  %v1239_v9 = vld [vmem:[#allocation2 + $0x2a] sm:$0xff]  ;;  %v5796_v15 = vld [vmem:[%s7443_s3 + $0x80] sm:$0xff]  }
 0x19c   : > { %v1013_v58 = vpop.f32.mrf.mxu0  ;;  %5292 = vmatpush3.bf16.msra.mxu1 %v5793_v60  ;;  %v7521_v25 = vld [vmem:[#allocation13_spill] sm:$0xff]  ;;  %5430 = vmatpush3.bf16.msra.mxu0 %v5794_v8 }
 0x19d   : > { %1177 = vst [vmem:[#allocation2 + $0x88] sm:$0xff] %v6417_v45  ;;  %v1155_v49 = vmax.f32 %v6420_v27, 0.0  ;;  %v6432_v59 = vadd.f32 %v6233_v35, %v1096_v12  ;;  %v1101_v52 = vmax.f32 %v7518_v30, %v1076_v50  ;;  %v1074_v24 = vmax.f32 %v7519_v21, %v1013_v58  ;;  %1511 = vrot.lane.b32.xlu0 %v6303_v33, %s5866_s18  ;;  %v7522_v4 = vld [vmem:[#allocation21_spill] sm:$0xff]  ;;  %v5795_v12 = vld [vmem:[%s7443_s3 + $0x30] sm:$0xff]  }
 0x19e   : > { %v5286_v43 = vpop.f32.mrf.mxu0  ;;  %v7523_v44 = vmax.f32 %v7521_v25, %v7522_v4  ;;  %v1207_v47 = vld [vmem:[#allocation2 + $0x2e] sm:$0xff]  ;;  %5293 = vmatprep.subr.bf16.mxu1 %v5867_v53  ;;  %5431 = vmatprep.subr.bf16.mxu0 %v5867_v53  ;;  %v1242_v8 = vld [vmem:[#allocation2 + $0x42] sm:$0xff] }
 0x19f   : > { %1180 = vst [vmem:[#allocation2 + $0xa0] sm:$0xff] %v1155_v49  ;;  %v1153_v3 = vmax.f32 %v6432_v59, 0.0  ;;  %v6452_v34 = vadd.f32 %v6233_v35, %v1101_v52  ;;  %v1099_v17 = vmax.f32 %v1049_v39, %v1074_v24  ;;  %v1077_v62 = vmax.f32 %v7520_v38, %v5286_v43  ;;  %1439 = vrot.lane.b32.xlu1 %v1240_v51, %s5868_s23  ;;  %v7526_v39 = vld [vmem:[#allocation18_spill] sm:$0xff]  ;;  %v5797_v21 = vld [vmem:[%s7443_s3 + $0x28] sm:$0xff]   ;;  %v5798_v24 = vld [vmem:[%s7443_s3 + $0x78] sm:$0xff]  }
 0x1a0   : > { %v1016_v19 = vpop.f32.mrf.mxu0  ;;  %v7527_v58 = vmax.f32 %v7525_v48, %v7526_v39  ;;  %5294 = vmatpush3.bf16.msra.mxu1 %v5795_v12  ;;  %5432 = vmatpush3.bf16.msra.mxu0 %v5796_v15  ;;  %v1245_v43 = vld [vmem:[#allocation2 + $0x5a] sm:$0xff]  ;;  %v1226_v51 = vld [vmem:[#allocation2 + $0x44] sm:$0xff]  ;;  %v1244_v25 = vld [vmem:[#allocation2 + $0x52] sm:$0xff] }
 0x1a1   : > { %1178 = vst [vmem:[#allocation2 + $0x90] sm:$0xff] %v1153_v3  ;;  %v1158_v46 = vmax.f32 %v6452_v34, 0.0  ;;  %v6460_v61 = vadd.f32 %v6233_v35, %v1099_v17  ;;  %v1102_v54 = vmax.f32 %v7523_v44, %v1077_v62  ;;  %v1075_v31 = vmax.f32 %v7524_v55, %v1016_v19  ;;  %1437 = vrot.lane.b32.xlu0 %v1239_v9, %s5868_s23  ;;  %v1229_v17 = vld [vmem:[#allocation2 + $0x5c] sm:$0xff]  ;;  %v1210_v38 = vld [vmem:[#allocation2 + $0x46] sm:$0xff]  ;;  %v1211_v4 = vld [vmem:[#allocation2 + $0x4e] sm:$0xff] }
 0x1a2   : > { %5295 = vmatprep.subr.bf16.mxu1 %v5867_v53  ;;  %5433 = vmatprep.subr.bf16.mxu0 %v5867_v53  ;;  %v1213_v62 = vld [vmem:[#allocation2 + $0x5e] sm:$0xff]  ;;  %v1243_v19 = vld [vmem:[#allocation2 + $0x4a] sm:$0xff]  ;;  %v1228_v44 = vld [vmem:[#allocation2 + $0x54] sm:$0xff] }
 0x1a3   : > { %1183 = vst [vmem:[#allocation2 + $0xb8] sm:$0xff] %v1158_v46  ;;  %v1156_v50 = vmax.f32 %v6460_v61, 0.0  ;;  %v6479_v0 = vadd.f32 %v6233_v35, %v1102_v54  ;;  %v1100_v7 = vmax.f32 %v7527_v58, %v1075_v31  ;;  %1301 = vrot.lane.b32.xlu1 %v1207_v47, %s5864_s15  ;;  %5297 = vmatprep.mubr.msk.bf16.mxu1 %vm5869_vm3, %v5867_v53  ;;  %v1227_v9 = vld [vmem:[#allocation2 + $0x4c] sm:$0xff]  ;;  %v1212_v54 = vld [vmem:[#allocation2 + $0x56] sm:$0xff]  ;;  %v1246_v55 = vld [vmem:[#allocation2 + $0x62] sm:$0xff] }
 0x1a4   : > { %5296 = vmatpush3.bf16.msra.mxu1 %v5797_v21  ;;  %5434 = vmatpush3.bf16.msra.mxu0 %v5798_v24  ;;  %v1249_v31 = vld [vmem:[#allocation2 + $0x7a] sm:$0xff]  ;;  %v1230_v47 = vld [vmem:[#allocation2 + $0x64] sm:$0xff]  ;;  %v1231_v58 = vld [vmem:[#allocation2 + $0x6c] sm:$0xff] }
 0x1a5   : > { %1181 = vst [vmem:[#allocation2 + $0xa8] sm:$0xff] %v1156_v50  ;;  %v1159_v30 = vmax.f32 %v6479_v0, 0.0  ;;  %v6489_v52 = vadd.f32 %v6233_v35, %v1100_v7  ;;  %1371 = vrot.lane.b32.xlu0 %v1224_v41, %s5865_s16  ;;  %v1208_v35 = vld [vmem:[#allocation2 + $0x36] sm:$0xff]  ;;  %5435 = vmatprep.mubr.msk.bf16.mxu0 %vm5869_vm3, %v5867_v53  ;;  %v1214_v15 = vld [vmem:[#allocation2 + $0x66] sm:$0xff]  ;;  %v1217_v48 = vld [vmem:[#allocation2 + $0x7e] sm:$0xff] }
 0x1a6   : > { %5333 = vmatprep.subr.bf16.mxu1 %v5867_v53  ;;  %5471 = vmatprep.subr.bf16.mxu0 %v5867_v53  ;;  %v1233_v12 = vld [vmem:[#allocation2 + $0x7c] sm:$0xff]  ;;  %v1247_v39 = vld [vmem:[#allocation2 + $0x6a] sm:$0xff]  ;;  %v1248_v7 = vld [vmem:[#allocation2 + $0x72] sm:$0xff] }
 0x1a7   : > { %v1157_v60 = vmax.f32 %v6489_v52, 0.0  ;;  %1517 = vrot.lane.b32.xlu1 %v6319_v5, %s5866_s18  ;;  %v1215_v41 = vld [vmem:[#allocation2 + $0x6e] sm:$0xff]  ;;  %v1216_v24 = vld [vmem:[#allocation2 + $0x76] sm:$0xff]  ;;  %v1218_v56 = vld [vmem:[#allocation2 + $0x86] sm:$0xff] }
 0x1a8   : > { %v1232_v21 = vld [vmem:[#allocation2 + $0x74] sm:$0xff] }
 0x1a9   : > { %1182 = vst [vmem:[#allocation2 + $0xb0] sm:$0xff] %v1157_v60  ;;  %1303 = vrot.lane.b32.xlu0 %v1208_v35, %s5864_s15  ;;  %v1250_v35 = vld [vmem:[#allocation2 + $0x82] sm:$0xff]  ;;  %v1236_v27 = vld [vmem:[#allocation2 + $0x94] sm:$0xff] }
 0x1ab   : > { %1513 = vrot.lane.b32.xlu1 %v6328_v22, %s5866_s18 }
 0x1ad   : > { %1443 = vrot.lane.b32.xlu0 %v1242_v8, %s5868_s23  ;;  %v1253_v8 = vld [vmem:[#allocation2 + $0x9a] sm:$0xff] }
 0x1af   : > { %1449 = vrot.lane.b32.xlu1 %v1245_v43, %s5868_s23  ;;  %v1234_v43 = vld [vmem:[#allocation2 + $0x84] sm:$0xff] }
 0x1b0   : > { %v1255_v59 = vld [vmem:[#allocation2 + $0xaa] sm:$0xff] }
 0x1b1   : > { %1375 = vrot.lane.b32.xlu0 %v1226_v51, %s5865_s16  ;;  %v1237_v51 = vld [vmem:[#allocation2 + $0x9c] sm:$0xff] }
 0x1b3   : > { %1381 = vrot.lane.b32.xlu1 %v1229_v17, %s5865_s16 }
 0x1b5   : > { %1307 = vrot.lane.b32.xlu0 %v1210_v38, %s5864_s15  ;;  %v1235_v38 = vld [vmem:[#allocation2 + $0x8c] sm:$0xff] }
 0x1b7   : > { %1313 = vrot.lane.b32.xlu1 %v1213_v62, %s5864_s15 }
 0x1b9   : > { %1519 = vrot.lane.b32.xlu0 %v6339_v16, %s5866_s18 }
 0x1bb   : > { %1445 = vrot.lane.b32.xlu1 %v1243_v19, %s5868_s23 }
 0x1bd   : > { %1515 = vrot.lane.b32.xlu0 %v6348_v10, %s5866_s18 }
 0x1bf   : > { %1377 = vrot.lane.b32.xlu1 %v1227_v9, %s5865_s16  ;;  %v1219_v9 = vld [vmem:[#allocation2 + $0x8e] sm:$0xff] }
 0x1c1   : > { %1447 = vrot.lane.b32.xlu0 %v1244_v25, %s5868_s23 }
 0x1c3   : > { %1309 = vrot.lane.b32.xlu1 %v1211_v4, %s5864_s15  ;;  %v1252_v4 = vld [vmem:[#allocation2 + $0x92] sm:$0xff] }
 0x1c5   : > { %1379 = vrot.lane.b32.xlu0 %v1228_v44, %s5865_s16 }
 0x1c7   : > { %1525 = vrot.lane.b32.xlu1 %v6355_v26, %s5866_s18 }
 0x1c9   : > { %1311 = vrot.lane.b32.xlu0 %v1212_v54, %s5864_s15 }
 0x1cb   : > { %1521 = vrot.lane.b32.xlu1 %v6364_v63, %s5866_s18 }
 0x1cd   : > { %1451 = vrot.lane.b32.xlu0 %v1246_v55, %s5868_s23  ;;  %v1254_v55 = vld [vmem:[#allocation2 + $0xa2] sm:$0xff] }
 0x1cf   : > { %1457 = vrot.lane.b32.xlu1 %v1249_v31, %s5868_s23 }
 0x1d1   : > { %1383 = vrot.lane.b32.xlu0 %v1230_v47, %s5865_s16 }
 0x1d3   : > { %1389 = vrot.lane.b32.xlu1 %v1233_v12, %s5865_s16 }
 0x1d5   : > { %1315 = vrot.lane.b32.xlu0 %v1214_v15, %s5864_s15  ;;  %v7528_v15 = vmax.f32 %v6238_v13, 0.0 }
 0x1d7   : > { %1321 = vrot.lane.b32.xlu1 %v1217_v48, %s5864_s15 }
 0x1d9   : > { %1527 = vrot.lane.b32.xlu0 %v6375_v23, %s5866_s18 }
 0x1db   : > { %1453 = vrot.lane.b32.xlu1 %v1247_v39, %s5868_s23 }
 0x1dd   : > { %1523 = vrot.lane.b32.xlu0 %v6390_v32, %s5866_s18 }
 0x1df   : > { %1385 = vrot.lane.b32.xlu1 %v1231_v58, %s5865_s16 }
 0x1e1   : > { %1455 = vrot.lane.b32.xlu0 %v1248_v7, %s5868_s23 }
 0x1e3   : > { %1317 = vrot.lane.b32.xlu1 %v1215_v41, %s5864_s15 }
 0x1e5   : > { %1387 = vrot.lane.b32.xlu0 %v1232_v21, %s5865_s16 }
 0x1e7   : > { %1533 = vrot.lane.b32.xlu1 %v1154_v20, %s5866_s18  ;;  %v1251_v20 = vld [vmem:[#allocation2 + $0x8a] sm:$0xff] }
 0x1e9   : > { %1319 = vrot.lane.b32.xlu0 %v1216_v24, %s5864_s15 }
 0x1eb   : > { %1529 = vrot.lane.b32.xlu1 %v6417_v45, %s5866_s18 }
 0x1ed   : > { %1459 = vrot.lane.b32.xlu0 %v1250_v35, %s5868_s23 }
 0x1ef   : > { %1465 = vrot.lane.b32.xlu1 %v1253_v8, %s5868_s23 }
 0x1f1   : > { %1391 = vrot.lane.b32.xlu0 %v1234_v43, %s5865_s16 }
 0x1f3   : > { %1397 = vrot.lane.b32.xlu1 %v1237_v51, %s5865_s16 }
 0x1f5   : > { %1323 = vrot.lane.b32.xlu0 %v1218_v56, %s5864_s15 }
 0x1f7   : > { %1461 = vrot.lane.b32.xlu1 %v1251_v20, %s5868_s23 }
 0x1f9   : > { %v1298_v17 = vpop.permute.xlu1 %1297  ;;  %1535 = vrot.lane.b32.xlu0 %v1155_v49, %s5866_s18 }
 0x1fa   : > { %v1566_v35 = vsel %vm1563_vm4, %v1137_v2, %v1298_v17 }
 0x1fb   : > { %v1294_v62 = vpop.permute.xlu0 %1293  ;;  %1393 = vrot.lane.b32.xlu1 %v1235_v38, %s5865_s16 }
 0x1fc   : > { %v1564_v48 = vsel %vm1563_vm4, %v7528_v15, %v1294_v62 }
 0x1fd   : > { %v1366_v19 = vpop.permute.xlu1 %1365  ;;  %1531 = vrot.lane.b32.xlu0 %v1153_v3, %s5866_s18 }
 0x1fe   : > { %v1583_v13 = vsel %vm1582_vm5, %v1564_v48, %v1366_v19 }
 0x1ff   : > { %v1296_v25 = vpop.permute.xlu0 %1295  ;;  %1325 = vrot.lane.b32.xlu1 %v1219_v9, %s5864_s15 }
 0x200   : > { %v1565_v34 = vsel %vm1563_vm4, %v1136_v14, %v1296_v25  ;;  %v1256_v14 = vld [vmem:[#allocation2 + $0xb2] sm:$0xff] }
 0x201   : > { %v1510_v44 = vpop.permute.xlu1 %1509  ;;  %1463 = vrot.lane.b32.xlu0 %v1252_v4, %s5868_s23 }
 0x203   : > { %v1368_v54 = vpop.permute.xlu0 %1367  ;;  %1537 = vrot.lane.b32.xlu1 %v1156_v50, %s5866_s18  ;;  %v1238_v50 = vld [vmem:[#allocation2 + $0xa4] sm:$0xff] }
 0x204   : > { %v1584_v39 = vsel %vm1582_vm5, %v1565_v34, %v1368_v54  ;;  %v5799_v54 = vld [vmem:[%s7443_s3 + $0x20] sm:$0xff]  }
 0x205   : > { %v6573_v49 = vpop.permute.xlu1 %1373  ;;  %1395 = vrot.lane.b32.xlu0 %v1236_v27, %s5865_s16  ;;  %v6627_v27 = vld [vmem:[%s7443_s3 + $0xc0] sm:$0xff]  }
 0x207   : > { %v6576_v3 = vpop.permute.xlu0 %1299  ;;  %1469 = vrot.lane.b32.xlu1 %v1255_v59, %s5868_s23 }
 0x209   : > { %v6579_v31 = vpop.permute.xlu1 %1305  ;;  %1467 = vrot.lane.b32.xlu0 %v1254_v55, %s5868_s23 }
 0x20b   : > { %v1442_v47 = vpop.permute.xlu0 %1441  ;;  %1541 = vrot.lane.b32.xlu1 %v1158_v46, %s5866_s18  ;;  %v1220_v46 = vld [vmem:[#allocation2 + $0x96] sm:$0xff] }
 0x20d   : > { %v1370_v61 = vpop.permute.xlu1 %1369  ;;  %1539 = vrot.lane.b32.xlu0 %v1157_v60, %s5866_s18 }
 0x20e   : > { %v1585_v0 = vsel %vm1582_vm5, %v1566_v35, %v1370_v61  ;;  %v5800_v61 = vld [vmem:[%s7443_s3 + $0x18] sm:$0xff]  }
 0x20f   : > { %v1512_v12 = vpop.permute.xlu0 %1511  ;;  %1399 = vrot.lane.b32.xlu1 %v1238_v50, %s5865_s16  ;;  %v1604_v43 = vsel %vm1601_vm7, %v1585_v0, %v1442_v47 }
 0x211   : > { %v1440_v52 = vpop.permute.xlu1 %1439  ;;  %1327 = vrot.lane.b32.xlu0 %v1220_v46, %s5864_s15 }
 0x212   : > { %v1603_v60 = vsel %vm1601_vm7, %v1584_v39, %v1440_v52 }
 0x213   : > { %v1622_v58 = vsel %vm1620_vm6, %v1603_v60, %v1512_v12  ;;  %v1438_v7 = vpop.permute.xlu0 %1437  ;;  %1543 = vrot.lane.b32.xlu1 %v1159_v30, %s5866_s18 }
 0x214   : > { %1641 = vst.msk [vmem:[#allocation3 + $0x8] sm:$0xff] %vm1639_vm8, %v1622_v58  ;;  %v1602_v28 = vsel %vm1601_vm7, %v1583_v13, %v1438_v7  ;;  %v5802_v58 = vld [vmem:[%s7443_s3 + $0x8] sm:$0xff]  }
 0x215   : > { %v1621_v41 = vsel %vm1620_vm6, %v1602_v28, %v1510_v44  ;;  %v1302_v21 = vpop.permute.xlu1 %1301  ;;  %1471 = vrot.lane.b32.xlu0 %v1256_v14, %s5868_s23  ;;  %v6686_v7 = vld [vmem:[%s7443_s3 + $0xa8] sm:$0xff]  }
 0x216   : > { %1640 = vst.msk [vmem:[#allocation3] sm:$0xff] %vm1639_vm8, %v1621_v41  ;;  %v1568_v55 = vsel %vm1563_vm4, %v1139_v29, %v1302_v21  ;;  %v1567_v29 = vsel %vm1563_vm4, %v1138_v18, %v6576_v3  ;;  %v6668_v18 = vld [vmem:[%s7443_s3 + $0xb0] sm:$0xff]   ;;  %v6697_v41 = vld [vmem:[%s7443_s3 + $0xa0] sm:$0xff]  }
 0x217   : > { %v1372_v24 = vpop.permute.xlu0 %1371  ;;  %v1587_v50 = vsel %vm1582_vm5, %v1568_v55, %v6573_v49 }
 0x218   : > { %v1586_v15 = vsel %vm1582_vm5, %v1567_v29, %v1372_v24 }
 0x219   : > { %v1518_v8 = vpop.permute.xlu1 %1517 }
 0x21b   : > { %v1304_v30 = vpop.permute.xlu0 %1303 }
 0x21c   : > { %v1569_v52 = vsel %vm1563_vm4, %v1140_v37, %v1304_v30 }
 0x21d   : > { %v1514_v51 = vpop.permute.xlu1 %1513  ;;  %v1695_v40 = vld [vmem:[#allocation3 + $0x1] sm:$0xff] }
 0x21e   : > { %v1623_v56 = vsel %vm1620_vm6, %v1604_v43, %v1514_v51  ;;  %v2275_v2 = vld [vmem:[#allocation3 + $0x3] sm:$0xff]  ;;  %v5805_v51 = vld [vmem:[%s7443_s3] sm:$0xff]  }
 0x21f   : > { %1642 = vst.msk [vmem:[#allocation3 + $0x10] sm:$0xff] %vm1639_vm8, %v1623_v56  ;;  %v1444_v20 = vpop.permute.xlu0 %1443 }
 0x220   : > { %v1605_v34 = vsel %vm1601_vm7, %v1586_v15, %v1444_v20 }
 0x221   : > { %v6615_v38 = vpop.permute.xlu1 %1449 }
 0x223   : > { %v1376_v62 = vpop.permute.xlu0 %1375 }
 0x224   : > { %v1588_v60 = vsel %vm1582_vm5, %v1569_v52, %v1376_v62 }
 0x225   : > { %v6617_v19 = vpop.permute.xlu1 %1381 }
 0x226   : > { %v1696_v9 = vld [vmem:[#allocation3 + $0x9] sm:$0xff] }
 0x227   : > { %v2276_v17 = vld [vmem:[#allocation3 + $0xb] sm:$0xff]  ;;  %v6619_v25 = vpop.permute.xlu0 %1307  ;;  %v1713_v4 = vpack.c.bf16 %v1696_v9, %v1695_v40 }
 0x228   : > { %v2293_v44 = vpack.c.bf16 %v2276_v17, %v2275_v2  ;;  %v1571_v15 = vsel %vm1563_vm4, %v6283_v57, %v6619_v25 }
 0x229   : > { %5298 = vmatmul.mubr.msk.bf16.vlgmr.msra.gmra.mxu1 %vm1639_vm8, %v1713_v4  ;;  %v6631_v59 = vpop.permute.xlu1 %1313 }
 0x22a   : > { %5436 = vmatmul.mubr.msk.bf16.vlgmr.msra.gmra.mxu0 %vm1639_vm8, %v2293_v44  ;;  %5301 = vmatprep.mubr.msk.bf16.mxu1 %vm5869_vm3, %v5867_v53 }
 0x22b   : > { %5439 = vmatprep.mubr.msk.bf16.mxu0 %vm5869_vm3, %v5867_v53  ;;  %v1520_v47 = vpop.permute.xlu0 %1519  ;;  %5334 = vmatpush3.bf16.msra.mxu1 %v5799_v54 }
 0x22c   : > { %5472 = vmatpush3.bf16.msra.mxu0 %v6627_v27  ;;  %5335 = vmatprep.subr.bf16.mxu1 %v5867_v53 }
 0x22d   : > { %5473 = vmatprep.subr.bf16.mxu0 %v5867_v53  ;;  %v1446_v12 = vpop.permute.xlu1 %1445 }
 0x22e   : > { %v1606_v48 = vsel %vm1601_vm7, %v1587_v50, %v1446_v12 }
 0x22f   : > { %v1625_v46 = vsel %vm1620_vm6, %v1606_v48, %v1518_v8  ;;  %v1516_v39 = vpop.permute.xlu0 %1515  ;;  %5336 = vmatpush3.bf16.msra.mxu1 %v5800_v61  ;;  %v1570_v8 = vsel %vm1563_vm4, %v1141_v6, %v6579_v31 }
 0x230   : > { %5474 = vmatpush3.bf16.msra.mxu0 %v6647_v11  ;;  %1644 = vst.msk [vmem:[#allocation3 + $0x20] sm:$0xff] %vm1639_vm8, %v1625_v46  ;;  %v1624_v49 = vsel %vm1620_vm6, %v1605_v34, %v1516_v39  ;;  %5337 = vmatprep.subr.bf16.mxu1 %v5867_v53 }
 0x231   : > { %5475 = vmatprep.subr.bf16.mxu0 %v5867_v53  ;;  %1643 = vst.msk [vmem:[#allocation3 + $0x18] sm:$0xff] %vm1639_vm8, %v1624_v49  ;;  %v1378_v3 = vpop.permute.xlu1 %1377 }
 0x232   : > { %v1589_v56 = vsel %vm1582_vm5, %v1570_v8, %v1378_v3 }
 0x233   : > { %v1448_v13 = vpop.permute.xlu0 %1447  ;;  %5338 = vmatpush3.bf16.msra.mxu1 %v5801_v42  ;;  %v1608_v36 = vsel %vm1601_vm7, %v1589_v56, %v6615_v38 }
 0x234   : > { %5476 = vmatpush3.bf16.msra.mxu0 %v6668_v18  ;;  %v1607_v28 = vsel %vm1601_vm7, %v1588_v60, %v1448_v13  ;;  %5339 = vmatprep.subr.bf16.mxu1 %v5867_v53 }
 0x235   : > { %5477 = vmatprep.subr.bf16.mxu0 %v5867_v53  ;;  %v1626_v1 = vsel %vm1620_vm6, %v1607_v28, %v1520_v47  ;;  %v1310_v37 = vpop.permute.xlu1 %1309 }
 0x236   : > { %1645 = vst.msk [vmem:[#allocation3 + $0x28] sm:$0xff] %vm1639_vm8, %v1626_v1  ;;  %v1572_v50 = vsel %vm1563_vm4, %v6303_v33, %v1310_v37 }
 0x237   : > { %v1380_v14 = vpop.permute.xlu0 %1379  ;;  %5340 = vmatpush3.bf16.msra.mxu1 %v5802_v58  ;;  %v1591_v48 = vsel %vm1582_vm5, %v1572_v50, %v6617_v19 }
 0x238   : > { %5478 = vmatpush3.bf16.msra.mxu0 %v6686_v7  ;;  %v1697_v21 = vld [vmem:[#allocation3 + $0x11] sm:$0xff]  ;;  %v1698_v24 = vld [vmem:[#allocation3 + $0x19] sm:$0xff]  ;;  %5341 = vmatprep.subr.bf16.mxu1 %v5867_v53  ;;  %v1590_v46 = vsel %vm1582_vm5, %v1571_v15, %v1380_v14 }
 0x239   : > { %v2277_v35 = vld [vmem:[#allocation3 + $0x13] sm:$0xff]  ;;  %5479 = vmatprep.subr.bf16.mxu0 %v5867_v53  ;;  %v1526_v0 = vpop.permute.xlu1 %1525  ;;  %v1714_v30 = vpack.c.bf16 %v1698_v24, %v1697_v21  ;;  %v2278_v43 = vld [vmem:[#allocation3 + $0x1b] sm:$0xff]  ;;  %v1574_v21 = vsel %vm1563_vm4, %v6348_v10, %v6631_v59 }
 0x23a   : > { %v2294_v20 = vpack.c.bf16 %v2278_v43, %v2277_v35 }
 0x23b   : > { %5302 = vmatmul.mubr.msk.bf16.gmra.mxu1 %vm1639_vm8, %v1714_v30  ;;  %v1312_v62 = vpop.permute.xlu0 %1311 }
 0x23c   : > { %5480 = vmatpush3.bf16.msra.mxu0 %v6697_v41  ;;  %5305 = vmatprep.mubr.msk.bf16.mxu1 %vm5869_vm3, %v5867_v53  ;;  %v1573_v19 = vsel %vm1563_vm4, %v6328_v22, %v1312_v62 }
 0x23d   : > { %5440 = vmatmul.mubr.msk.bf16.gmra.mxu0 %vm1639_vm8, %v2294_v20  ;;  %v1522_v6 = vpop.permute.xlu1 %1521  ;;  %5342 = vmatpush3.bf16.msra.mxu1 %v5805_v51  ;;  %v1699_v4 = vld [vmem:[#allocation3 + $0x21] sm:$0xff] }
 0x23e   : > { %5443 = vmatprep.mubr.msk.bf16.mxu0 %vm5869_vm3, %v5867_v53  ;;  %v1627_v31 = vsel %vm1620_vm6, %v1608_v36, %v1522_v6  ;;  %5379 = vmatprep.subr.bf16.mxu1 %v5867_v53  ;;  %v2279_v54 = vld [vmem:[#allocation3 + $0x23] sm:$0xff] }
 0x23f   : > { %1646 = vst.msk [vmem:[#allocation3 + $0x30] sm:$0xff] %vm1639_vm8, %v1627_v31  ;;  %v1452_v40 = vpop.permute.xlu0 %1451 }
 0x240   : > { %v1609_v33 = vsel %vm1601_vm7, %v1590_v46, %v1452_v40 }
 0x241   : > { %v1458_v9 = vpop.permute.xlu1 %1457 }
 0x243   : > { %v1384_v2 = vpop.permute.xlu0 %1383 }
 0x244   : > { %v1592_v25 = vsel %vm1582_vm5, %v1573_v19, %v1384_v2 }
 0x245   : > { %v6721_v17 = vpop.permute.xlu1 %1389 }
 0x246   : > { %v1700_v44 = vld [vmem:[#allocation3 + $0x29] sm:$0xff] }
 0x247   : > { %v2280_v38 = vld [vmem:[#allocation3 + $0x2b] sm:$0xff]  ;;  %v6723_v55 = vpop.permute.xlu0 %1315  ;;  %v1715_v47 = vpack.c.bf16 %v1700_v44, %v1699_v4 }
 0x248   : > { %v2295_v61 = vpack.c.bf16 %v2280_v38, %v2279_v54  ;;  %v1575_v50 = vsel %vm1563_vm4, %v6319_v5, %v6723_v55 }
 0x249   : > { %5306 = vmatmul.mubr.msk.bf16.gmra.mxu1 %vm1639_vm8, %v1715_v47  ;;  %v6727_v29 = vpop.permute.xlu1 %1321 }
 0x24a   : > { %5444 = vmatmul.mubr.msk.bf16.gmra.mxu0 %vm1639_vm8, %v2295_v61  ;;  %5309 = vmatprep.mubr.msk.bf16.mxu1 %vm5869_vm3, %v5867_v53  ;;  %v1578_v46 = vsel %vm1563_vm4, %v6390_v32, %v6727_v29 }
 0x24b   : > { %5447 = vmatprep.mubr.msk.bf16.mxu0 %vm5869_vm3, %v5867_v53  ;;  %v1528_v12 = vpop.permute.xlu0 %1527 }
 0x24d   : > { %v1454_v34 = vpop.permute.xlu1 %1453 }
 0x24e   : > { %v1610_v39 = vsel %vm1601_vm7, %v1591_v48, %v1454_v34 }
 0x24f   : > { %v1629_v42 = vsel %vm1620_vm6, %v1610_v39, %v1526_v0  ;;  %v1524_v49 = vpop.permute.xlu0 %1523 }
 0x250   : > { %1648 = vst.msk [vmem:[#allocation3 + $0x40] sm:$0xff] %vm1639_vm8, %v1629_v42  ;;  %v1628_v3 = vsel %vm1620_vm6, %v1609_v33, %v1524_v49 }
 0x251   : > { %1647 = vst.msk [vmem:[#allocation3 + $0x38] sm:$0xff] %vm1639_vm8, %v1628_v3  ;;  %v1386_v57 = vpop.permute.xlu1 %1385 }
 0x252   : > { %v1593_v8 = vsel %vm1582_vm5, %v1574_v21, %v1386_v57 }
 0x253   : > { %v1456_v52 = vpop.permute.xlu0 %1455  ;;  %v1612_v43 = vsel %vm1601_vm7, %v1593_v8, %v1458_v9 }
 0x254   : > { %v1611_v60 = vsel %vm1601_vm7, %v1592_v25, %v1456_v52 }
 0x255   : > { %v1630_v13 = vsel %vm1620_vm6, %v1611_v60, %v1528_v12  ;;  %v1318_v58 = vpop.permute.xlu1 %1317 }
 0x256   : > { %1649 = vst.msk [vmem:[#allocation3 + $0x48] sm:$0xff] %vm1639_vm8, %v1630_v13  ;;  %v1576_v6 = vsel %vm1563_vm4, %v6339_v16, %v1318_v58 }
 0x257   : > { %v1388_v28 = vpop.permute.xlu0 %1387  ;;  %v1595_v54 = vsel %vm1582_vm5, %v1576_v6, %v6721_v17 }
 0x258   : > { %v1701_v1 = vld [vmem:[#allocation3 + $0x31] sm:$0xff]  ;;  %v1702_v37 = vld [vmem:[#allocation3 + $0x39] sm:$0xff]  ;;  %v1594_v17 = vsel %vm1582_vm5, %v1575_v50, %v1388_v28 }
 0x259   : > { %v2281_v14 = vld [vmem:[#allocation3 + $0x33] sm:$0xff]  ;;  %v1534_v24 = vpop.permute.xlu1 %1533  ;;  %v1716_v22 = vpack.c.bf16 %v1702_v37, %v1701_v1  ;;  %v2282_v35 = vld [vmem:[#allocation3 + $0x3b] sm:$0xff] }
 0x25a   : > { %v2296_v0 = vpack.c.bf16 %v2282_v35, %v2281_v14 }
 0x25b   : > { %5310 = vmatmul.mubr.msk.bf16.gmra.mxu1 %vm1639_vm8, %v1716_v22  ;;  %v1320_v30 = vpop.permute.xlu0 %1319 }
 0x25c   : > { %5448 = vmatmul.mubr.msk.bf16.gmra.mxu0 %vm1639_vm8, %v2296_v0  ;;  %5313 = vmatprep.mubr.msk.bf16.mxu1 %vm5869_vm3, %v5867_v53  ;;  %v1577_v33 = vsel %vm1563_vm4, %v6364_v63, %v1320_v30 }
 0x25d   : > { %v1530_v51 = vpop.permute.xlu1 %1529  ;;  %5451 = vmatprep.mubr.msk.bf16.mxu0 %vm5869_vm3, %v5867_v53  ;;  %v1703_v36 = vld [vmem:[#allocation3 + $0x41] sm:$0xff] }
 0x25e   : > { %v1631_v10 = vsel %vm1620_vm6, %v1612_v43, %v1530_v51  ;;  %v2283_v40 = vld [vmem:[#allocation3 + $0x43] sm:$0xff] }
 0x25f   : > { %1650 = vst.msk [vmem:[#allocation3 + $0x50] sm:$0xff] %vm1639_vm8, %v1631_v10  ;;  %v1460_v59 = vpop.permute.xlu0 %1459 }
 0x260   : > { %v1613_v15 = vsel %vm1601_vm7, %v1594_v17, %v1460_v59 }
 0x261   : > { %v1466_v56 = vpop.permute.xlu1 %1465 }
 0x263   : > { %v1392_v20 = vpop.permute.xlu0 %1391 }
 0x264   : > { %v1596_v55 = vsel %vm1582_vm5, %v1577_v33, %v1392_v20 }
 0x265   : > { %v1398_v62 = vpop.permute.xlu1 %1397 }
 0x266   : > { %v1704_v31 = vld [vmem:[#allocation3 + $0x49] sm:$0xff] }
 0x267   : > { %v2284_v2 = vld [vmem:[#allocation3 + $0x4b] sm:$0xff]  ;;  %v1324_v9 = vpop.permute.xlu0 %1323  ;;  %v1717_v4 = vpack.c.bf16 %v1704_v31, %v1703_v36 }
 0x268   : > { %v2297_v44 = vpack.c.bf16 %v2284_v2, %v2283_v40  ;;  %v1579_v21 = vsel %vm1563_vm4, %v6355_v26, %v1324_v9 }
 0x269   : > { %5314 = vmatmul.mubr.msk.bf16.gmra.mxu1 %vm1639_vm8, %v1717_v4  ;;  %v1462_v38 = vpop.permute.xlu1 %1461 }
 0x26a   : > { %5452 = vmatmul.mubr.msk.bf16.gmra.mxu0 %vm1639_vm8, %v2297_v44  ;;  %v1614_v47 = vsel %vm1601_vm7, %v1595_v54, %v1462_v38  ;;  %5317 = vmatprep.mubr.msk.bf16.mxu1 %vm5869_vm3, %v5867_v53 }
 0x26b   : > { %5455 = vmatprep.mubr.msk.bf16.mxu0 %vm5869_vm3, %v5867_v53  ;;  %v1633_v16 = vsel %vm1620_vm6, %v1614_v47, %v1534_v24  ;;  %v1536_v61 = vpop.permute.xlu0 %1535 }
 0x26c   : > { %1652 = vst.msk [vmem:[#allocation3 + $0x60] sm:$0xff] %vm1639_vm8, %v1633_v16 }
 0x26d   : > { %v1394_v12 = vpop.permute.xlu1 %1393 }
 0x26e   : > { %v1597_v5 = vsel %vm1582_vm5, %v1578_v46, %v1394_v12  ;;  %v1659_v46 = vld [vmem:[#allocation3 + $0x8] sm:$0xff] }
 0x26f   : > { %v1532_v48 = vpop.permute.xlu0 %1531  ;;  %v1616_v57 = vsel %vm1601_vm7, %v1597_v5, %v1466_v56  ;;  %v2493_v5 = vld [vmem:[#allocation3 + $0x4] sm:$0xff] }
 0x270   : > { %v1632_v34 = vsel %vm1620_vm6, %v1613_v15, %v1532_v48  ;;  %v1658_v48 = vld [vmem:[#allocation3] sm:$0xff] }
 0x271   : > { %1651 = vst.msk [vmem:[#allocation3 + $0x58] sm:$0xff] %vm1639_vm8, %v1632_v34  ;;  %v1326_v39 = vpop.permute.xlu1 %1325  ;;  %v2494_v34 = vld [vmem:[#allocation3 + $0xc] sm:$0xff]  ;;  %v1676_v33 = vpack.c.bf16 %v1659_v46, %v1658_v48  ;;  %v2065_v48 = vld [vmem:[#allocation3 + $0x42] sm:$0xff] }
 0x272   : > { %v1580_v60 = vsel %vm1563_vm4, %v6375_v23, %v1326_v39  ;;  %v5809_v39 = vld [vmem:[%s7443_s3 + $0x70] sm:$0xff]  }
 0x273   : > { %v1464_v42 = vpop.permute.xlu0 %1463  ;;  %v1599_v14 = vsel %vm1582_vm5, %v1580_v60, %v1398_v62  ;;  %v1665_v60 = vld [vmem:[#allocation3 + $0x38] sm:$0xff] }
 0x274   : > { %v1615_v49 = vsel %vm1601_vm7, %v1596_v55, %v1464_v42  ;;  %v2511_v55 = vpack.c.bf16 %v2494_v34, %v2493_v5  ;;  %v5810_v42 = vld [vmem:[%s7443_s3 + $0x68] sm:$0xff]  }
 0x275   : > { %v1634_v3 = vsel %vm1620_vm6, %v1615_v49, %v1536_v61  ;;  %v1538_v19 = vpop.permute.xlu1 %1537  ;;  %v1661_v49 = vld [vmem:[#allocation3 + $0x18] sm:$0xff] }
 0x276   : > { %1653 = vst.msk [vmem:[#allocation3 + $0x68] sm:$0xff] %vm1639_vm8, %v1634_v3  ;;  %v1635_v32 = vsel %vm1620_vm6, %v1616_v57, %v1538_v19  ;;  %v1660_v3 = vld [vmem:[#allocation3 + $0x10] sm:$0xff]  ;;  %v5811_v57 = vld [vmem:[%s7443_s3 + $0x60] sm:$0xff]  }
 0x277   : > { %1654 = vst.msk [vmem:[#allocation3 + $0x70] sm:$0xff] %vm1639_vm8, %v1635_v32  ;;  %v1396_v29 = vpop.permute.xlu0 %1395  ;;  %v1677_v19 = vpack.c.bf16 %v1661_v49, %v1660_v3  ;;  %v5812_v32 = vld [vmem:[%s7443_s3 + $0x58] sm:$0xff]  }
 0x278   : > { %v1705_v63 = vld [vmem:[#allocation3 + $0x51] sm:$0xff]  ;;  %v1706_v25 = vld [vmem:[#allocation3 + $0x59] sm:$0xff]  ;;  %v1598_v22 = vsel %vm1582_vm5, %v1579_v21, %v1396_v29  ;;  %v1663_v29 = vld [vmem:[#allocation3 + $0x28] sm:$0xff] }
 0x279   : > { %v2285_v52 = vld [vmem:[#allocation3 + $0x53] sm:$0xff]  ;;  %v1470_v13 = vpop.permute.xlu1 %1469  ;;  %v1718_v58 = vpack.c.bf16 %v1706_v25, %v1705_v63  ;;  %v2286_v28 = vld [vmem:[#allocation3 + $0x5b] sm:$0xff]  ;;  %v5813_v25 = vld [vmem:[%s7443_s3 + $0x50] sm:$0xff]  }
 0x27a   : > { %v2298_v1 = vpack.c.bf16 %v2286_v28, %v2285_v52  ;;  %v1618_v24 = vsel %vm1601_vm7, %v1599_v14, %v1470_v13  ;;  %v1662_v63 = vld [vmem:[#allocation3 + $0x20] sm:$0xff]  ;;  %v1664_v13 = vld [vmem:[#allocation3 + $0x30] sm:$0xff]  ;;  %v1667_v28 = vld [vmem:[#allocation3 + $0x48] sm:$0xff] }
 0x27b   : > { %5318 = vmatmul.mubr.msk.bf16.gmra.mxu1 %vm1639_vm8, %v1718_v58  ;;  %v1468_v37 = vpop.permute.xlu0 %1467  ;;  %v1678_v52 = vpack.c.bf16 %v1663_v29, %v1662_v63  ;;  %v1679_v58 = vpack.c.bf16 %v1665_v60, %v1664_v13  ;;  %v1669_v14 = vld [vmem:[#allocation3 + $0x58] sm:$0xff]  ;;  %v1668_v21 = vld [vmem:[#allocation3 + $0x50] sm:$0xff] }
 0x27c   : > { %5456 = vmatmul.mubr.msk.bf16.gmra.mxu0 %vm1639_vm8, %v2298_v1  ;;  %5321 = vmatprep.mubr.msk.bf16.mxu1 %vm5869_vm3, %v5867_v53  ;;  %v1617_v30 = vsel %vm1601_vm7, %v1598_v22, %v1468_v37  ;;  %v1666_v1 = vld [vmem:[#allocation3 + $0x40] sm:$0xff] }
 0x27d   : > { %v1542_v23 = vpop.permute.xlu1 %1541  ;;  %5459 = vmatprep.mubr.msk.bf16.mxu0 %vm5869_vm3, %v5867_v53  ;;  %v1707_v8 = vld [vmem:[#allocation3 + $0x61] sm:$0xff]  ;;  %v1680_v37 = vpack.c.bf16 %v1667_v28, %v1666_v1 }
 0x27e   : > { %v1637_v35 = vsel %vm1620_vm6, %v1618_v24, %v1542_v23  ;;  %v1708_v0 = vld [vmem:[#allocation3 + $0x69] sm:$0xff]  ;;  %v1681_v24 = vpack.c.bf16 %v1669_v14, %v1668_v21  ;;  %v1670_v22 = vld [vmem:[#allocation3 + $0x60] sm:$0xff] }
 0x27f   : > { %1656 = vst.msk [vmem:[#allocation3 + $0x80] sm:$0xff] %vm1639_vm8, %v1637_v35  ;;  %v1540_v43 = vpop.permute.xlu0 %1539  ;;  %v2287_v51 = vld [vmem:[#allocation3 + $0x63] sm:$0xff]  ;;  %v2288_v10 = vld [vmem:[#allocation3 + $0x6b] sm:$0xff]  ;;  %v1719_v59 = vpack.c.bf16 %v1708_v0, %v1707_v8 }
 0x280   : > { %v1636_v26 = vsel %vm1620_vm6, %v1617_v30, %v1540_v43  ;;  %v2299_v20 = vpack.c.bf16 %v2288_v10, %v2287_v51  ;;  %v1671_v23 = vld [vmem:[#allocation3 + $0x68] sm:$0xff]  ;;  %v1672_v0 = vld [vmem:[#allocation3 + $0x70] sm:$0xff] }
 0x281   : > { %1655 = vst.msk [vmem:[#allocation3 + $0x78] sm:$0xff] %vm1639_vm8, %v1636_v26  ;;  %v1400_v56 = vpop.permute.xlu1 %1399  ;;  %v1682_v35 = vpack.c.bf16 %v1671_v23, %v1670_v22  ;;  %v2058_v26 = vld [vmem:[#allocation3 + $0xa] sm:$0xff]  ;;  %v2069_v63 = vld [vmem:[#allocation3 + $0x62] sm:$0xff] }
 0x283   : > { %5322 = vmatmul.mubr.msk.bf16.gmra.mxu1 %vm1639_vm8, %v1719_v59  ;;  %v1328_v62 = vpop.permute.xlu0 %1327  ;;  %v2057_v59 = vld [vmem:[#allocation3 + $0x2] sm:$0xff] }
 0x284   : > { %5460 = vmatmul.mubr.msk.bf16.gmra.mxu0 %vm1639_vm8, %v2299_v20  ;;  %v1581_v36 = vsel %vm1563_vm4, %v6417_v45, %v1328_v62  ;;  %5325 = vmatprep.mubr.msk.bf16.mxu1 %vm5869_vm3, %v5867_v53  ;;  %v2059_v20 = vld [vmem:[#allocation3 + $0x12] sm:$0xff]  ;;  %v2060_v62 = vld [vmem:[#allocation3 + $0x1a] sm:$0xff] }
 0x285   : > { %5463 = vmatprep.mubr.msk.bf16.mxu0 %vm5869_vm3, %v5867_v53  ;;  %v1600_v31 = vsel %vm1582_vm5, %v1581_v36, %v1400_v56  ;;  %v1544_v40 = vpop.permute.xlu1 %1543  ;;  %v2075_v56 = vpack.c.bf16 %v2058_v26, %v2057_v59 }
 0x286   : > { %v1674_v51 = vld [vmem:[#allocation3 + $0x80] sm:$0xff] }
 0x287   : > { %v1472_v6 = vpop.permute.xlu0 %1471 }
 0x288   : > { %v1619_v2 = vsel %vm1601_vm7, %v1600_v31, %v1472_v6  ;;  %v1709_v9 = vld [vmem:[#allocation3 + $0x71] sm:$0xff]  ;;  %v1710_v4 = vld [vmem:[#allocation3 + $0x79] sm:$0xff]  ;;  %v2076_v31 = vpack.c.bf16 %v2060_v62, %v2059_v20 }
 0x289   : > { %v2289_v44 = vld [vmem:[#allocation3 + $0x73] sm:$0xff]  ;;  %v1638_v54 = vsel %vm1620_vm6, %v1619_v2, %v1544_v40  ;;  %v1720_v38 = vpack.c.bf16 %v1710_v4, %v1709_v9  ;;  %v2290_v47 = vld [vmem:[#allocation3 + $0x7b] sm:$0xff] }
 0x28a   : > { %1657 = vst.msk [vmem:[#allocation3 + $0x88] sm:$0xff] %vm1639_vm8, %v1638_v54  ;;  %v2300_v45 = vpack.c.bf16 %v2290_v47, %v2289_v44  ;;  %v1673_v8 = vld [vmem:[#allocation3 + $0x78] sm:$0xff]  ;;  %v2062_v44 = vld [vmem:[#allocation3 + $0x2a] sm:$0xff]  ;;  %v2061_v54 = vld [vmem:[#allocation3 + $0x22] sm:$0xff] }
 0x28b   : > { %5326 = vmatmul.mubr.msk.bf16.gmra.mxu1 %vm1639_vm8, %v1720_v38  ;;  %v1683_v30 = vpack.c.bf16 %v1673_v8, %v1672_v0  ;;  %v2077_v38 = vpack.c.bf16 %v2062_v44, %v2061_v54  ;;  %v2063_v47 = vld [vmem:[#allocation3 + $0x32] sm:$0xff]  ;;  %v2072_v13 = vld [vmem:[#allocation3 + $0x7a] sm:$0xff] }
 0x28c   : > { %5464 = vmatmul.mubr.msk.bf16.gmra.mxu0 %vm1639_vm8, %v2300_v45  ;;  %5329 = vmatprep.mubr.msk.bf16.mxu1 %vm5869_vm3, %v5867_v53  ;;  %v2071_v60 = vld [vmem:[#allocation3 + $0x72] sm:$0xff]  ;;  %v2500_v54 = vld [vmem:[#allocation3 + $0x3c] sm:$0xff] }
 0x28d   : > { %5467 = vmatprep.mubr.msk.bf16.mxu0 %vm5869_vm3, %v5867_v53  ;;  %v2499_v44 = vld [vmem:[#allocation3 + $0x34] sm:$0xff] }
 0x291   : > { %v1711_v16 = vld [vmem:[#allocation3 + $0x81] sm:$0xff]  ;;  %v1712_v61 = vld [vmem:[#allocation3 + $0x89] sm:$0xf] }
 0x292   : > { %v2291_v50 = vld [vmem:[#allocation3 + $0x83] sm:$0xff]  ;;  %v1721_v12 = vpack.c.bf16 %v1712_v61, %v1711_v16  ;;  %v2292_v17 = vld [vmem:[#allocation3 + $0x8b] sm:$0xf] }
 0x293   : > { %v2301_v15 = vpack.c.bf16 %v2292_v17, %v2291_v50  ;;  %v1675_v43 = vld [vmem:[#allocation3 + $0x88] sm:$0xf] }
 0x294   : > { %5330 = vmatmul.mubr.msk.bf16.gmra.mxu1 %vm1639_vm8, %v1721_v12  ;;  %v1684_v10 = vpack.c.bf16 %v1675_v43, %v1674_v51  ;;  %v2066_v17 = vld [vmem:[#allocation3 + $0x4a] sm:$0xff]  ;;  %v2496_v43 = vld [vmem:[#allocation3 + $0x1c] sm:$0xff] }
 0x295   : > { %5468 = vmatmul.mubr.msk.bf16.gmra.mxu0 %vm1639_vm8, %v2301_v15  ;;  %5343 = vmatprep.mubr.msk.bf16.mxu1 %vm5869_vm3, %v5867_v53  ;;  %v2079_v46 = vpack.c.bf16 %v2066_v17, %v2065_v48  ;;  %v2074_v23 = vld [vmem:[#allocation3 + $0x8a] sm:$0xf] }
 0x296   : > { %5481 = vmatprep.mubr.msk.bf16.mxu0 %vm5869_vm3, %v5867_v53  ;;  %v2502_v17 = vld [vmem:[#allocation3 + $0x4c] sm:$0xff] }
 0x29c   : > { %5344 = vmatmul.mubr.msk.bf16.vlgmr.msra.gmra.mxu1 %vm1639_vm8, %v1676_v33  ;;  %v2068_v33 = vld [vmem:[#allocation3 + $0x5a] sm:$0xff] }
 0x29d   : > { %5380 = vmatpush3.bf16.msra.mxu1 %v5809_v39  ;;  %5482 = vmatmul.mubr.msk.bf16.vlgmr.msra.gmra.mxu0 %vm1639_vm8, %v2511_v55  ;;  %v2067_v39 = vld [vmem:[#allocation3 + $0x52] sm:$0xff] }
 0x29e   : > { %5347 = vmatprep.mubr.msk.bf16.mxu1 %vm5869_vm3, %v5867_v53  ;;  %5381 = vmatprep.subr.bf16.mxu1 %v5867_v53 }
 0x2a1   : > { %5382 = vmatpush3.bf16.msra.mxu1 %v5810_v42  ;;  %v2080_v42 = vpack.c.bf16 %v2068_v33, %v2067_v39 }
 0x2a2   : > { %5383 = vmatprep.subr.bf16.mxu1 %v5867_v53 }
 0x2a4   : > { %5348 = vmatmul.mubr.msk.bf16.gmra.mxu1 %vm1639_vm8, %v1677_v19 }
 0x2a5   : > { %5351 = vmatprep.mubr.msk.bf16.mxu1 %vm5869_vm3, %v5867_v53  ;;  %5384 = vmatpush3.bf16.msra.mxu1 %v5811_v57 }
 0x2a6   : > { %5385 = vmatprep.subr.bf16.mxu1 %v5867_v53 }
 0x2a9   : > { %5386 = vmatpush3.bf16.msra.mxu1 %v5812_v32 }
 0x2aa   : > { %5387 = vmatprep.subr.bf16.mxu1 %v5867_v53 }
 0x2ac   : > { %5352 = vmatmul.mubr.msk.bf16.gmra.mxu1 %vm1639_vm8, %v1678_v52 }
 0x2ad   : > { %5355 = vmatprep.mubr.msk.bf16.mxu1 %vm5869_vm3, %v5867_v53  ;;  %5388 = vmatpush3.bf16.msra.mxu1 %v5813_v25  ;;  %v2070_v25 = vld [vmem:[#allocation3 + $0x6a] sm:$0xff] }
 0x2ae   : > { %5707 = vmatprep.subr.bf16.mxu1 %v5867_v53  ;;  %v2081_v52 = vpack.c.bf16 %v2070_v25, %v2069_v63  ;;  %v2504_v63 = vld [vmem:[#allocation3 + $0x5c] sm:$0xff] }
 0x2b4   : > { %5356 = vmatmul.mubr.msk.bf16.gmra.mxu1 %vm1639_vm8, %v1679_v58  ;;  %v2082_v58 = vpack.c.bf16 %v2072_v13, %v2071_v60 }
 0x2b5   : > { %5359 = vmatprep.mubr.msk.bf16.mxu1 %vm5869_vm3, %v5867_v53 }
 0x2bc   : > { %5360 = vmatmul.mubr.msk.bf16.gmra.mxu1 %vm1639_vm8, %v1680_v37 }
 0x2bd   : > { %5363 = vmatprep.mubr.msk.bf16.mxu1 %vm5869_vm3, %v5867_v53 }
 0x2c4   : > { %5364 = vmatmul.mubr.msk.bf16.gmra.mxu1 %vm1639_vm8, %v1681_v24  ;;  %v2073_v24 = vld [vmem:[#allocation3 + $0x82] sm:$0xff] }
 0x2c5   : > { %5367 = vmatprep.mubr.msk.bf16.mxu1 %vm5869_vm3, %v5867_v53  ;;  %v2083_v0 = vpack.c.bf16 %v2074_v23, %v2073_v24 }
 0x2cc   : > { %5368 = vmatmul.mubr.msk.bf16.gmra.mxu1 %vm1639_vm8, %v1682_v35 }
 0x2cd   : > { %5371 = vmatprep.mubr.msk.bf16.mxu1 %vm5869_vm3, %v5867_v53 }
 0x2d4   : > { %5372 = vmatmul.mubr.msk.bf16.gmra.mxu1 %vm1639_vm8, %v1683_v30  ;;  %v2495_v30 = vld [vmem:[#allocation3 + $0x14] sm:$0xff] }
 0x2d5   : > { %5375 = vmatprep.mubr.msk.bf16.mxu1 %vm5869_vm3, %v5867_v53  ;;  %v2512_v26 = vpack.c.bf16 %v2496_v43, %v2495_v30 }
 0x2dc   : > { %5376 = vmatmul.mubr.msk.bf16.gmra.mxu1 %vm1639_vm8, %v1684_v10 }
 0x2dd   : > { %5389 = vmatprep.mubr.msk.bf16.mxu1 %vm5869_vm3, %v5867_v53 }
 0x2e4   : > { %5390 = vmatmul.mubr.msk.bf16.vlgmr.msra.gmra.mxu1 %vm1639_vm8, %v2075_v56 }
 0x2e5   : > { %5712 = vmatpush3.bf16.msra.mxu1 %v6627_v27  ;;  %5393 = vmatprep.mubr.msk.bf16.mxu1 %vm5869_vm3, %v5867_v53 }
 0x2e6   : > { %5708 = vmatprep.subr.bf16.mxu1 %v5867_v53 }
 0x2e9   : > { %v6894_v36 = vpop.f32.mrf.mxu1  ;;  %5713 = vmatpush3.bf16.msra.mxu1 %v6647_v11 }
 0x2ea   : > { %v6896_v6 = vpop.f32.mrf.mxu0  ;;  %5709 = vmatprep.subr.bf16.mxu1 %v5867_v53 }
 0x2eb   : > { %v5299_v40 = vpop.f32.mrf.mxu1 }
 0x2ec   : > { %v5437_v2 = vpop.f32.mrf.mxu0  ;;  %5394 = vmatmul.mubr.msk.bf16.gmra.mxu1 %vm1639_vm8, %v2076_v31 }
 0x2ed   : > { %v6901_v27 = vpop.f32.mrf.mxu1  ;;  %5397 = vmatprep.mubr.msk.bf16.mxu1 %vm5869_vm3, %v5867_v53  ;;  %5714 = vmatpush3.bf16.msra.mxu1 %v6668_v18  ;;  %v2064_v18 = vld [vmem:[#allocation3 + $0x3a] sm:$0xff]  ;;  %v2498_v2 = vld [vmem:[#allocation3 + $0x2c] sm:$0xff] }
 0x2ee   : > { %v6903_v9 = vpop.f32.mrf.mxu0  ;;  %5710 = vmatprep.subr.bf16.mxu1 %v5867_v53  ;;  %v2078_v45 = vpack.c.bf16 %v2064_v18, %v2063_v47 }
 0x2ef   : > { %v5300_v4 = vpop.f32.mrf.mxu1 }
 0x2f0   : > { %v5438_v11 = vpop.f32.mrf.mxu0  ;;  %v2497_v4 = vld [vmem:[#allocation3 + $0x24] sm:$0xff] }
 0x2f1   : > { %5715 = vmatpush3.bf16.msra.mxu1 %v6686_v7  ;;  %v2513_v11 = vpack.c.bf16 %v2498_v2, %v2497_v4  ;;  %v2507_v2 = vld [vmem:[#allocation3 + $0x74] sm:$0xff]  ;;  %v2508_v4 = vld [vmem:[#allocation3 + $0x7c] sm:$0xff] }
 0x2f2   : > { %5711 = vmatprep.subr.bf16.mxu1 %v5867_v53 }
 0x2f4   : > { %5398 = vmatmul.mubr.msk.bf16.gmra.mxu1 %vm1639_vm8, %v2077_v38  ;;  %v2514_v38 = vpack.c.bf16 %v2500_v54, %v2499_v44 }
 0x2f5   : > { %5401 = vmatprep.mubr.msk.bf16.mxu1 %vm5869_vm3, %v5867_v53  ;;  %5716 = vmatpush3.bf16.msra.mxu1 %v6697_v41 }
 0x2fb   : > { %v6915_v16 = vpop.f32.mrf.mxu1 }
 0x2fc   : > { %5402 = vmatmul.mubr.msk.bf16.gmra.mxu1 %vm1639_vm8, %v2078_v45 }
 0x2fd   : > { %v6917_v61 = vpop.f32.mrf.mxu0  ;;  %v5303_v7 = vpop.f32.mrf.mxu1  ;;  %5405 = vmatprep.mubr.msk.bf16.mxu1 %vm5869_vm3, %v5867_v53 }
 0x2ff   : > { %v5441_v50 = vpop.f32.mrf.mxu0  ;;  %v6922_v12 = vpop.f32.mrf.mxu1 }
 0x301   : > { %v6924_v15 = vpop.f32.mrf.mxu0  ;;  %v5304_v41 = vpop.f32.mrf.mxu1 }
 0x303   : > { %v5442_v34 = vpop.f32.mrf.mxu0 }
 0x304   : > { %5406 = vmatmul.mubr.msk.bf16.gmra.mxu1 %vm1639_vm8, %v2079_v46  ;;  %v2501_v34 = vld [vmem:[#allocation3 + $0x44] sm:$0xff] }
 0x305   : > { %5409 = vmatprep.mubr.msk.bf16.mxu1 %vm5869_vm3, %v5867_v53  ;;  %v2515_v39 = vpack.c.bf16 %v2502_v17, %v2501_v34 }
 0x309   : > { %v6929_v5 = vpop.f32.mrf.mxu1 }
 0x30a   : > { %v6931_v55 = vpop.f32.mrf.mxu0 }
 0x30b   : > { %v5307_v49 = vpop.f32.mrf.mxu1 }
 0x30c   : > { %v5445_v3 = vpop.f32.mrf.mxu0  ;;  %5410 = vmatmul.mubr.msk.bf16.gmra.mxu1 %vm1639_vm8, %v2080_v42 }
 0x30d   : > { %v6934_v57 = vpop.f32.mrf.mxu1  ;;  %5413 = vmatprep.mubr.msk.bf16.mxu1 %vm5869_vm3, %v5867_v53 }
 0x30e   : > { %v6936_v19 = vpop.f32.mrf.mxu0 }
 0x30f   : > { %v5308_v32 = vpop.f32.mrf.mxu1 }
 0x310   : > { %v5446_v29 = vpop.f32.mrf.mxu0 }
 0x311   : > { %v2503_v29 = vld [vmem:[#allocation3 + $0x54] sm:$0xff] }
 0x312   : > { %v2516_v13 = vpack.c.bf16 %v2504_v63, %v2503_v29 }
 0x314   : > { %5414 = vmatmul.mubr.msk.bf16.gmra.mxu1 %vm1639_vm8, %v2081_v52 }
 0x315   : > { %5417 = vmatprep.mubr.msk.bf16.mxu1 %vm5869_vm3, %v5867_v53 }
 0x31b   : > { %v6943_v28 = vpop.f32.mrf.mxu1 }
 0x31c   : > { %v6945_v1 = vpop.f32.mrf.mxu0  ;;  %5418 = vmatmul.mubr.msk.bf16.gmra.mxu1 %vm1639_vm8, %v2082_v58 }
 0x31d   : > { %v5311_v37 = vpop.f32.mrf.mxu1  ;;  %5421 = vmatprep.mubr.msk.bf16.mxu1 %vm5869_vm3, %v5867_v53 }
 0x31e   : > { %v5449_v14 = vpop.f32.mrf.mxu0 }
 0x31f   : > { %v6950_v21 = vpop.f32.mrf.mxu1 }
 0x320   : > { %v6952_v22 = vpop.f32.mrf.mxu0 }
 0x321   : > { %v5312_v35 = vpop.f32.mrf.mxu1 }
 0x322   : > { %v5450_v8 = vpop.f32.mrf.mxu0  ;;  %v2505_v35 = vld [vmem:[#allocation3 + $0x64] sm:$0xff] }
 0x323   : > { %v2506_v8 = vld [vmem:[#allocation3 + $0x6c] sm:$0xff] }
 0x324   : > { %5422 = vmatmul.mubr.msk.bf16.gmra.mxu1 %vm1639_vm8, %v2083_v0 }
 0x325   : > { %5485 = vmatprep.mubr.msk.bf16.mxu1 %vm5869_vm3, %v5867_v53 }
 0x329   : > { %v6957_v51 = vpop.f32.mrf.mxu1 }
 0x32a   : > { %v6959_v10 = vpop.f32.mrf.mxu0 }
 0x32b   : > { %v5315_v59 = vpop.f32.mrf.mxu1 }
 0x32c   : > { %v5453_v56 = vpop.f32.mrf.mxu0  ;;  %5486 = vmatmul.mubr.msk.bf16.vlgmr.msra.gmra.mxu1 %vm1639_vm8, %v2512_v26  ;;  %v2517_v26 = vpack.c.bf16 %v2506_v8, %v2505_v35 }
 0x32d   : > { %v6962_v20 = vpop.f32.mrf.mxu1  ;;  %5489 = vmatprep.mubr.msk.bf16.mxu1 %vm5869_vm3, %v5867_v53 }
 0x32e   : > { %v6964_v62 = vpop.f32.mrf.mxu0 }
 0x32f   : > { %v5316_v31 = vpop.f32.mrf.mxu1 }
 0x330   : > { %v5454_v40 = vpop.f32.mrf.mxu0 }
 0x334   : > { %5490 = vmatmul.mubr.msk.bf16.gmra.mxu1 %vm1639_vm8, %v2513_v11 }
 0x335   : > { %5493 = vmatprep.mubr.msk.bf16.mxu1 %vm5869_vm3, %v5867_v53 }
 0x33b   : > { %v6971_v47 = vpop.f32.mrf.mxu1 }
 0x33c   : > { %v6973_v18 = vpop.f32.mrf.mxu0  ;;  %5494 = vmatmul.mubr.msk.bf16.gmra.mxu1 %vm1639_vm8, %v2514_v38  ;;  %v2518_v38 = vpack.c.bf16 %v2508_v4, %v2507_v2 }
 0x33d   : > { %v5319_v45 = vpop.f32.mrf.mxu1  ;;  %5497 = vmatprep.mubr.msk.bf16.mxu1 %vm5869_vm3, %v5867_v53 }
 0x33e   : > { %v5457_v7 = vpop.f32.mrf.mxu0 }
 0x33f   : > { %v6978_v50 = vpop.f32.mrf.mxu1 }
 0x340   : > { %v6980_v41 = vpop.f32.mrf.mxu0 }
 0x341   : > { %v5320_v48 = vpop.f32.mrf.mxu1 }
 0x342   : > { %v5458_v46 = vpop.f32.mrf.mxu0 }
 0x343   : > { %v6982_v33 = vpop.f32.mrf.mxu1  ;;  %v2509_v46 = vld [vmem:[#allocation3 + $0x84] sm:$0xff] }
 0x344   : > { %v6984_v42 = vpop.f32.mrf.mxu0  ;;  %5498 = vmatmul.mubr.msk.bf16.gmra.mxu1 %vm1639_vm8, %v2515_v39  ;;  %v2510_v39 = vld [vmem:[#allocation3 + $0x8c] sm:$0xf] }
 0x345   : > { %v5323_v49 = vpop.f32.mrf.mxu1  ;;  %5501 = vmatprep.mubr.msk.bf16.mxu1 %vm5869_vm3, %v5867_v53  ;;  %v2519_v63 = vpack.c.bf16 %v2510_v39, %v2509_v46 }
 0x346   : > { %v5461_v3 = vpop.f32.mrf.mxu0 }
 0x347   : > { %v6989_v32 = vpop.f32.mrf.mxu1 }
 0x348   : > { %v6991_v25 = vpop.f32.mrf.mxu0 }
 0x349   : > { %7529 = vst [vmem:[#allocation14_spill] sm:$0xff] %v6991_v25  ;;  %v5324_v52 = vpop.f32.mrf.mxu1 }
 0x34a   : > { %v5462_v60 = vpop.f32.mrf.mxu0 }
 0x34b   : > { %v6993_v58 = vpop.f32.mrf.mxu1 }
 0x34c   : > { %v6995_v37 = vpop.f32.mrf.mxu0  ;;  %5502 = vmatmul.mubr.msk.bf16.gmra.mxu1 %vm1639_vm8, %v2516_v13 }
 0x34d   : > { %7530 = vst [vmem:[#allocation8_spill] sm:$0xff] %v6995_v37  ;;  %v5327_v14 = vpop.f32.mrf.mxu1  ;;  %5505 = vmatprep.mubr.msk.bf16.mxu1 %vm5869_vm3, %v5867_v53 }
 0x34e   : > { %v5465_v24 = vpop.f32.mrf.mxu0 }
 0x34f   : > { %v7000_v23 = vpop.f32.mrf.mxu1 }
 0x350   : > { %7531 = vst [vmem:[#allocation7_spill] sm:$0xff] %v7000_v23  ;;  %v7002_v0 = vpop.f32.mrf.mxu0 }
 0x351   : > { %7532 = vst [vmem:[#allocation17_spill] sm:$0xff] %v7002_v0  ;;  %v5328_v30 = vpop.f32.mrf.mxu1 }
 0x352   : > { %v5466_v43 = vpop.f32.mrf.mxu0 }
 0x354   : > { %v7004_v59 = vpop.f32.mrf.mxu1  ;;  %5506 = vmatmul.mubr.msk.bf16.gmra.mxu1 %vm1639_vm8, %v2517_v26 }
 0x355   : > { %7533 = vst [vmem:[#allocation22_spill] sm:$0xff] %v7004_v59  ;;  %v7007_v56 = vpop.f32.mrf.mxu0  ;;  %5509 = vmatprep.mubr.msk.bf16.mxu1 %vm5869_vm3, %v5867_v53 }
 0x356   : > { %7534 = vst [vmem:[#allocation23_spill] sm:$0xff] %v7007_v56  ;;  %v5331_v31 = vpop.f32.mrf.mxu1 }
 0x357   : > { %v5469_v40 = vpop.f32.mrf.mxu0 }
 0x358   : > { %v1891_v11 = vpop.f32.mrf.mxu1 }
 0x359   : > { %v2471_v44 = vpop.f32.mrf.mxu0 }
 0x35a   : > { %v5332_v54 = vpop.f32.mrf.mxu1 }
 0x35b   : > { %v5470_v45 = vpop.f32.mrf.mxu0 }
 0x35c   : > { %v1986_v7 = vpop.f32.mrf.mxu1  ;;  %5510 = vmatmul.mubr.msk.bf16.gmra.mxu1 %vm1639_vm8, %v2518_v38 }
 0x35d   : > { %v2622_v17 = vpop.f32.mrf.mxu0  ;;  %5513 = vmatprep.mubr.msk.bf16.mxu1 %vm5869_vm3, %v5867_v53 }
 0x35e   : > { %v5345_v48 = vpop.f32.mrf.mxu1 }
 0x35f   : > { %v5483_v34 = vpop.f32.mrf.mxu0 }
 0x360   : > { %v1989_v49 = vpop.f32.mrf.mxu1 }
 0x361   : > { %v2625_v3 = vpop.f32.mrf.mxu0 }
 0x362   : > { %v5346_v29 = vpop.f32.mrf.mxu1 }
 0x363   : > { %v5484_v52 = vpop.f32.mrf.mxu0 }
 0x364   : > { %v7014_v60 = vpop.f32.mrf.mxu1  ;;  %5514 = vmatmul.mubr.msk.bf16.gmra.mxu1 %vm1639_vm8, %v2519_v63 }
 0x366   : > { %v5349_v13 = vpop.f32.mrf.mxu1 }
 0x368   : > { %v7017_v14 = vpop.f32.mrf.mxu1 }
 0x36a   : > { %v5350_v24 = vpop.f32.mrf.mxu1 }
 0x36c   : > { %v7019_v35 = vpop.f32.mrf.mxu1 }
 0x36e   : > { %v5353_v53 = vpop.f32.mrf.mxu1 }
 0x370   : > { %v7021_v8 = vpop.f32.mrf.mxu1 }
 0x372   : > { %v5354_v30 = vpop.f32.mrf.mxu1 }
 0x374   : > { %v7023_v43 = vpop.f32.mrf.mxu1 }
 0x376   : > { %v5357_v26 = vpop.f32.mrf.mxu1 }
 0x378   : > { %v7025_v31 = vpop.f32.mrf.mxu1 }
 0x37a   : > { %v5358_v40 = vpop.f32.mrf.mxu1 }
 0x37c   : > { %v7027_v2 = vpop.f32.mrf.mxu1 }
 0x37e   : > { %v5361_v4 = vpop.f32.mrf.mxu1 }
 0x37f   : > { %v1987_v4 = vadd.f32 %v1986_v7, %v6894_v36 }
 0x380   : > { %v7029_v11 = vpop.f32.mrf.mxu1 }
 0x382   : > { %v5362_v44 = vpop.f32.mrf.mxu1 }
 0x384   : > { %v7031_v54 = vpop.f32.mrf.mxu1 }
 0x386   : > { %v5365_v38 = vpop.f32.mrf.mxu1 }
 0x388   : > { %v7033_v45 = vpop.f32.mrf.mxu1 }
 0x38a   : > { %v5366_v48 = vpop.f32.mrf.mxu1 }
 0x38c   : > { %v7035_v34 = vpop.f32.mrf.mxu1 }
 0x38e   : > { %v5369_v46 = vpop.f32.mrf.mxu1 }
 0x38f   : > { %v1990_v46 = vadd.f32 %v1989_v49, %v6901_v27 }
 0x390   : > { %v7037_v39 = vpop.f32.mrf.mxu1 }
 0x392   : > { %v5370_v29 = vpop.f32.mrf.mxu1 }
 0x394   : > { %v7039_v63 = vpop.f32.mrf.mxu1 }
 0x396   : > { %v5373_v52 = vpop.f32.mrf.mxu1 }
 0x398   : > { %v7041_v13 = vpop.f32.mrf.mxu1 }
 0x399   : > { %7535 = vst [vmem:[#allocation10_spill] sm:$0xff] %v7041_v13 }
 0x39a   : > { %v5374_v24 = vpop.f32.mrf.mxu1 }
 0x39c   : > { %v7043_v53 = vpop.f32.mrf.mxu1 }
 0x39d   : > { %7536 = vst [vmem:[#allocation19_spill] sm:$0xff] %v7043_v53 }
 0x39e   : > { %v5377_v30 = vpop.f32.mrf.mxu1 }
 0x3a0   : > { %v2053_v26 = vpop.f32.mrf.mxu1 }
 0x3a2   : > { %v5378_v40 = vpop.f32.mrf.mxu1 }
 0x3a4   : > { %v2186_v44 = vpop.f32.mrf.mxu1 }
 0x3a5   : > { %v2257_v38 = vadd.f32 %v2186_v44, %v1987_v4 }
 0x3a6   : > { %v5391_v48 = vpop.f32.mrf.mxu1 }
 0x3a7   : > { %v2475_v29 = vadd.f32 %v6896_v6, %v2257_v38 }
 0x3a8   : > { %v2189_v56 = vpop.f32.mrf.mxu1 }
 0x3a9   : > { %v2693_v0 = vadd.f32 %v2622_v17, %v2475_v29  ;;  %v2258_v52 = vadd.f32 %v2189_v56, %v1990_v46 }
 0x3aa   : > { %v5392_v59 = vpop.f32.mrf.mxu1 }
 0x3ab   : > { %2711 = vst [vmem:[#allocation4] sm:$0xff] %v2693_v0  ;;  %v2476_v24 = vadd.f32 %v6903_v9, %v2258_v52  ;;  %v7052_v0 = vld [vmem:[%s7444_s4] sm:$0x1] }
 0x3ac   : > { %v2194_v53 = vpop.f32.mrf.mxu1 }
 0x3ad   : > { %v2694_v30 = vadd.f32 %v2625_v3, %v2476_v24 }
 0x3ae   : > { %v5395_v26 = vpop.f32.mrf.mxu1 }
 0x3af   : > { %2712 = vst [vmem:[#allocation4 + $0x8] sm:$0xff] %v2694_v30 }
 0x3b0   : > { %v2197_v40 = vpop.f32.mrf.mxu1 }
 0x3b2   : > { %v5396_v36 = vpop.f32.mrf.mxu1  ;;  %v2730_v7 = vld [vmem:[#allocation4] sm:$0x1]  ;;  %v2731_v4 = vld [vmem:[#allocation4 + $0x1] sm:$0x1] }
 0x3b3   : > { %v2732_v38 = vmax.f32 %v2730_v7, %v2731_v4 }
 0x3b4   : > { %v2202_v44 = vpop.f32.mrf.mxu1 }
 0x3b6   : > { %v2733_v27 = vld [vmem:[#allocation4 + $0xe] sm:$0x1]  ;;  %v2734_v49 = vld [vmem:[#allocation4 + $0xf] sm:$0x1]  ;;  %v5399_v6 = vpop.f32.mrf.mxu1 }
 0x3b7   : > { %v2735_v17 = vmax.f32 %v2733_v27, %v2734_v49 }
 0x3b8   : > { %v2205_v9 = vpop.f32.mrf.mxu1 }
 0x3b9   : > { %v2736_v59 = vmax.f32 %v2732_v38, %v2735_v17 }
 0x3ba   : > { %v5400_v56 = vpop.f32.mrf.mxu1 }
 0x3bb   : > { %v2737_v3 = vadd.f32 %v2736_v59, %v7052_v0 }
 0x3bc   : > { %v2210_v48 = vpop.f32.mrf.mxu1 }
 0x3bd   : > { %v2738_v46 = vmax.f32 %v2737_v3, 0.0 }
 0x3be   : > { %v5403_v29 = vpop.f32.mrf.mxu1 }
 0x3bf   : > { %2740 = vst [vmem:[%s7056_s21] sm:$0x1] %v2738_v46 }
 0x3c0   : > { %v7059_v52 = vpop.f32.mrf.mxu1 }
 0x3c2   : > { %v5404_v24 = vpop.f32.mrf.mxu1 }
 0x3c4   : > { %v7061_v30 = vpop.f32.mrf.mxu1 }
 0x3c6   : > { %v5407_v26 = vpop.f32.mrf.mxu1 }
 0x3c8   : > { %v7063_v36 = vpop.f32.mrf.mxu1 }
 0x3ca   : > { %v5408_v7 = vpop.f32.mrf.mxu1 }
 0x3cb   : > { %v1995_v7 = vadd.f32 %v7014_v60, %v6915_v16 }
 0x3cc   : > { %v7065_v4 = vpop.f32.mrf.mxu1 }
 0x3cd   : > { %v2259_v37 = vadd.f32 %v2194_v53, %v1995_v7  ;;  %v2006_v53 = vadd.f32 %v7021_v8, %v6934_v57  ;;  %v2014_v57 = vadd.f32 %v7025_v31, %v6950_v21 }
 0x3ce   : > { %v5411_v27 = vpop.f32.mrf.mxu1 }
 0x3d0   : > { %v7067_v49 = vpop.f32.mrf.mxu1 }
 0x3d2   : > { %v5412_v6 = vpop.f32.mrf.mxu1 }
 0x3d4   : > { %v7069_v38 = vpop.f32.mrf.mxu1 }
 0x3d6   : > { %v5415_v17 = vpop.f32.mrf.mxu1 }
 0x3d7   : > { %v1998_v17 = vadd.f32 %v7017_v14, %v6922_v12  ;;  %v2741_v14 = vld [vmem:[#allocation4 + $0x2] sm:$0x1] }
 0x3d8   : > { %v7071_v59 = vpop.f32.mrf.mxu1 }
 0x3d9   : > { %v2260_v23 = vadd.f32 %v2197_v40, %v1998_v17  ;;  %v2262_v40 = vadd.f32 %v2205_v9, %v2006_v53 }
 0x3da   : > { %v5416_v56 = vpop.f32.mrf.mxu1 }
 0x3db   : > { %v2477_v56 = vadd.f32 %v6917_v61, %v2259_v37  ;;  %v2478_v16 = vadd.f32 %v6924_v15, %v2260_v23  ;;  %v2753_v37 = vld [vmem:[#allocation4 + $0x4] sm:$0x1]  ;;  %v2766_v15 = vld [vmem:[#allocation4 + $0x7] sm:$0x1]  ;;  %v2777_v23 = vld [vmem:[#allocation4 + $0x8] sm:$0x1] }
 0x3dc   : > { %v7073_v3 = vpop.f32.mrf.mxu1 }
 0x3dd   : > { %7537 = vst [vmem:[#allocation24_spill] sm:$0xff] %v7073_v3 }
 0x3de   : > { %v5419_v46 = vpop.f32.mrf.mxu1 }
 0x3df   : > { %v2003_v46 = vadd.f32 %v7019_v35, %v6929_v5  ;;  %v2754_v5 = vld [vmem:[#allocation4 + $0x5] sm:$0x1] }
 0x3e0   : > { %v7075_v29 = vpop.f32.mrf.mxu1 }
 0x3e1   : > { %7538 = vst [vmem:[#allocation6_spill] sm:$0xff] %v7075_v29 }
 0x3e2   : > { %v5420_v24 = vpop.f32.mrf.mxu1 }
 0x3e4   : > { %v7077_v26 = vpop.f32.mrf.mxu1 }
 0x3e5   : > { %7539 = vst [vmem:[#allocation15_spill] sm:$0xff] %v7077_v26  ;;  %v2261_v26 = vadd.f32 %v2202_v44, %v2003_v46  ;;  %v2011_v44 = vadd.f32 %v7023_v43, %v6943_v28  ;;  %v2480_v28 = vadd.f32 %v6936_v19, %v2262_v40  ;;  %v2755_v43 = vmax.f32 %v2753_v37, %v2754_v5 }
 0x3e6   : > { %v5423_v27 = vpop.f32.mrf.mxu1 }
 0x3e7   : > { %v2479_v61 = vadd.f32 %v6931_v55, %v2261_v26 }
 0x3e8   : > { %v2253_v6 = vpop.f32.mrf.mxu1 }
 0x3ea   : > { %v5424_v13 = vpop.f32.mrf.mxu1 }
 0x3eb   : > { %v2742_v13 = vld [vmem:[#allocation4 + $0x3] sm:$0x1] }
 0x3ec   : > { %v2630_v25 = vpop.f32.mrf.mxu1  ;;  %v2743_v55 = vmax.f32 %v2741_v14, %v2742_v13 }
 0x3ed   : > { %v2695_v24 = vadd.f32 %v2630_v25, %v2477_v56  ;;  %v2765_v25 = vld [vmem:[#allocation4 + $0x6] sm:$0x1]  ;;  %v2263_v56 = vadd.f32 %v2210_v48, %v2011_v44  ;;  %v2264_v44 = vadd.f32 %v7059_v52, %v2014_v57 }
 0x3ee   : > { %v5487_v29 = vpop.f32.mrf.mxu1  ;;  %v2767_v53 = vmax.f32 %v2765_v25, %v2766_v15  ;;  %v2019_v15 = vadd.f32 %v7027_v2, %v6957_v51 }
 0x3ef   : > { %2713 = vst [vmem:[#allocation4 + $0x10] sm:$0xff] %v2695_v24  ;;  %v2778_v29 = vld [vmem:[#allocation4 + $0x9] sm:$0x1]  ;;  %v2481_v40 = vadd.f32 %v6945_v1, %v2263_v56  ;;  %v2022_v56 = vadd.f32 %v7029_v11, %v6962_v20 }
 0x3f0   : > { %v2633_v60 = vpop.f32.mrf.mxu1  ;;  %v2265_v1 = vadd.f32 %v7061_v30, %v2019_v15 }
 0x3f1   : > { %v2696_v7 = vadd.f32 %v2633_v60, %v2478_v16  ;;  %v2266_v30 = vadd.f32 %v7063_v36, %v2022_v56  ;;  %v2027_v36 = vadd.f32 %v7031_v54, %v6971_v47 }
 0x3f2   : > { %v5488_v12 = vpop.f32.mrf.mxu1 }
 0x3f3   : > { %2714 = vst [vmem:[#allocation4 + $0x18] sm:$0xff] %v2696_v7 }
 0x3f4   : > { %v2638_v35 = vpop.f32.mrf.mxu1 }
 0x3f5   : > { %v2697_v27 = vadd.f32 %v2638_v35, %v2479_v61  ;;  %v2779_v35 = vmax.f32 %v2777_v23, %v2778_v29 }
 0x3f6   : > { %v2744_v8 = vld [vmem:[#allocation4 + $0x10] sm:$0x1]  ;;  %v2745_v6 = vld [vmem:[#allocation4 + $0x11] sm:$0x1]  ;;  %v2756_v9 = vld [vmem:[#allocation4 + $0x12] sm:$0x1]  ;;  %v5491_v17 = vpop.f32.mrf.mxu1 }
 0x3f7   : > { %v2746_v26 = vmax.f32 %v2744_v8, %v2745_v6  ;;  %v2757_v46 = vld [vmem:[#allocation4 + $0x13] sm:$0x1]  ;;  %v2768_v24 = vld [vmem:[#allocation4 + $0x14] sm:$0x1]  ;;  %v2769_v16 = vld [vmem:[#allocation4 + $0x15] sm:$0x1] }
 0x3f8   : > { %2715 = vst [vmem:[#allocation4 + $0x20] sm:$0xff] %v2697_v27  ;;  %v2758_v60 = vmax.f32 %v2756_v9, %v2757_v46  ;;  %v2770_v7 = vmax.f32 %v2768_v24, %v2769_v16  ;;  %v2780_v12 = vld [vmem:[#allocation4 + $0x16] sm:$0x1]  ;;  %v2781_v61 = vld [vmem:[#allocation4 + $0x17] sm:$0x1]  ;;  %v2641_v21 = vpop.f32.mrf.mxu1  ;;  %v2482_v9 = vadd.f32 %v6952_v22, %v2264_v44 }
 0x3f9   : > { %v2747_v31 = vmax.f32 %v2743_v55, %v2746_v26  ;;  %v2782_v3 = vmax.f32 %v2780_v12, %v2781_v61  ;;  %v2698_v17 = vadd.f32 %v2641_v21, %v2480_v28  ;;  %v2483_v21 = vadd.f32 %v6959_v10, %v2265_v1 }
 0x3fa   : > { %v2759_v48 = vmax.f32 %v2755_v43, %v2758_v60  ;;  %v2771_v14 = vmax.f32 %v2767_v53, %v2770_v7  ;;  %v5492_v13 = vpop.f32.mrf.mxu1  ;;  %v2789_v51 = vld [vmem:[#allocation4 + $0x1c] sm:$0x1]  ;;  %v2790_v2 = vld [vmem:[#allocation4 + $0x1d] sm:$0x1]  ;;  %v2801_v55 = vld [vmem:[#allocation4 + $0x1e] sm:$0x1] }
 0x3fb   : > { %v2748_v27 = vadd.f32 %v2747_v31, %v7052_v0  ;;  %v2783_v19 = vmax.f32 %v2779_v35, %v2782_v3  ;;  %2716 = vst [vmem:[#allocation4 + $0x28] sm:$0xff] %v2698_v17  ;;  %v2802_v46 = vld [vmem:[#allocation4 + $0x1f] sm:$0x1]  ;;  %v2791_v7 = vmax.f32 %v2789_v51, %v2790_v2 }
 0x3fc   : > { %v2760_v37 = vadd.f32 %v2759_v48, %v7052_v0  ;;  %v2772_v5 = vadd.f32 %v2771_v14, %v7052_v0  ;;  %v2646_v25 = vpop.f32.mrf.mxu1  ;;  %v2803_v31 = vmax.f32 %v2801_v55, %v2802_v46 }
 0x3fd   : > { %v2749_v23 = vmax.f32 %v2748_v27, 0.0  ;;  %v2784_v52 = vadd.f32 %v2783_v19, %v7052_v0  ;;  %v2699_v29 = vadd.f32 %v2646_v25, %v2481_v40 }
 0x3fe   : > { %v2761_v57 = vmax.f32 %v2760_v37, 0.0  ;;  %v2773_v3 = vmax.f32 %v2772_v5, 0.0  ;;  %v5495_v8 = vpop.f32.mrf.mxu1 }
 0x3ff   : > { %4890 = vst [vmem:[%s7056_s21 + $0x8] sm:$0x1] %v2749_v23  ;;  %v2785_v6 = vmax.f32 %v2784_v52, 0.0  ;;  %2717 = vst [vmem:[#allocation4 + $0x30] sm:$0xff] %v2699_v29  ;;  %v2813_v24 = vld [vmem:[#allocation4 + $0x20] sm:$0x1]  ;;  %v2484_v29 = vadd.f32 %v6964_v62, %v2266_v30  ;;  %v2030_v62 = vadd.f32 %v7033_v45, %v6978_v50 }
 0x400   : > { %4891 = vst [vmem:[%s7056_s21 + $0x10] sm:$0x1] %v2761_v57  ;;  %4892 = vst [vmem:[%s7056_s21 + $0x18] sm:$0x1] %v2773_v3  ;;  %v2649_v26 = vpop.f32.mrf.mxu1  ;;  %v2814_v16 = vld [vmem:[#allocation4 + $0x21] sm:$0x1]  ;;  %v2267_v57 = vadd.f32 %v7065_v4, %v2027_v36 }
 0x401   : > { %4893 = vst [vmem:[%s7056_s21 + $0x20] sm:$0x1] %v2785_v6  ;;  %v2700_v28 = vadd.f32 %v2649_v26, %v2482_v9  ;;  %v2815_v35 = vmax.f32 %v2813_v24, %v2814_v16  ;;  %v2825_v17 = vld [vmem:[#allocation4 + $0x22] sm:$0x1]  ;;  %v2826_v48 = vld [vmem:[#allocation4 + $0x23] sm:$0x1] }
 0x402   : > { %v2792_v43 = vld [vmem:[#allocation4 + $0x2a] sm:$0x1]  ;;  %v2793_v60 = vld [vmem:[#allocation4 + $0x2b] sm:$0x1]  ;;  %v2804_v53 = vld [vmem:[#allocation4 + $0x2c] sm:$0x1]  ;;  %v5496_v22 = vpop.f32.mrf.mxu1  ;;  %v2827_v3 = vmax.f32 %v2825_v17, %v2826_v48  ;;  %v2038_v17 = vadd.f32 %v7037_v39, %v6989_v32 }
 0x403   : > { %v2794_v12 = vmax.f32 %v2792_v43, %v2793_v60  ;;  %v2805_v20 = vld [vmem:[#allocation4 + $0x2d] sm:$0x1]  ;;  %v2816_v11 = vld [vmem:[#allocation4 + $0x2e] sm:$0x1]  ;;  %v2817_v61 = vld [vmem:[#allocation4 + $0x2f] sm:$0x1]  ;;  %v2485_v43 = vadd.f32 %v6973_v18, %v2267_v57  ;;  %v2035_v60 = vadd.f32 %v7035_v34, %v6982_v33 }
 0x404   : > { %2718 = vst [vmem:[#allocation4 + $0x38] sm:$0xff] %v2700_v28  ;;  %v2806_v14 = vmax.f32 %v2804_v53, %v2805_v20  ;;  %v2818_v13 = vmax.f32 %v2816_v11, %v2817_v61  ;;  %v2654_v44 = vpop.f32.mrf.mxu1  ;;  %v2837_v27 = vld [vmem:[#allocation4 + $0x24] sm:$0x1]  ;;  %v2838_v19 = vld [vmem:[#allocation4 + $0x25] sm:$0x1]  ;;  %v2268_v28 = vadd.f32 %v7067_v49, %v2030_v62 }
 0x405   : > { %v2795_v40 = vmax.f32 %v2791_v7, %v2794_v12  ;;  %v2701_v37 = vadd.f32 %v2654_v44, %v2483_v21  ;;  %v2839_v47 = vmax.f32 %v2837_v27, %v2838_v19  ;;  %v2269_v12 = vadd.f32 %v7069_v38, %v2035_v60 }
 0x406   : > { %v2807_v5 = vmax.f32 %v2803_v31, %v2806_v14  ;;  %v2819_v25 = vmax.f32 %v2815_v35, %v2818_v13  ;;  %v2828_v15 = vld [vmem:[#allocation4 + $0x30] sm:$0x1]  ;;  %v2829_v23 = vld [vmem:[#allocation4 + $0x31] sm:$0x1]  ;;  %v2840_v52 = vld [vmem:[#allocation4 + $0x32] sm:$0x1]  ;;  %v5499_v10 = vpop.f32.mrf.mxu1  ;;  %v2486_v35 = vadd.f32 %v6980_v41, %v2268_v28 }
 0x407   : > { %v2796_v8 = vadd.f32 %v2795_v40, %v7052_v0  ;;  %v2830_v1 = vmax.f32 %v2828_v15, %v2829_v23  ;;  %v2841_v6 = vld [vmem:[#allocation4 + $0x33] sm:$0x1]  ;;  %2719 = vst [vmem:[#allocation4 + $0x40] sm:$0xff] %v2701_v37  ;;  %v2043_v37 = vadd.f32 %v7039_v63, %v6993_v58  ;;  %v2487_v32 = vadd.f32 %v6984_v42, %v2269_v12 }
 0x408   : > { %v2808_v54 = vadd.f32 %v2807_v5, %v7052_v0  ;;  %v2820_v9 = vadd.f32 %v2819_v25, %v7052_v0  ;;  %v2842_v56 = vmax.f32 %v2840_v52, %v2841_v6  ;;  %v2657_v51 = vpop.f32.mrf.mxu1  ;;  %v2270_v5 = vadd.f32 %v7071_v59, %v2038_v17 }
 0x409   : > { %v2797_v4 = vmax.f32 %v2796_v8, 0.0  ;;  %v2831_v2 = vmax.f32 %v2827_v3, %v2830_v1  ;;  %v2702_v55 = vadd.f32 %v2657_v51, %v2484_v29 }
 0x40a   : > { %v2809_v26 = vmax.f32 %v2808_v54, 0.0  ;;  %v2821_v46 = vmax.f32 %v2820_v9, 0.0  ;;  %v2843_v24 = vmax.f32 %v2839_v47, %v2842_v56  ;;  %v5500_v16 = vpop.f32.mrf.mxu1 }
 0x40b   : > { %4894 = vst [vmem:[%s7056_s21 + $0x28] sm:$0x1] %v2797_v4  ;;  %v2832_v30 = vadd.f32 %v2831_v2, %v7052_v0  ;;  %2720 = vst [vmem:[#allocation4 + $0x48] sm:$0xff] %v2702_v55  ;;  %v2849_v45 = vld [vmem:[#allocation4 + $0x38] sm:$0x1]  ;;  %v7540_v55 = vld [vmem:[#allocation24_spill] sm:$0xff] }
 0x40c   : > { %4895 = vst [vmem:[%s7056_s21 + $0x30] sm:$0x1] %v2809_v26  ;;  %4896 = vst [vmem:[%s7056_s21 + $0x38] sm:$0x1] %v2821_v46  ;;  %v2844_v50 = vadd.f32 %v2843_v24, %v7052_v0  ;;  %v2850_v53 = vld [vmem:[#allocation4 + $0x39] sm:$0x1]  ;;  %v2662_v22 = vpop.f32.mrf.mxu1  ;;  %v2271_v26 = vadd.f32 %v7540_v55, %v2043_v37 }
 0x40d   : > { %v2833_v7 = vmax.f32 %v2832_v30, 0.0  ;;  %v2703_v49 = vadd.f32 %v2662_v22, %v2485_v43  ;;  %v2851_v18 = vmax.f32 %v2849_v45, %v2850_v53  ;;  %v2861_v31 = vld [vmem:[#allocation4 + $0x3a] sm:$0x1]  ;;  %v2862_v33 = vld [vmem:[#allocation4 + $0x3b] sm:$0x1] }
 0x40e   : > { %v2845_v20 = vmax.f32 %v2844_v50, 0.0  ;;  %v2852_v11 = vld [vmem:[#allocation4 + $0x46] sm:$0x1]  ;;  %v2853_v61 = vld [vmem:[#allocation4 + $0x47] sm:$0x1]  ;;  %v5503_v21 = vpop.f32.mrf.mxu1  ;;  %v2863_v39 = vmax.f32 %v2861_v31, %v2862_v33  ;;  %v7541_v16 = vld [vmem:[#allocation14_spill] sm:$0xff] }
 0x40f   : > { %4897 = vst [vmem:[%s7056_s21 + $0x40] sm:$0x1] %v2833_v7  ;;  %v2854_v34 = vmax.f32 %v2852_v11, %v2853_v61  ;;  %2721 = vst [vmem:[#allocation4 + $0x50] sm:$0xff] %v2703_v49  ;;  %v2873_v48 = vld [vmem:[#allocation4 + $0x3c] sm:$0x1]  ;;  %v2488_v28 = vadd.f32 %v7541_v16, %v2270_v5  ;;  %v7542_v50 = vld [vmem:[#allocation7_spill] sm:$0xff] }
 0x410   : > { %4898 = vst [vmem:[%s7056_s21 + $0x48] sm:$0x1] %v2845_v20  ;;  %v2874_v14 = vld [vmem:[#allocation4 + $0x3d] sm:$0x1]  ;;  %v2885_v13 = vld [vmem:[#allocation4 + $0x3e] sm:$0x1]  ;;  %v2665_v38 = vpop.f32.mrf.mxu1 }
 0x411   : > { %v2886_v44 = vld [vmem:[#allocation4 + $0x3f] sm:$0x1]  ;;  %v2855_v36 = vmax.f32 %v2851_v18, %v2854_v34  ;;  %v2897_v27 = vld [vmem:[#allocation4 + $0x40] sm:$0x1]  ;;  %v2898_v19 = vld [vmem:[#allocation4 + $0x41] sm:$0x1]  ;;  %v2704_v40 = vadd.f32 %v2665_v38, %v2486_v35  ;;  %v2875_v52 = vmax.f32 %v2873_v48, %v2874_v14 }
 0x412   : > { %v2864_v25 = vld [vmem:[#allocation4 + $0x48] sm:$0x1]  ;;  %v2865_v41 = vld [vmem:[#allocation4 + $0x49] sm:$0x1]  ;;  %v2876_v15 = vld [vmem:[#allocation4 + $0x4a] sm:$0x1]  ;;  %v5504_v23 = vpop.f32.mrf.mxu1  ;;  %v2887_v1 = vmax.f32 %v2885_v13, %v2886_v44  ;;  %v2899_v58 = vmax.f32 %v2897_v27, %v2898_v19 }
 0x413   : > { %v2856_v10 = vadd.f32 %v2855_v36, %v7052_v0  ;;  %v2866_v29 = vmax.f32 %v2864_v25, %v2865_v41  ;;  %v2877_v57 = vld [vmem:[#allocation4 + $0x4b] sm:$0x1]  ;;  %v2888_v3 = vld [vmem:[#allocation4 + $0x4c] sm:$0x1]  ;;  %v2889_v8 = vld [vmem:[#allocation4 + $0x4d] sm:$0x1] }
 0x414   : > { %2722 = vst [vmem:[#allocation4 + $0x58] sm:$0xff] %v2704_v40  ;;  %v2878_v63 = vmax.f32 %v2876_v15, %v2877_v57  ;;  %v2890_v59 = vmax.f32 %v2888_v3, %v2889_v8  ;;  %v2900_v6 = vld [vmem:[#allocation4 + $0x4e] sm:$0x1]  ;;  %v2901_v47 = vld [vmem:[#allocation4 + $0x4f] sm:$0x1]  ;;  %v2670_v54 = vpop.f32.mrf.mxu1  ;;  %v7543_v45 = vld [vmem:[#allocation10_spill] sm:$0xff] }
 0x415   : > { %v2857_v9 = vmax.f32 %v2856_v10, 0.0  ;;  %v2867_v56 = vmax.f32 %v2863_v39, %v2866_v29  ;;  %v2902_v42 = vmax.f32 %v2900_v6, %v2901_v47  ;;  %v2705_v51 = vadd.f32 %v2670_v54, %v2487_v32  ;;  %v7544_v61 = vld [vmem:[#allocation6_spill] sm:$0xff]  ;;  %v7545_v31 = vld [vmem:[#allocation8_spill] sm:$0xff]  ;;  %v7547_v35 = vld [vmem:[#allocation19_spill] sm:$0xff] }
 0x416   : > { %v2879_v62 = vmax.f32 %v2875_v52, %v2878_v63  ;;  %v2891_v4 = vmax.f32 %v2887_v1, %v2890_v59  ;;  %v5507_v2 = vpop.f32.mrf.mxu1  ;;  %v2046_v53 = vadd.f32 %v7543_v45, %v7542_v50  ;;  %v2489_v33 = vadd.f32 %v7545_v31, %v2271_v26  ;;  %v7546_v34 = vld [vmem:[#allocation22_spill] sm:$0xff]  ;;  %v2909_v48 = vld [vmem:[#allocation4 + $0x54] sm:$0x1]  ;;  %v2910_v14 = vld [vmem:[#allocation4 + $0x55] sm:$0x1] }
 0x417   : > { %4899 = vst [vmem:[%s7056_s21 + $0x50] sm:$0x1] %v2857_v9  ;;  %v2868_v46 = vadd.f32 %v2867_v56, %v7052_v0  ;;  %v2903_v24 = vmax.f32 %v2899_v58, %v2902_v42  ;;  %2723 = vst [vmem:[#allocation4 + $0x60] sm:$0xff] %v2705_v51  ;;  %v2051_v17 = vadd.f32 %v7547_v35, %v7546_v34  ;;  %v2921_v13 = vld [vmem:[#allocation4 + $0x56] sm:$0x1]  ;;  %v7548_v40 = vld [vmem:[#allocation15_spill] sm:$0xff] }
 0x418   : > { %v2880_v30 = vadd.f32 %v2879_v62, %v7052_v0  ;;  %v2892_v43 = vadd.f32 %v2891_v4, %v7052_v0  ;;  %v2673_v60 = vpop.f32.mrf.mxu1  ;;  %v2272_v21 = vadd.f32 %v7544_v61, %v2046_v53  ;;  %v2922_v44 = vld [vmem:[#allocation4 + $0x57] sm:$0x1]  ;;  %v2911_v23 = vmax.f32 %v2909_v48, %v2910_v14  ;;  %v7550_v26 = vld [vmem:[#allocation23_spill] sm:$0xff] }
 0x419   : > { %v2869_v22 = vmax.f32 %v2868_v46, 0.0  ;;  %v2904_v7 = vadd.f32 %v2903_v24, %v7052_v0  ;;  %v2706_v49 = vadd.f32 %v2673_v60, %v2488_v28  ;;  %v2273_v37 = vadd.f32 %v7548_v40, %v2051_v17  ;;  %v7549_v29 = vld [vmem:[#allocation17_spill] sm:$0xff] }
 0x41a   : > { %v2881_v12 = vmax.f32 %v2880_v30, 0.0  ;;  %v2893_v20 = vmax.f32 %v2892_v43, 0.0  ;;  %v5508_v11 = vpop.f32.mrf.mxu1  ;;  %v2490_v57 = vadd.f32 %v7549_v29, %v2272_v21  ;;  %v2923_v3 = vmax.f32 %v2921_v13, %v2922_v44 }
 0x41b   : > { %4900 = vst [vmem:[%s7056_s21 + $0x58] sm:$0x1] %v2869_v22  ;;  %v2905_v18 = vmax.f32 %v2904_v7, 0.0  ;;  %2724 = vst [vmem:[#allocation4 + $0x68] sm:$0xff] %v2706_v49  ;;  %v2933_v36 = vld [vmem:[#allocation4 + $0x58] sm:$0x1]  ;;  %v2491_v46 = vadd.f32 %v7550_v26, %v2273_v37 }
 0x41c   : > { %4901 = vst [vmem:[%s7056_s21 + $0x60] sm:$0x1] %v2881_v12  ;;  %4902 = vst [vmem:[%s7056_s21 + $0x68] sm:$0x1] %v2893_v20  ;;  %v2678_v38 = vpop.f32.mrf.mxu1  ;;  %v2934_v27 = vld [vmem:[#allocation4 + $0x59] sm:$0x1] }
 0x41d   : > { %4903 = vst [vmem:[%s7056_s21 + $0x70] sm:$0x1] %v2905_v18  ;;  %v2707_v19 = vadd.f32 %v2678_v38, %v2489_v33  ;;  %v2935_v8 = vmax.f32 %v2933_v36, %v2934_v27  ;;  %v2945_v1 = vld [vmem:[#allocation4 + $0x5a] sm:$0x1]  ;;  %v2946_v58 = vld [vmem:[#allocation4 + $0x5b] sm:$0x1] }
 0x41e   : > { %v2912_v5 = vld [vmem:[#allocation4 + $0x62] sm:$0x1]  ;;  %v2913_v25 = vld [vmem:[#allocation4 + $0x63] sm:$0x1]  ;;  %v2924_v41 = vld [vmem:[#allocation4 + $0x64] sm:$0x1]  ;;  %v5511_v15 = vpop.f32.mrf.mxu1  ;;  %v2947_v24 = vmax.f32 %v2945_v1, %v2946_v58 }
 0x41f   : > { %v2914_v32 = vmax.f32 %v2912_v5, %v2913_v25  ;;  %v2925_v39 = vld [vmem:[#allocation4 + $0x65] sm:$0x1]  ;;  %v2936_v52 = vld [vmem:[#allocation4 + $0x66] sm:$0x1]  ;;  %v2937_v10 = vld [vmem:[#allocation4 + $0x67] sm:$0x1] }
 0x420   : > { %2725 = vst [vmem:[#allocation4 + $0x70] sm:$0xff] %v2707_v19  ;;  %v2926_v63 = vmax.f32 %v2924_v41, %v2925_v39  ;;  %v2938_v59 = vmax.f32 %v2936_v52, %v2937_v10  ;;  %v2681_v6 = vpop.f32.mrf.mxu1  ;;  %v2957_v47 = vld [vmem:[#allocation4 + $0x5c] sm:$0x1]  ;;  %v2958_v54 = vld [vmem:[#allocation4 + $0x5d] sm:$0x1] }
 0x421   : > { %v2915_v9 = vmax.f32 %v2911_v23, %v2914_v32  ;;  %v2708_v56 = vadd.f32 %v2681_v6, %v2490_v57  ;;  %v2959_v43 = vmax.f32 %v2957_v47, %v2958_v54 }
 0x422   : > { %v2927_v42 = vmax.f32 %v2923_v3, %v2926_v63  ;;  %v2939_v51 = vmax.f32 %v2935_v8, %v2938_v59  ;;  %v2948_v62 = vld [vmem:[#allocation4 + $0x68] sm:$0x1]  ;;  %v2949_v4 = vld [vmem:[#allocation4 + $0x69] sm:$0x1]  ;;  %v2960_v2 = vld [vmem:[#allocation4 + $0x6a] sm:$0x1]  ;;  %v5512_v55 = vpop.f32.mrf.mxu1 }
 0x423   : > { %v2916_v16 = vadd.f32 %v2915_v9, %v7052_v0  ;;  %v2950_v28 = vmax.f32 %v2948_v62, %v2949_v4  ;;  %v2961_v30 = vld [vmem:[#allocation4 + $0x6b] sm:$0x1]  ;;  %2726 = vst [vmem:[#allocation4 + $0x78] sm:$0xff] %v2708_v56 }
 0x424   : > { %v2928_v60 = vadd.f32 %v2927_v42, %v7052_v0  ;;  %v2940_v50 = vadd.f32 %v2939_v51, %v7052_v0  ;;  %v2962_v45 = vmax.f32 %v2960_v2, %v2961_v30  ;;  %v2686_v53 = vpop.f32.mrf.mxu1 }
 0x425   : > { %v2917_v22 = vmax.f32 %v2916_v16, 0.0  ;;  %v2951_v7 = vmax.f32 %v2947_v24, %v2950_v28  ;;  %v2709_v49 = vadd.f32 %v2686_v53, %v2491_v46 }
 0x426   : > { %v2929_v12 = vmax.f32 %v2928_v60, 0.0  ;;  %v2941_v20 = vmax.f32 %v2940_v50, 0.0  ;;  %v2963_v11 = vmax.f32 %v2959_v43, %v2962_v45  ;;  %v5515_v61 = vpop.f32.mrf.mxu1  ;;  %v5814_v43 = vld [vmem:[%s7445_s5 + $0x8] sm:$0xff] (%p41_p0)   ;;  %v5870_v60 = vmov (%p41_p0), 0.0  }
 0x427   : > { %4904 = vst [vmem:[%s7056_s21 + $0x78] sm:$0x1] %v2917_v22  ;;  %v2952_v21 = vadd.f32 %v2951_v7, %v7052_v0  ;;  %2727 = vst [vmem:[#allocation4 + $0x80] sm:$0xff] %v2709_v49  ;;  %v2969_v31 = vld [vmem:[#allocation4 + $0x70] sm:$0x1]  ;;  %5517 = vmatprep.subr.bf16.mxu0 (%p41_p0), %v5870_v60  ;;  %5523 = vmatprep.subr.bf16.mxu1 (%p41_p0), %v5870_v60  ;;  %v5816_v7 = vld [vmem:[%s7445_s5 + $0x10] sm:$0xff] (%p41_p0)  }
 0x428   : > { %4905 = vst [vmem:[%s7056_s21 + $0x80] sm:$0x1] %v2929_v12  ;;  %4906 = vst [vmem:[%s7056_s21 + $0x88] sm:$0x1] %v2941_v20  ;;  %v2964_v18 = vadd.f32 %v2963_v11, %v7052_v0  ;;  %v2970_v33 = vld [vmem:[#allocation4 + $0x71] sm:$0x1]  ;;  %v2689_v34 = vpop.f32.mrf.mxu1  ;;  %5518 = vmatpush3.bf16.msra.mxu0 (%p41_p0), %v5814_v43  ;;  %5519 = vmatprep.mubr.msk.bf16.mxu0 (%p41_p0), %vm5871_vm9, %v5870_v60 }
 0x429   : > { %v2953_v35 = vmax.f32 %v2952_v21, 0.0  ;;  %v2971_v38 = vmax.f32 %v2969_v31, %v2970_v33  ;;  %v2981_v44 = vld [vmem:[#allocation4 + $0x72] sm:$0x1]  ;;  %v2982_v36 = vld [vmem:[#allocation4 + $0x73] sm:$0x1]  ;;  %5525 = vmatprep.mubr.msk.bf16.mxu1 (%p41_p0), %vm5871_vm9, %v5870_v60  ;;  %5529 = vmatprep.subr.bf16.mxu0 (%p41_p0), %v5870_v60  ;;  %v5817_v49 = vld [vmem:[%s7445_s5 + $0x18] sm:$0xff] (%p41_p0)  }
 0x42a   : > { %v2965_v17 = vmax.f32 %v2964_v18, 0.0  ;;  %v2972_v48 = vld [vmem:[#allocation4 + $0x7e] sm:$0x1]  ;;  %v2973_v14 = vld [vmem:[#allocation4 + $0x7f] sm:$0x1]  ;;  %v5516_v13 = vpop.f32.mrf.mxu1  ;;  %v2983_v52 = vmax.f32 %v2981_v44, %v2982_v36  ;;  %v5818_v21 = vld [vmem:[%s7445_s5 + $0x20] sm:$0xff] (%p41_p0)  }
 0x42b   : > { %4907 = vst [vmem:[%s7056_s21 + $0x90] sm:$0x1] %v2953_v35  ;;  %v2974_v27 = vmax.f32 %v2972_v48, %v2973_v14  ;;  %v2993_v19 = vld [vmem:[#allocation4 + $0x74] sm:$0x1]  ;;  %v2994_v40 = vld [vmem:[#allocation4 + $0x75] sm:$0x1] }
 0x42c   : > { %4908 = vst [vmem:[%s7056_s21 + $0x98] sm:$0x1] %v2965_v17  ;;  %v3005_v37 = vld [vmem:[#allocation4 + $0x76] sm:$0x1]  ;;  %v3006_v5 = vld [vmem:[#allocation4 + $0x77] sm:$0x1]  ;;  %v2995_v1 = vmax.f32 %v2993_v19, %v2994_v40 }
 0x42d   : > { %v2975_v25 = vmax.f32 %v2971_v38, %v2974_v27  ;;  %v3017_v41 = vld [vmem:[#allocation4 + $0x78] sm:$0x1]  ;;  %v3018_v15 = vld [vmem:[#allocation4 + $0x79] sm:$0x1]  ;;  %v3007_v58 = vmax.f32 %v3005_v37, %v3006_v5  ;;  %v5819_v18 = vld [vmem:[%s7445_s5 + $0x28] sm:$0xff] (%p41_p0)  }
 0x42e   : > { %v2984_v23 = vld [vmem:[#allocation4 + $0x80] sm:$0x1]  ;;  %v2985_v32 = vld [vmem:[#allocation4 + $0x81] sm:$0x1]  ;;  %v2996_v39 = vld [vmem:[#allocation4 + $0x82] sm:$0x1]  ;;  %v3019_v9 = vmax.f32 %v3017_v41, %v3018_v15 }
 0x42f   : > { %v2976_v10 = vadd.f32 %v2975_v25, %v7052_v0  ;;  %v2986_v29 = vmax.f32 %v2984_v23, %v2985_v32  ;;  %v2997_v57 = vld [vmem:[#allocation4 + $0x83] sm:$0x1]  ;;  %v3008_v3 = vld [vmem:[#allocation4 + $0x84] sm:$0x1]  ;;  %v3009_v8 = vld [vmem:[#allocation4 + $0x85] sm:$0x1] }
 0x430   : > { %v2998_v63 = vmax.f32 %v2996_v39, %v2997_v57  ;;  %v3010_v59 = vmax.f32 %v3008_v3, %v3009_v8  ;;  %v3020_v6 = vld [vmem:[#allocation4 + $0x86] sm:$0x1]  ;;  %v3021_v47 = vld [vmem:[#allocation4 + $0x87] sm:$0x1]  ;;  %v5820_v17 = vld [vmem:[%s7445_s5 + $0x30] sm:$0xff] (%p41_p0)  }
 0x431   : > { %v2977_v54 = vmax.f32 %v2976_v10, 0.0  ;;  %v2987_v56 = vmax.f32 %v2983_v52, %v2986_v29  ;;  %v3022_v42 = vmax.f32 %v3020_v6, %v3021_v47  ;;  %v5821_v48 = vld [vmem:[%s7445_s5 + $0x38] sm:$0xff] (%p41_p0)   ;;  %v5822_v36 = vld [vmem:[%s7445_s5 + $0x40] sm:$0xff] (%p41_p0)   ;;  %v5823_v27 = vld [vmem:[%s7445_s5 + $0x48] sm:$0xff] (%p41_p0)  }
 0x432   : > { %v2999_v51 = vmax.f32 %v2995_v1, %v2998_v63  ;;  %v3011_v62 = vmax.f32 %v3007_v58, %v3010_v59  ;;  %v5824_v37 = vld [vmem:[%s7445_s5 + $0x50] sm:$0xff] (%p41_p0)   ;;  %v5825_v25 = vld [vmem:[%s7445_s5 + $0x58] sm:$0xff] (%p41_p0)   ;;  %v5826_v32 = vld [vmem:[%s7445_s5 + $0x60] sm:$0xff] (%p41_p0)  }
 0x433   : > { %4909 = vst [vmem:[%s7056_s21 + $0xa0] sm:$0x1] %v2977_v54  ;;  %v2988_v4 = vadd.f32 %v2987_v56, %v7052_v0  ;;  %v3023_v2 = vmax.f32 %v3019_v9, %v3022_v42  ;;  %v5827_v52 = vld [vmem:[%s7445_s5 + $0x68] sm:$0xff] (%p41_p0)   ;;  %v5828_v1 = vld [vmem:[%s7445_s5 + $0x70] sm:$0xff] (%p41_p0)   ;;  %v5829_v58 = vld [vmem:[%s7445_s5 + $0x78] sm:$0xff] (%p41_p0)  }
 0x434   : > { %v3000_v55 = vadd.f32 %v2999_v51, %v7052_v0  ;;  %v3012_v26 = vadd.f32 %v3011_v62, %v7052_v0  ;;  %v5830_v54 = vld [vmem:[%s7445_s5 + $0x80] sm:$0xff] (%p41_p0)   ;;  %v5831_v9 = vld [vmem:[%s7445_s5 + $0x88] sm:$0xff] (%p41_p0)  }
 0x435   : > { %v2989_v46 = vmax.f32 %v2988_v4, 0.0  ;;  %v3024_v24 = vadd.f32 %v3023_v2, %v7052_v0  ;;  %43 = sbr.rel (!%p41_p0) target bundleno = 1 (0x1), region = 101  ;;  %v5815_v0 = vld [vmem:[%s7445_s5] sm:$0xff] (%p41_p0)   ;;  %v5832_v4 = vld [vmem:[%s7445_s5 + $0x90] sm:$0xff] (%p41_p0)   ;;  %v5833_v2 = vld [vmem:[%s7445_s5 + $0x98] sm:$0xff] (%p41_p0)  }
 0x436   : > { %v3001_v16 = vmax.f32 %v3000_v55, 0.0  ;;  %v3013_v28 = vmax.f32 %v3012_v26, 0.0  ;;  %5524 = vmatpush3.bf16.msra.mxu1 (%p41_p0), %v5815_v0 }
 0x437   : > { %4910 = vst [vmem:[%s7056_s21 + $0xa8] sm:$0x1] %v2989_v46  ;;  %v3025_v30 = vmax.f32 %v3024_v24, 0.0  ;;  %5535 = vmatprep.subr.bf16.mxu1 (%p41_p0), %v5870_v60 }
 0x438   : > { %4911 = vst [vmem:[%s7056_s21 + $0xb0] sm:$0x1] %v3001_v16  ;;  %4912 = vst [vmem:[%s7056_s21 + $0xb8] sm:$0x1] %v3013_v28  ;;  %v5834_v16 = vld [vmem:[%s7445_s5 + $0xa0] sm:$0xff] (%p41_p0)   ;;  %v5835_v28 = vld [vmem:[%s7445_s5 + $0xa8] sm:$0xff] (%p41_p0)  }
 0x439   : > { %4913 = vst [vmem:[%s7056_s21 + $0xc0] sm:$0x1] %v3025_v30 }
 0x440   :  { %v3033_v50 = vld [vmem:[#allocation5 + $0x8] sm:$0xff]  ;;  %v3029_v45 = vld [vmem:[#allocation5] sm:$0xff]  ;;  %v3136_v12 = vld [vmem:[#allocation5 + $0x10] sm:$0xff] }
 0x441   :  { %v3034_v53 = vpack.c.bf16 %v3033_v50, %v3033_v50  ;;  %v3030_v22 = vpack.c.bf16 %v3029_v45, %v3029_v45  ;;  %v3190_v20 = vld [vmem:[#allocation5 + $0x18] sm:$0xff]  ;;  %v3137_v11 = vpack.c.bf16 %v3136_v12, %v3136_v12  ;;  %v3244_v31 = vld [vmem:[#allocation5 + $0x20] sm:$0xff]  ;;  %v3298_v33 = vld [vmem:[#allocation5 + $0x28] sm:$0xff] }
 0x442   :  { %v3191_v61 = vpack.c.bf16 %v3190_v20, %v3190_v20  ;;  %v3245_v34 = vpack.c.bf16 %v3244_v31, %v3244_v31  ;;  %v3299_v35 = vpack.c.bf16 %v3298_v33, %v3298_v33  ;;  %v3352_v14 = vld [vmem:[#allocation5 + $0x30] sm:$0xff]  ;;  %v3406_v13 = vld [vmem:[#allocation5 + $0x38] sm:$0xff]  ;;  %v3460_v19 = vld [vmem:[#allocation5 + $0x40] sm:$0xff] }
 0x443   :  { %5520 = vmatmul.mubr.msk.bf16.vlgmr.msra.gmra.mxu0 %vm1563_vm4, %v3034_v53  ;;  %5526 = vmatmul.mubr.msk.bf16.vlgmr.msra.gmra.mxu1 %vm1563_vm4, %v3030_v22  ;;  %v3353_v38 = vpack.c.bf16 %v3352_v14, %v3352_v14  ;;  %v3407_v44 = vpack.c.bf16 %v3406_v13, %v3406_v13  ;;  %v3514_v40 = vld [vmem:[#allocation5 + $0x48] sm:$0xff]  ;;  %v3461_v5 = vpack.c.bf16 %v3460_v19, %v3460_v19  ;;  %v3568_v15 = vld [vmem:[#allocation5 + $0x50] sm:$0xff]  ;;  %v3622_v23 = vld [vmem:[#allocation5 + $0x58] sm:$0xff] }
 0x444   :  { %5530 = vmatpush3.bf16.msra.mxu0 %v5816_v7  ;;  %5536 = vmatpush3.bf16.msra.mxu1 %v5817_v49  ;;  %v3515_v41 = vpack.c.bf16 %v3514_v40, %v3514_v40  ;;  %v3569_v39 = vpack.c.bf16 %v3568_v15, %v3568_v15  ;;  %v3623_v10 = vpack.c.bf16 %v3622_v23, %v3622_v23  ;;  %v3676_v29 = vld [vmem:[#allocation5 + $0x60] sm:$0xff]  ;;  %v3730_v57 = vld [vmem:[#allocation5 + $0x68] sm:$0xff]  ;;  %v3784_v63 = vld [vmem:[#allocation5 + $0x70] sm:$0xff] }
 0x445   :  { %5531 = vmatprep.mubr.msk.bf16.mxu0 %vm5871_vm9, %v5870_v60  ;;  %5537 = vmatprep.mubr.msk.bf16.mxu1 %vm5871_vm9, %v5870_v60  ;;  %v3677_v3 = vpack.c.bf16 %v3676_v29, %v3676_v29  ;;  %v3731_v8 = vpack.c.bf16 %v3730_v57, %v3730_v57  ;;  %v3838_v59 = vld [vmem:[#allocation5 + $0x78] sm:$0xff]  ;;  %v3785_v6 = vpack.c.bf16 %v3784_v63, %v3784_v63  ;;  %v3892_v56 = vld [vmem:[#allocation5 + $0x80] sm:$0xff]  ;;  %v3946_v42 = vld [vmem:[#allocation5 + $0x88] sm:$0xff] }
 0x446   :  { %5541 = vmatprep.subr.bf16.mxu0 %v5870_v60  ;;  %5547 = vmatprep.subr.bf16.mxu1 %v5870_v60  ;;  %v3839_v47 = vpack.c.bf16 %v3838_v59, %v3838_v59  ;;  %v3893_v51 = vpack.c.bf16 %v3892_v56, %v3892_v56  ;;  %v3947_v62 = vpack.c.bf16 %v3946_v42, %v3946_v42  ;;  %v4000_v55 = vld [vmem:[#allocation5 + $0x90] sm:$0xff]  ;;  %v4054_v26 = vld [vmem:[#allocation5 + $0x98] sm:$0xff]  ;;  %v4108_v30 = vld [vmem:[#allocation5 + $0xa0] sm:$0xff] }
 0x447   :  { %v4001_v46 = vpack.c.bf16 %v4000_v55, %v4000_v55  ;;  %v4055_v24 = vpack.c.bf16 %v4054_v26, %v4054_v26  ;;  %v4162_v43 = vld [vmem:[#allocation5 + $0xa8] sm:$0xff]  ;;  %v4109_v0 = vpack.c.bf16 %v4108_v30, %v4108_v30  ;;  %v5837_v53 = vld [vmem:[%s7445_s5 + $0xb8] sm:$0xff]   ;;  %v4270_v7 = vld [vmem:[#allocation5 + $0xb8] sm:$0xff] }
 0x448   :  { %v4163_v50 = vpack.c.bf16 %v4162_v43, %v4162_v43  ;;  %v5836_v45 = vld [vmem:[%s7445_s5 + $0xb0] sm:$0xff]   ;;  %v4216_v22 = vld [vmem:[#allocation5 + $0xb0] sm:$0xff]  ;;  %v4271_v12 = vpack.c.bf16 %v4270_v7, %v4270_v7  ;;  %v5838_v20 = vld [vmem:[%s7445_s5 + $0xc0] sm:$0xff]  }
 0x449   :  { %v4217_v49 = vpack.c.bf16 %v4216_v22, %v4216_v22  ;;  %v5841_v31 = vld [vmem:[%s7447_s7 + $0x28] sm:$0xff]   ;;  %v5842_v33 = vld [vmem:[%s7447_s7 + $0x20] sm:$0xff]   ;;  %v5847_v14 = vld [vmem:[%s7449_s9 + $0x38] sm:$0xff]  }
 0x44a   :  { %v5848_v13 = vld [vmem:[%s7449_s9 + $0x30] sm:$0xff]  }
 0x44b   :  { %5532 = vmatmul.mubr.msk.bf16.vlgmr.msra.gmra.mxu0 %vm1563_vm4, %v3137_v11  ;;  %5538 = vmatmul.mubr.msk.bf16.vlgmr.msra.gmra.mxu1 %vm1563_vm4, %v3191_v61  ;;  %v4324_v11 = vld [vmem:[#allocation5 + $0xc0] sm:$0xff] }
 0x44c   :  { %5542 = vmatpush3.bf16.msra.mxu0 %v5818_v21  ;;  %5548 = vmatpush3.bf16.msra.mxu1 %v5819_v18  ;;  %v4325_v61 = vpack.c.bf16 %v4324_v11, %v4324_v11  ;;  %v5839_v21 = vld [vmem:[%s7447_s7 + $0x38] sm:$0xff]   ;;  %v5840_v18 = vld [vmem:[%s7447_s7 + $0x30] sm:$0xff]  }
 0x44d   :  { %5543 = vmatprep.mubr.msk.bf16.mxu0 %vm5871_vm9, %v5870_v60  ;;  %5549 = vmatprep.mubr.msk.bf16.mxu1 %vm5871_vm9, %v5870_v60 }
 0x44e   :  { %5553 = vmatprep.subr.bf16.mxu0 %v5870_v60  ;;  %5559 = vmatprep.subr.bf16.mxu1 %v5870_v60 }
 0x453   :  { %5544 = vmatmul.mubr.msk.bf16.vlgmr.msra.gmra.mxu0 %vm1563_vm4, %v3245_v34  ;;  %5550 = vmatmul.mubr.msk.bf16.vlgmr.msra.gmra.mxu1 %vm1563_vm4, %v3299_v35  ;;  %v5843_v34 = vld [vmem:[%s7447_s7 + $0x18] sm:$0xff]   ;;  %v5844_v35 = vld [vmem:[%s7447_s7 + $0x10] sm:$0xff]  }
 0x454   :  { %5554 = vmatpush3.bf16.msra.mxu0 %v5820_v17  ;;  %5560 = vmatpush3.bf16.msra.mxu1 %v5821_v48  ;;  %v5845_v17 = vld [vmem:[%s7447_s7 + $0x8] sm:$0xff]   ;;  %v5846_v48 = vld [vmem:[%s7447_s7] sm:$0xff]  }
 0x455   :  { %5555 = vmatprep.mubr.msk.bf16.mxu0 %vm5871_vm9, %v5870_v60  ;;  %5561 = vmatprep.mubr.msk.bf16.mxu1 %vm5871_vm9, %v5870_v60 }
 0x456   :  { %5565 = vmatprep.subr.bf16.mxu0 %v5870_v60  ;;  %5571 = vmatprep.subr.bf16.mxu1 %v5870_v60 }
 0x45b   :  { %5556 = vmatmul.mubr.msk.bf16.vlgmr.msra.gmra.mxu0 %vm1563_vm4, %v3353_v38  ;;  %5562 = vmatmul.mubr.msk.bf16.vlgmr.msra.gmra.mxu1 %vm1563_vm4, %v3407_v44  ;;  %v5849_v38 = vld [vmem:[%s7449_s9 + $0x28] sm:$0xff]   ;;  %v5850_v44 = vld [vmem:[%s7449_s9 + $0x20] sm:$0xff]  }
 0x45c   :  { %5566 = vmatpush3.bf16.msra.mxu0 %v5822_v36  ;;  %5572 = vmatpush3.bf16.msra.mxu1 %v5823_v27  ;;  %v5851_v36 = vld [vmem:[%s7449_s9 + $0x18] sm:$0xff]   ;;  %v5852_v27 = vld [vmem:[%s7449_s9 + $0x10] sm:$0xff]  }
 0x45d   :  { %5567 = vmatprep.mubr.msk.bf16.mxu0 %vm5871_vm9, %v5870_v60  ;;  %5573 = vmatprep.mubr.msk.bf16.mxu1 %vm5871_vm9, %v5870_v60 }
 0x45e   :  { %5577 = vmatprep.subr.bf16.mxu0 %v5870_v60  ;;  %5583 = vmatprep.subr.bf16.mxu1 %v5870_v60 }
 0x463   :  { %5568 = vmatmul.mubr.msk.bf16.vlgmr.msra.gmra.mxu0 %vm1563_vm4, %v3461_v5  ;;  %5574 = vmatmul.mubr.msk.bf16.vlgmr.msra.gmra.mxu1 %vm1563_vm4, %v3515_v41 }
 0x464   :  { %5578 = vmatpush3.bf16.msra.mxu0 %v5824_v37  ;;  %5584 = vmatpush3.bf16.msra.mxu1 %v5825_v25 }
 0x465   :  { %5579 = vmatprep.mubr.msk.bf16.mxu0 %vm5871_vm9, %v5870_v60  ;;  %5585 = vmatprep.mubr.msk.bf16.mxu1 %vm5871_vm9, %v5870_v60 }
 0x466   :  { %5589 = vmatprep.subr.bf16.mxu0 %v5870_v60  ;;  %5595 = vmatprep.subr.bf16.mxu1 %v5870_v60 }
 0x46b   :  { %5580 = vmatmul.mubr.msk.bf16.vlgmr.msra.gmra.mxu0 %vm1563_vm4, %v3569_v39  ;;  %5586 = vmatmul.mubr.msk.bf16.vlgmr.msra.gmra.mxu1 %vm1563_vm4, %v3623_v10 }
 0x46c   :  { %5590 = vmatpush3.bf16.msra.mxu0 %v5826_v32  ;;  %5596 = vmatpush3.bf16.msra.mxu1 %v5827_v52 }
 0x46d   :  { %5591 = vmatprep.mubr.msk.bf16.mxu0 %vm5871_vm9, %v5870_v60  ;;  %5597 = vmatprep.mubr.msk.bf16.mxu1 %vm5871_vm9, %v5870_v60 }
 0x46e   :  { %5601 = vmatprep.subr.bf16.mxu0 %v5870_v60  ;;  %5607 = vmatprep.subr.bf16.mxu1 %v5870_v60 }
 0x473   :  { %5592 = vmatmul.mubr.msk.bf16.vlgmr.msra.gmra.mxu0 %vm1563_vm4, %v3677_v3  ;;  %5598 = vmatmul.mubr.msk.bf16.vlgmr.msra.gmra.mxu1 %vm1563_vm4, %v3731_v8 }
 0x474   :  { %5602 = vmatpush3.bf16.msra.mxu0 %v5828_v1  ;;  %5608 = vmatpush3.bf16.msra.mxu1 %v5829_v58 }
 0x475   :  { %5603 = vmatprep.mubr.msk.bf16.mxu0 %vm5871_vm9, %v5870_v60  ;;  %5609 = vmatprep.mubr.msk.bf16.mxu1 %vm5871_vm9, %v5870_v60 }
 0x476   :  { %5613 = vmatprep.subr.bf16.mxu0 %v5870_v60  ;;  %5619 = vmatprep.subr.bf16.mxu1 %v5870_v60 }
 0x47b   :  { %5604 = vmatmul.mubr.msk.bf16.vlgmr.msra.gmra.mxu0 %vm1563_vm4, %v3785_v6  ;;  %5610 = vmatmul.mubr.msk.bf16.vlgmr.msra.gmra.mxu1 %vm1563_vm4, %v3839_v47 }
 0x47c   :  { %5614 = vmatpush3.bf16.msra.mxu0 %v5830_v54  ;;  %5620 = vmatpush3.bf16.msra.mxu1 %v5831_v9 }
 0x47d   :  { %5615 = vmatprep.mubr.msk.bf16.mxu0 %vm5871_vm9, %v5870_v60  ;;  %5621 = vmatprep.mubr.msk.bf16.mxu1 %vm5871_vm9, %v5870_v60 }
 0x47e   :  { %5625 = vmatprep.subr.bf16.mxu0 %v5870_v60  ;;  %5631 = vmatprep.subr.bf16.mxu1 %v5870_v60 }
 0x483   :  { %5616 = vmatmul.mubr.msk.bf16.vlgmr.msra.gmra.mxu0 %vm1563_vm4, %v3893_v51  ;;  %5622 = vmatmul.mubr.msk.bf16.vlgmr.msra.gmra.mxu1 %vm1563_vm4, %v3947_v62 }
 0x484   :  { %5626 = vmatpush3.bf16.msra.mxu0 %v5832_v4  ;;  %5632 = vmatpush3.bf16.msra.mxu1 %v5833_v2 }
 0x485   :  { %5627 = vmatprep.mubr.msk.bf16.mxu0 %vm5871_vm9, %v5870_v60  ;;  %5633 = vmatprep.mubr.msk.bf16.mxu1 %vm5871_vm9, %v5870_v60 }
 0x486   :  { %5637 = vmatprep.subr.bf16.mxu0 %v5870_v60  ;;  %5643 = vmatprep.subr.bf16.mxu1 %v5870_v60 }
 0x48b   :  { %5628 = vmatmul.mubr.msk.bf16.vlgmr.msra.gmra.mxu0 %vm1563_vm4, %v4001_v46  ;;  %5634 = vmatmul.mubr.msk.bf16.vlgmr.msra.gmra.mxu1 %vm1563_vm4, %v4055_v24 }
 0x48c   :  { %5638 = vmatpush3.bf16.msra.mxu0 %v5834_v16  ;;  %5644 = vmatpush3.bf16.msra.mxu1 %v5835_v28 }
 0x48d   :  { %5639 = vmatprep.mubr.msk.bf16.mxu0 %vm5871_vm9, %v5870_v60  ;;  %5645 = vmatprep.mubr.msk.bf16.mxu1 %vm5871_vm9, %v5870_v60 }
 0x48e   :  { %5649 = vmatprep.subr.bf16.mxu0 %v5870_v60  ;;  %5655 = vmatprep.subr.bf16.mxu1 %v5870_v60 }
 0x493   :  { %5640 = vmatmul.mubr.msk.bf16.vlgmr.msra.gmra.mxu0 %vm1563_vm4, %v4109_v0  ;;  %5646 = vmatmul.mubr.msk.bf16.vlgmr.msra.gmra.mxu1 %vm1563_vm4, %v4163_v50 }
 0x494   :  { %5650 = vmatpush3.bf16.msra.mxu0 %v5836_v45  ;;  %5656 = vmatpush3.bf16.msra.mxu1 %v5837_v53 }
 0x495   :  { %5651 = vmatprep.mubr.msk.bf16.mxu0 %vm5871_vm9, %v5870_v60  ;;  %5657 = vmatprep.mubr.msk.bf16.mxu1 %vm5871_vm9, %v5870_v60 }
 0x496   :  { %5661 = vmatprep.subr.bf16.mxu0 %v5870_v60  ;;  %5667 = vmatprep.subr.bf16.mxu1 %v5870_v60 }
 0x49b   :  { %5652 = vmatmul.mubr.msk.bf16.vlgmr.msra.gmra.mxu0 %vm1563_vm4, %v4217_v49  ;;  %5658 = vmatmul.mubr.msk.bf16.vlgmr.msra.gmra.mxu1 %vm1563_vm4, %v4271_v12 }
 0x49c   :  { %5662 = vmatpush3.bf16.msra.mxu0 %v5838_v20  ;;  %5663 = vmatprep.mubr.msk.bf16.mxu0 %vm5871_vm9, %v5870_v60 }
 0x49d   :  { %5683 = vmatprep.mubr.msk.bf16.mxu1 %vm5871_vm9, %v5870_v60  ;;  %5687 = vmatprep.subr.bf16.mxu0 %v5870_v60 }
 0x49e   :  { %5668 = vmatpush3.bf16.msra.mxu1 %v5839_v21 }
 0x49f   :  { %5669 = vmatprep.subr.bf16.mxu1 %v5870_v60 }
 0x4a2   :  { %5670 = vmatpush3.bf16.msra.mxu1 %v5840_v18 }
 0x4a3   :  { %5664 = vmatmul.mubr.msk.bf16.vlgmr.msra.gmra.mxu0 %vm1563_vm4, %v4325_v61  ;;  %5671 = vmatprep.subr.bf16.mxu1 %v5870_v60 }
 0x4a4   :  { %5703 = vmatprep.mubr.msk.bf16.mxu0 %vm5871_vm9, %v5870_v60  ;;  %5688 = vmatpush3.bf16.msra.mxu0 %v5847_v14 }
 0x4a5   :  { %5689 = vmatprep.subr.bf16.mxu0 %v5870_v60 }
 0x4a6   :  { %5672 = vmatpush3.bf16.msra.mxu1 %v5841_v31 }
 0x4a7   :  { %5673 = vmatprep.subr.bf16.mxu1 %v5870_v60 }
 0x4a8   :  { %5690 = vmatpush3.bf16.msra.mxu0 %v5848_v13 }
 0x4a9   :  { %5691 = vmatprep.subr.bf16.mxu0 %v5870_v60 }
 0x4aa   :  { %5674 = vmatpush3.bf16.msra.mxu1 %v5842_v33 }
 0x4ab   :  { %5675 = vmatprep.subr.bf16.mxu1 %v5870_v60 }
 0x4ac   :  { %5692 = vmatpush3.bf16.msra.mxu0 %v5849_v38 }
 0x4ad   :  { %5693 = vmatprep.subr.bf16.mxu0 %v5870_v60 }
 0x4ae   :  { %5676 = vmatpush3.bf16.msra.mxu1 %v5843_v34 }
 0x4af   :  { %5677 = vmatprep.subr.bf16.mxu1 %v5870_v60 }
 0x4b0   :  { %5694 = vmatpush3.bf16.msra.mxu0 %v5850_v44 }
 0x4b1   :  { %5695 = vmatprep.subr.bf16.mxu0 %v5870_v60 }
 0x4b2   :  { %5678 = vmatpush3.bf16.msra.mxu1 %v5844_v35 }
 0x4b3   :  { %5679 = vmatprep.subr.bf16.mxu1 %v5870_v60 }
 0x4b4   :  { %5696 = vmatpush3.bf16.msra.mxu0 %v5851_v36 }
 0x4b5   :  { %5697 = vmatprep.subr.bf16.mxu0 %v5870_v60 }
 0x4b6   :  { %5680 = vmatpush3.bf16.msra.mxu1 %v5845_v17 }
 0x4b7   :  { %5681 = vmatprep.subr.bf16.mxu1 %v5870_v60 }
 0x4b8   :  { %5698 = vmatpush3.bf16.msra.mxu0 %v5852_v27 }
 0x4b9   :  { %5699 = vmatprep.subr.bf16.mxu0 %v5870_v60 }
 0x4ba   :  { %5682 = vmatpush3.bf16.msra.mxu1 %v5846_v48 }
 0x503   :  { %v3081_v19 = vpop.f32.mrf.mxu0  ;;  %v3130_v40 = vpop.f32.mrf.mxu1 }
 0x504   :  { %v3131_v2 = vadd.f32 %v3130_v40, %v3081_v19 }
 0x505   :  { %v5521_v37 = vpop.f32.mrf.mxu0  ;;  %v5527_v5 = vpop.f32.mrf.mxu1 }
 0x507   :  { %v3084_v25 = vpop.f32.mrf.mxu0  ;;  %v3133_v41 = vpop.f32.mrf.mxu1 }
 0x509   :  { %v5522_v15 = vpop.f32.mrf.mxu0  ;;  %v5528_v23 = vpop.f32.mrf.mxu1 }
 0x50b   :  { %v3183_v32 = vpop.f32.mrf.mxu0  ;;  %v3237_v39 = vpop.f32.mrf.mxu1 }
 0x50c   :  { %v3189_v46 = vadd.f32 %v3183_v32, %v3131_v2 }
 0x50d   :  { %v5533_v52 = vpop.f32.mrf.mxu0  ;;  %v5539_v10 = vpop.f32.mrf.mxu1 }
 0x50e   :  { %v3243_v43 = vadd.f32 %v3237_v39, %v3189_v46 }
 0x50f   :  { %v3186_v29 = vpop.f32.mrf.mxu0  ;;  %v3240_v57 = vpop.f32.mrf.mxu1 }
 0x511   :  { %v5534_v3 = vpop.f32.mrf.mxu0  ;;  %v5540_v8 = vpop.f32.mrf.mxu1 }
 0x513   :  { %v3291_v1 = vpop.f32.mrf.mxu0  ;;  %v3345_v58 = vpop.f32.mrf.mxu1 }
 0x514   :  { %v3297_v45 = vadd.f32 %v3291_v1, %v3243_v43 }
 0x515   :  { %v5545_v63 = vpop.f32.mrf.mxu0  ;;  %v5551_v59 = vpop.f32.mrf.mxu1 }
 0x516   :  { %v3351_v12 = vadd.f32 %v3345_v58, %v3297_v45 }
 0x517   :  { %v3294_v6 = vpop.f32.mrf.mxu0  ;;  %v3348_v47 = vpop.f32.mrf.mxu1 }
 0x519   :  { %v5546_v54 = vpop.f32.mrf.mxu0  ;;  %v5552_v9 = vpop.f32.mrf.mxu1 }
 0x51b   :  { %v3399_v56 = vpop.f32.mrf.mxu0  ;;  %v3453_v42 = vpop.f32.mrf.mxu1 }
 0x51c   :  { %v3405_v61 = vadd.f32 %v3399_v56, %v3351_v12 }
 0x51d   :  { %v5557_v51 = vpop.f32.mrf.mxu0  ;;  %v5563_v62 = vpop.f32.mrf.mxu1 }
 0x51e   :  { %v3459_v34 = vadd.f32 %v3453_v42, %v3405_v61 }
 0x51f   :  { %v3402_v4 = vpop.f32.mrf.mxu0  ;;  %v3456_v55 = vpop.f32.mrf.mxu1 }
 0x521   :  { %v5558_v26 = vpop.f32.mrf.mxu0  ;;  %v5564_v24 = vpop.f32.mrf.mxu1 }
 0x523   :  { %v3507_v16 = vpop.f32.mrf.mxu0  ;;  %v3561_v28 = vpop.f32.mrf.mxu1 }
 0x524   :  { %v3513_v48 = vadd.f32 %v3507_v16, %v3459_v34 }
 0x525   :  { %v5569_v30 = vpop.f32.mrf.mxu0  ;;  %v5575_v0 = vpop.f32.mrf.mxu1 }
 0x526   :  { %v3567_v36 = vadd.f32 %v3561_v28, %v3513_v48 }
 0x527   :  { %v3510_v50 = vpop.f32.mrf.mxu0  ;;  %v3564_v53 = vpop.f32.mrf.mxu1 }
 0x529   :  { %v5570_v22 = vpop.f32.mrf.mxu0  ;;  %v5576_v7 = vpop.f32.mrf.mxu1 }
 0x52b   :  { %v3615_v49 = vpop.f32.mrf.mxu0  ;;  %v3669_v20 = vpop.f32.mrf.mxu1 }
 0x52c   :  { %v3621_v40 = vadd.f32 %v3615_v49, %v3567_v36 }
 0x52d   :  { %v5581_v11 = vpop.f32.mrf.mxu0  ;;  %v5587_v21 = vpop.f32.mrf.mxu1 }
 0x52e   :  { %v3675_v15 = vadd.f32 %v3669_v20, %v3621_v40 }
 0x52f   :  { %v3618_v18 = vpop.f32.mrf.mxu0  ;;  %v3672_v31 = vpop.f32.mrf.mxu1 }
 0x531   :  { %v5582_v33 = vpop.f32.mrf.mxu0  ;;  %v5588_v35 = vpop.f32.mrf.mxu1 }
 0x533   :  { %v3723_v17 = vpop.f32.mrf.mxu0  ;;  %v3777_v14 = vpop.f32.mrf.mxu1 }
 0x534   :  { %v3729_v39 = vadd.f32 %v3723_v17, %v3675_v15 }
 0x535   :  { %v5593_v13 = vpop.f32.mrf.mxu0  ;;  %v5599_v38 = vpop.f32.mrf.mxu1 }
 0x536   :  { %v3783_v3 = vadd.f32 %v3777_v14, %v3729_v39  ;;  %v4964_v14 = vld [vmem:[%s7446_s6] ss:$0 sm:$0xff] }
 0x537   :  { %v3726_v44 = vpop.f32.mrf.mxu0  ;;  %v3780_v27 = vpop.f32.mrf.mxu1 }
 0x539   :  { %v5594_v19 = vpop.f32.mrf.mxu0  ;;  %v5600_v37 = vpop.f32.mrf.mxu1 }
 0x53a   :  { %v5853_v37 = vld [vmem:[%s7449_s9 + $0x8] sm:$0xff]  }
 0x53b   :  { %v3831_v5 = vpop.f32.mrf.mxu0  ;;  %v3885_v25 = vpop.f32.mrf.mxu1  ;;  %5700 = vmatpush3.bf16.msra.mxu0 %v5853_v37 }
 0x53c   :  { %v3837_v58 = vadd.f32 %v3831_v5, %v3783_v3  ;;  %5701 = vmatprep.subr.bf16.mxu0 %v5870_v60  ;;  %v5854_v5 = vld [vmem:[%s7449_s9] sm:$0xff]  }
 0x53d   :  { %v5605_v41 = vpop.f32.mrf.mxu0  ;;  %v5611_v23 = vpop.f32.mrf.mxu1  ;;  %v4974_v60 = vld [vmem:[%s7450_s10] ss:$0 sm:$0xff] }
 0x53e   :  { %v3891_v54 = vadd.f32 %v3885_v25, %v3837_v58  ;;  %v4965_v25 = vld [vmem:[%s7448_s8] ss:$0 sm:$0xff] }
 0x53f   :  { %v3834_v32 = vpop.f32.mrf.mxu0  ;;  %v3888_v52 = vpop.f32.mrf.mxu1  ;;  %5702 = vmatpush3.bf16.msra.mxu0 %v5854_v5 }
 0x541   :  { %v5606_v10 = vpop.f32.mrf.mxu0  ;;  %v5612_v29 = vpop.f32.mrf.mxu1 }
 0x543   :  { %v3939_v57 = vpop.f32.mrf.mxu0  ;;  %v3993_v8 = vpop.f32.mrf.mxu1 }
 0x544   :  { %v3945_v42 = vadd.f32 %v3939_v57, %v3891_v54 }
 0x545   :  { %v5617_v1 = vpop.f32.mrf.mxu0  ;;  %v5623_v63 = vpop.f32.mrf.mxu1 }
 0x546   :  { %v3999_v55 = vadd.f32 %v3993_v8, %v3945_v42 }
 0x547   :  { %v3942_v59 = vpop.f32.mrf.mxu0  ;;  %v3996_v6 = vpop.f32.mrf.mxu1 }
 0x549   :  { %v5618_v47 = vpop.f32.mrf.mxu0  ;;  %v5624_v9 = vpop.f32.mrf.mxu1 }
 0x54b   :  { %v4047_v56 = vpop.f32.mrf.mxu0  ;;  %v4101_v51 = vpop.f32.mrf.mxu1 }
 0x54c   :  { %v4053_v24 = vadd.f32 %v4047_v56, %v3999_v55 }
 0x54d   :  { %v5629_v62 = vpop.f32.mrf.mxu0  ;;  %v5635_v4 = vpop.f32.mrf.mxu1 }
 0x54e   :  { %v4107_v0 = vadd.f32 %v4101_v51, %v4053_v24 }
 0x54f   :  { %v4050_v2 = vpop.f32.mrf.mxu0  ;;  %v4104_v26 = vpop.f32.mrf.mxu1 }
 0x551   :  { %v5630_v46 = vpop.f32.mrf.mxu0  ;;  %v5636_v16 = vpop.f32.mrf.mxu1 }
 0x553   :  { %v4155_v28 = vpop.f32.mrf.mxu0  ;;  %v4209_v30 = vpop.f32.mrf.mxu1 }
 0x554   :  { %v4161_v53 = vadd.f32 %v4155_v28, %v4107_v0 }
 0x555   :  { %v5641_v43 = vpop.f32.mrf.mxu0  ;;  %v5647_v50 = vpop.f32.mrf.mxu1 }
 0x556   :  { %v4215_v20 = vadd.f32 %v4209_v30, %v4161_v53 }
 0x557   :  { %v4158_v45 = vpop.f32.mrf.mxu0  ;;  %v4212_v22 = vpop.f32.mrf.mxu1 }
 0x559   :  { %v5642_v7 = vpop.f32.mrf.mxu0  ;;  %v5648_v49 = vpop.f32.mrf.mxu1 }
 0x55b   :  { %v4263_v12 = vpop.f32.mrf.mxu0  ;;  %v4317_v11 = vpop.f32.mrf.mxu1 }
 0x55c   :  { %v4269_v21 = vadd.f32 %v4263_v12, %v4215_v20 }
 0x55d   :  { %v5653_v61 = vpop.f32.mrf.mxu0  ;;  %v5659_v18 = vpop.f32.mrf.mxu1 }
 0x55e   :  { %v4323_v35 = vadd.f32 %v4317_v11, %v4269_v21 }
 0x55f   :  { %v4266_v31 = vpop.f32.mrf.mxu0  ;;  %v4320_v33 = vpop.f32.mrf.mxu1 }
 0x561   :  { %v5654_v34 = vpop.f32.mrf.mxu0  ;;  %v5660_v17 = vpop.f32.mrf.mxu1 }
 0x563   :  { %v4371_v48 = vpop.f32.mrf.mxu0 }
 0x564   :  { %v4377_v13 = vadd.f32 %v4371_v48, %v4323_v35 }
 0x565   :  { %v5665_v38 = vpop.f32.mrf.mxu0 }
 0x566   :  { %v4385_v44 = vadd.f32 %v4964_v14, %v4377_v13 }
 0x567   :  { %v4374_v36 = vpop.f32.mrf.mxu0 }
 0x568   :  { %v4386_v27 = vmax.f32 %v4385_v44, 0.0 }
 0x569   :  { %v5666_v19 = vpop.f32.mrf.mxu0 }
 0x56a   :  { %v4387_v40 = vpack.c.bf16 %v4386_v27, %v4386_v27 }
 0x56c   :  { %5684 = vmatmul.mubr.bf16.vlgmr.msra.gmra.mxu1 %v4387_v40 }
 0x62c   :  { %v4493_v41 = vpop.f32.mrf.mxu1 }
 0x62d   :  { %v4494_v15 = vadd.f32 %v4965_v25, %v4493_v41 }
 0x62e   :  { %v5685_v23 = vpop.f32.mrf.mxu1 }
 0x62f   :  { %v4499_v32 = vmax.f32 %v4494_v15, 0.0 }
 0x630   :  { %v4496_v39 = vpop.f32.mrf.mxu1 }
 0x631   :  { %v4500_v52 = vpack.c.bf16 %v4499_v32, %v4499_v32 }
 0x632   :  { %v5686_v10 = vpop.f32.mrf.mxu1 }
 0x633   :  { %5704 = vmatmul.mubr.bf16.vlgmr.msra.gmra.mxu0 %v4500_v52 }
 0x6f3   :  { %v4606_v29 = vpop.f32.mrf.mxu0 }
 0x6f4   :  { %v4607_v57 = vadd.f32 %v4974_v60, %v4606_v29 }
 0x6f5   :  { %v5705_v3 = vpop.f32.mrf.mxu0 }
 0x6f6   :  { %4612 = vst [vmem:[%s7451_s11] sm:$0xff] %v4607_v57 }
 0x6f7   :  { %v4609_v8 = vpop.f32.mrf.mxu0 }
 0x6f9   :  { %v5706_v1 = vpop.f32.mrf.mxu0 }

</bundles_post_ra>
